<compile_context>
chip_gen: v5e
topology: v5e:2x2
jax: 0.10.0
libtpu: 0.0.40
codegen_flags: <defaults>
</compile_context>

<pallas_src>
import functools

import jax
import jax.numpy as jnp
from jax import lax
from jax.experimental import pallas as pl
from jax.experimental.pallas import tpu as pltpu

_LANE_PAD = 128  # halo (in lanes) around the flattened image inside the scratch


# ---------------------------- fused Pallas kernel ----------------------------

def _seg_kernel(x_ref,
                w1_ref, b1_ref, w2_ref, b2_ref,      # down DoubleConv
                w3_ref, b3_ref, w4_ref, b4_ref,      # prefinal DoubleConv
                tw_ref, tb_ref,                      # ConvTranspose2d(2F->F, k=2, s=2)
                w5_ref, b5_ref, w6_ref, b6_ref,      # up DoubleConv
                fw_ref, fb_ref,                      # final 1x1 conv
                o_ref,
                pad_ref,                             # VMEM scratch (rows, PAD+HW+PAD)
                *, H, W, feat):
    F = feat
    HW = H * W
    PAD = _LANE_PAD
    f32 = jnp.float32

    # Halo columns are zeroed once per image; every layer only rewrites the
    # interior [PAD, PAD+HW), so out-of-image taps always read zeros.
    pad_ref[...] = jnp.zeros_like(pad_ref)

    # flat index -> (row, col) of the full-resolution raster (H, W powers of two)
    pos = lax.broadcasted_iota(jnp.int32, (1, HW), 1)
    row = pos >> (W.bit_length() - 1)
    col = pos & (W - 1)

    def stage(x):
        # Park a (C, HW) activation in the zero-padded flat scratch.
        C = x.shape[0]
        pad_ref[:C, PAD:PAD + HW] = x
        return C

    def tap(C, dy, dx):
        # value[c, p] = staged[c, p + dy*W + dx]  (shifted flat window, halo -> 0)
        s = dy * W + dx
        return pad_ref[:C, PAD + s:PAD + s + HW]

    def conv3x3(x, w_ref, b_ref, *, step, relu=True):
        # step=1: dense raster.  step=2: activation holds the half-res image
        # embedded at even (row, col), so taps stride by 2 pixels.
        # Single lane-dense MXU matmul: (Cout, 9C) @ (9C, HW).
        C = stage(x)
        cols = []
        for dy in (-1, 0, 1):
            for dx in (-1, 0, 1):
                v = tap(C, dy * step, dx * step)
                r = row + dy * step
                c = col + dx * step
                valid = (r >= 0) & (r < H) & (c >= 0) & (c < W)
                cols.append(jnp.where(valid, v, 0.0))
        im2col = jnp.concatenate(cols, axis=0)                       # (9C, HW)
        y = jnp.dot(w_ref[...], im2col, preferred_element_type=f32) + b_ref[...]
        return jnp.maximum(y, 0.0) if relu else y

    def maxpool2(x):
        # 2x2 stride-2 max pool.  Result stays on the full-res raster, valid at
        # even (row, col) positions only ("embedded" half-res image).
        C = stage(x)
        m = tap(C, 0, 0)
        for dy, dx in ((0, 1), (1, 0), (1, 1)):
            m = jnp.maximum(m, tap(C, dy, dx))
        return m

    def conv_transpose2x2(x_emb):
        # x_emb: (2F, HW) half-res image embedded at even (row, col).
        # out[:, (2i+di)*W + 2j+dj] = tw[di,dj] @ x_low[:, i, j] + tb
        up = jnp.zeros((F, HW), f32)
        for t, (di, dj) in enumerate(((0, 0), (0, 1), (1, 0), (1, 1))):
            y = jnp.dot(tw_ref[t], x_emb, preferred_element_type=f32)   # (F, HW)
            C = stage(y)
            shifted = tap(C, -di, -dj)            # shifted[p] = y[p - (di*W + dj)]
            par = ((row & 1) == di) & ((col & 1) == dj)
            up = up + jnp.where(par, shifted, 0.0)
        return up + tb_ref[...]

    x = x_ref[...].astype(f32)                    # (8, HW): channels zero-padded 3 -> 8

    # down DoubleConv -> skip
    x = conv3x3(x, w1_ref, b1_ref, step=1)
    x = conv3x3(x, w2_ref, b2_ref, step=1)
    skip = x                                      # (F, HW)

    # 2x2 max-pool onto the embedded half-res grid
    x = maxpool2(x)

    # prefinal DoubleConv at half resolution (stride-2 taps on the embedded grid)
    x = conv3x3(x, w3_ref, b3_ref, step=2)
    x = conv3x3(x, w4_ref, b4_ref, step=2)

    # ConvTranspose2d upsample + channel concat (skip first) -- all in-kernel
    x = conv_transpose2x2(x)
    x = jnp.concatenate([skip, x], axis=0)        # (2F, HW)

    # up DoubleConv
    x = conv3x3(x, w5_ref, b5_ref, step=1)
    x = conv3x3(x, w6_ref, b6_ref, step=1)

    # final 1x1 conv
    o_ref[...] = jnp.dot(fw_ref[...], x, preferred_element_type=f32) + fb_ref[...]


# ---------------------------- wrapper ----------------------------

def _pack_conv3x3(w, cin_pad=None):
    # (3, 3, Cin, Cout) [HWIO] -> (Cout, 9*Cin); column order = tap-major
    # ((dy,dx) raster order), channel-minor.  Optionally zero-pad Cin.
    kh, kw, ci, co = w.shape
    if cin_pad is not None and cin_pad > ci:
        w = jnp.pad(w, ((0, 0), (0, 0), (0, cin_pad - ci), (0, 0)))
        ci = cin_pad
    return jnp.transpose(w.reshape(kh * kw, ci, co), (2, 0, 1)).reshape(co, kh * kw * ci)


def _pack_bias(b):
    return jnp.transpose(b)      # (1, C) -> (C, 1)


def segmentation_cnn_forward(image_nchw, params):
    N, Cin, H, W = image_nchw.shape
    assert H & (H - 1) == 0 and W & (W - 1) == 0, "H, W must be powers of two"
    F = params["d_w2"].shape[-1]
    Cout = params["f_w"].shape[-1]
    HW = H * W
    Cp = 8                        # pad input channels to the f32 sublane granule

    x = image_nchw.reshape(N, Cin, HW).astype(jnp.float32)
    x = jnp.pad(x, ((0, 0), (0, Cp - Cin), (0, 0)))

    # repack weights into kernel layout (tiny, fused by XLA)
    w1 = _pack_conv3x3(params["d_w1"], cin_pad=Cp)
    w2 = _pack_conv3x3(params["d_w2"])
    w3 = _pack_conv3x3(params["p_w1"])
    w4 = _pack_conv3x3(params["p_w2"])
    w5 = _pack_conv3x3(params["u_w1"])
    w6 = _pack_conv3x3(params["u_w2"])
    tw = jnp.transpose(params["t_w"].reshape(4, 2 * F, F), (0, 2, 1))   # (4, F, 2F)
    fw = jnp.transpose(params["f_w"])                                   # (Cout, F)
    b1, b2, b3, b4 = map(_pack_bias, (params["d_b1"], params["d_b2"],
                                      params["p_b1"], params["p_b2"]))
    tb, b5, b6, fb = map(_pack_bias, (params["t_b"], params["u_b1"],
                                      params["u_b2"], params["f_b"]))

    def full(*shape):
        d = len(shape)
        return pl.BlockSpec(shape, lambda n: (0,) * d)

    rows = max(2 * F, Cp)
    out = pl.pallas_call(
        functools.partial(_seg_kernel, H=H, W=W, feat=F),
        out_shape=jax.ShapeDtypeStruct((N, Cout, HW), jnp.float32),
        grid=(N,),
        in_specs=[
            pl.BlockSpec((None, Cp, HW), lambda n: (n, 0, 0)),
            full(F, 9 * Cp), full(F, 1),
            full(F, 9 * F), full(F, 1),
            full(2 * F, 9 * F), full(2 * F, 1),
            full(2 * F, 9 * 2 * F), full(2 * F, 1),
            full(4, F, 2 * F), full(F, 1),
            full(F, 9 * 2 * F), full(F, 1),
            full(F, 9 * F), full(F, 1),
            full(Cout, F), full(Cout, 1),
        ],
        out_specs=pl.BlockSpec((None, Cout, HW), lambda n: (n, 0, 0)),
        scratch_shapes=[
            pltpu.VMEM((rows, _LANE_PAD + HW + _LANE_PAD), jnp.float32)],
        compiler_params=pltpu.CompilerParams(
            dimension_semantics=("parallel",)),   # one batch image per TensorCore on v7x
    )(x, w1, b1, w2, b2, w3, b3, w4, b4, tw, tb, w5, b5, w6, b6, fw, fb)

    return out.reshape(N, Cout, H, W)


# ---------------------------- parameters ----------------------------

def init_params(key, in_channels=3, out_channels=1, feature=8, scale=0.1):
    ks = jax.random.split(key, 16)
    k = iter(ks)

    def w(shape):
        return scale * jax.random.normal(next(k), shape, dtype=jnp.float32)

    def b(c):
        return scale * jax.random.normal(next(k), (1, c), dtype=jnp.float32)

    F = feature
    return dict(
        # down: DoubleConv(in_channels, F)
        d_w1=w((3, 3, in_channels, F)), d_b1=b(F),
        d_w2=w((3, 3, F, F)), d_b2=b(F),
        # prefinal: DoubleConv(F, 2F)
        p_w1=w((3, 3, F, 2 * F)), p_b1=b(2 * F),
        p_w2=w((3, 3, 2 * F, 2 * F)), p_b2=b(2 * F),
        # up transpose: ConvTranspose2d(2F, F, k=2, s=2)  (weights as (kH, kW, Cin, Cout))
        t_w=w((2, 2, 2 * F, F)), t_b=b(F),
        # up: DoubleConv(2F, F)
        u_w1=w((3, 3, 2 * F, F)), u_b1=b(F),
        u_w2=w((3, 3, F, F)), u_b2=b(F),
        # final: Conv2d(F, out_channels, k=1)
        f_w=w((F, out_channels)), f_b=b(out_channels),
    )


# ---------------------------- pure-JAX reference ----------------------------

def _ref_conv3x3(x, w, b, relu=True):
    y = lax.conv_general_dilated(x, w, (1, 1), "SAME",
                                 dimension_numbers=("NHWC", "HWIO", "NHWC")) + b[0]
    return jnp.maximum(y, 0.0) if relu else y


def _ref_maxpool2(x):
    return lax.reduce_window(x, -jnp.inf, lax.max,
                             (1, 2, 2, 1), (1, 2, 2, 1), "VALID")


def _ref_convT2x2(x, w, b):
    N, H, W, _ = x.shape
    Cout = w.shape[-1]
    y = jnp.einsum("nhwc,ijco->nhwijo", x, w)          # (N,H,W,2,2,Cout)
    y = jnp.transpose(y, (0, 1, 3, 2, 4, 5)).reshape(N, 2 * H, 2 * W, Cout)
    return y + b[0]


def _ref_forward(image_nchw, params):
    x = jnp.transpose(image_nchw, (0, 2, 3, 1)).astype(jnp.float32)
    x = _ref_conv3x3(x, params["d_w1"], params["d_b1"])
    x = _ref_conv3x3(x, params["d_w2"], params["d_b2"])
    skip = x
    x = _ref_maxpool2(x)
    x = _ref_conv3x3(x, params["p_w1"], params["p_b1"])
    x = _ref_conv3x3(x, params["p_w2"], params["p_b2"])
    x = _ref_convT2x2(x, params["t_w"], params["t_b"])
    x = jnp.concatenate([skip, x], axis=-1)
    x = _ref_conv3x3(x, params["u_w1"], params["u_b1"])
    x = _ref_conv3x3(x, params["u_w2"], params["u_b2"])
    x = jnp.einsum("nhwc,co->nhwo", x, params["f_w"]) + params["f_b"][0]
    return jnp.transpose(x, (0, 3, 1, 2))


# ---------------------------- main ----------------------------

if __name__ == "__main__":
    N, C_IN, H, W = 2, 3, 16, 16
    FEATURE, C_OUT = 8, 1

    key = jax.random.PRNGKey(0)
    k_img, k_par = jax.random.split(key)
    image = jax.random.normal(k_img, (N, C_IN, H, W), dtype=jnp.float32)  # NCHW like PyTorch
    params = init_params(k_par, in_channels=C_IN, out_channels=C_OUT, feature=FEATURE)

    fwd = jax.jit(segmentation_cnn_forward)
    out = jax.block_until_ready(fwd(image, params))
    assert out.shape == (N, C_OUT, H, W), out.shape

    ref = jax.block_until_ready(_ref_forward(image, params))
    err = float(jnp.max(jnp.abs(out - ref)))
    assert jnp.allclose(out, ref, atol=1e-3, rtol=1e-3), err

    print("KERNEL_OK")
</pallas_src>

<mosaic_0001>
module attributes {stable_mosaic.version = 11 : i64} {
  func.func @_seg_kernel(%arg0: i32, %arg1: memref<1x8x256xf32, #tpu.memory_space<vmem>>, %arg2: memref<8x72xf32, #tpu.memory_space<vmem>>, %arg3: memref<8x1xf32, #tpu.memory_space<vmem>>, %arg4: memref<8x72xf32, #tpu.memory_space<vmem>>, %arg5: memref<8x1xf32, #tpu.memory_space<vmem>>, %arg6: memref<16x72xf32, #tpu.memory_space<vmem>>, %arg7: memref<16x1xf32, #tpu.memory_space<vmem>>, %arg8: memref<16x144xf32, #tpu.memory_space<vmem>>, %arg9: memref<16x1xf32, #tpu.memory_space<vmem>>, %arg10: memref<4x8x16xf32, #tpu.memory_space<vmem>>, %arg11: memref<8x1xf32, #tpu.memory_space<vmem>>, %arg12: memref<8x144xf32, #tpu.memory_space<vmem>>, %arg13: memref<8x1xf32, #tpu.memory_space<vmem>>, %arg14: memref<8x72xf32, #tpu.memory_space<vmem>>, %arg15: memref<8x1xf32, #tpu.memory_space<vmem>>, %arg16: memref<1x8xf32, #tpu.memory_space<vmem>>, %arg17: memref<1x1xf32, #tpu.memory_space<vmem>>, %arg18: memref<1x1x256xf32, #tpu.memory_space<vmem>>, %arg19: memref<16x512xf32, #tpu.memory_space<vmem>>) attributes {dimension_semantics = [#tpu.dimension_semantics<parallel>], iteration_bounds = array<i64: 2>, scalar_prefetch = 0 : i64, scratch_operands = 1 : i64, tpu.core_type = #tpu.core_type<tc>, window_params = [{transform_indices = @transform_0, window_bounds = array<i64: 1, 8, 256>}, {pipeline_mode = #tpu.pipeline_mode<synchronous>, transform_indices = @transform_1, window_bounds = array<i64: 8, 72>}, {pipeline_mode = #tpu.pipeline_mode<synchronous>, transform_indices = @transform_2, window_bounds = array<i64: 8, 1>}, {pipeline_mode = #tpu.pipeline_mode<synchronous>, transform_indices = @transform_3, window_bounds = array<i64: 8, 72>}, {pipeline_mode = #tpu.pipeline_mode<synchronous>, transform_indices = @transform_4, window_bounds = array<i64: 8, 1>}, {pipeline_mode = #tpu.pipeline_mode<synchronous>, transform_indices = @transform_5, window_bounds = array<i64: 16, 72>}, {pipeline_mode = #tpu.pipeline_mode<synchronous>, transform_indices = @transform_6, window_bounds = array<i64: 16, 1>}, {pipeline_mode = #tpu.pipeline_mode<synchronous>, transform_indices = @transform_7, window_bounds = array<i64: 16, 144>}, {pipeline_mode = #tpu.pipeline_mode<synchronous>, transform_indices = @transform_8, window_bounds = array<i64: 16, 1>}, {pipeline_mode = #tpu.pipeline_mode<synchronous>, transform_indices = @transform_9, window_bounds = array<i64: 4, 8, 16>}, {pipeline_mode = #tpu.pipeline_mode<synchronous>, transform_indices = @transform_10, window_bounds = array<i64: 8, 1>}, {pipeline_mode = #tpu.pipeline_mode<synchronous>, transform_indices = @transform_11, window_bounds = array<i64: 8, 144>}, {pipeline_mode = #tpu.pipeline_mode<synchronous>, transform_indices = @transform_12, window_bounds = array<i64: 8, 1>}, {pipeline_mode = #tpu.pipeline_mode<synchronous>, transform_indices = @transform_13, window_bounds = array<i64: 8, 72>}, {pipeline_mode = #tpu.pipeline_mode<synchronous>, transform_indices = @transform_14, window_bounds = array<i64: 8, 1>}, {pipeline_mode = #tpu.pipeline_mode<synchronous>, transform_indices = @transform_15, window_bounds = array<i64: 1, 8>}, {pipeline_mode = #tpu.pipeline_mode<synchronous>, transform_indices = @transform_16, window_bounds = array<i64: 1, 1>}, {transform_indices = @transform_17, window_bounds = array<i64: 1, 1, 256>}]} {
    %cst = arith.constant 0.000000e+00 : f32
    %0 = vector.broadcast %cst : f32 to vector<16x512xf32>
    %c0 = arith.constant 0 : index
    %c0_0 = arith.constant 0 : index
    %1 = vector.load %arg19[%c0, %c0_0] : memref<16x512xf32, #tpu.memory_space<vmem>>, vector<16x512xf32>
    tpu.vector_store %arg19[%c0, %c0_0], %0 {strides = array<i32>} : memref<16x512xf32, #tpu.memory_space<vmem>>, vector<16x512xf32>,
    %2 = tpu.iota {dimensions = array<i32: 1>} : vector<1x256xi32>
    %c4_i32 = arith.constant 4 : i32
    %3 = vector.broadcast %c4_i32 : i32 to vector<1x256xi32>
    %4 = arith.shrsi %2, %3 : vector<1x256xi32>
    %c15_i32 = arith.constant 15 : i32
    %5 = vector.broadcast %c15_i32 : i32 to vector<1x256xi32>
    %6 = arith.andi %2, %5 : vector<1x256xi32>
    %c0_1 = arith.constant 0 : index
    %c0_2 = arith.constant 0 : index
    %c0_3 = arith.constant 0 : index
    %7 = vector.load %arg1[%c0_1, %c0_2, %c0_3] : memref<1x8x256xf32, #tpu.memory_space<vmem>>, vector<1x8x256xf32>
    %8 = vector.shape_cast %7 : vector<1x8x256xf32> to vector<8x256xf32>
    %c0_4 = arith.constant 0 : index
    %c128 = arith.constant 128 : index
    %9 = vector.load %arg19[%c0_4, %c128] : memref<16x512xf32, #tpu.memory_space<vmem>>, vector<8x256xf32>
    tpu.vector_store %arg19[%c0_4, %c128], %8 {strides = array<i32>} : memref<16x512xf32, #tpu.memory_space<vmem>>, vector<8x256xf32>,
    %c0_5 = arith.constant 0 : index
    %c111 = arith.constant 111 : index
    %10 = vector.load %arg19[%c0_5, %c111] : memref<16x512xf32, #tpu.memory_space<vmem>>, vector<8x256xf32>
    %c-1_i32 = arith.constant -1 : i32
    %11 = vector.broadcast %c-1_i32 : i32 to vector<1x256xi32>
    %12 = arith.addi %4, %11 : vector<1x256xi32>
    %c-1_i32_6 = arith.constant -1 : i32
    %13 = vector.broadcast %c-1_i32_6 : i32 to vector<1x256xi32>
    %14 = arith.addi %6, %13 : vector<1x256xi32>
    %c0_i32 = arith.constant 0 : i32
    %15 = vector.broadcast %c0_i32 : i32 to vector<1x256xi32>
    %16 = arith.cmpi sge, %12, %15 : vector<1x256xi32>
    %c16_i32 = arith.constant 16 : i32
    %17 = vector.broadcast %c16_i32 : i32 to vector<1x256xi32>
    %18 = arith.cmpi slt, %12, %17 : vector<1x256xi32>
    %19 = arith.andi %16, %18 : vector<1x256xi1>
    %c0_i32_7 = arith.constant 0 : i32
    %20 = vector.broadcast %c0_i32_7 : i32 to vector<1x256xi32>
    %21 = arith.cmpi sge, %14, %20 : vector<1x256xi32>
    %22 = arith.andi %19, %21 : vector<1x256xi1>
    %c16_i32_8 = arith.constant 16 : i32
    %23 = vector.broadcast %c16_i32_8 : i32 to vector<1x256xi32>
    %24 = arith.cmpi slt, %14, %23 : vector<1x256xi32>
    %25 = arith.andi %22, %24 : vector<1x256xi1>
    %cst_9 = arith.constant 0.000000e+00 : f32
    %26 = vector.shape_cast %25 : vector<1x256xi1> to vector<1x256xi1>
    %27 = vector.broadcast %26 : vector<1x256xi1> to vector<8x256xi1>
    %28 = vector.broadcast %cst_9 : f32 to vector<8x256xf32>
    %29 = arith.select %27, %10, %28 : vector<8x256xi1>, vector<8x256xf32>
    %c0_10 = arith.constant 0 : index
    %c112 = arith.constant 112 : index
    %30 = vector.load %arg19[%c0_10, %c112] : memref<16x512xf32, #tpu.memory_space<vmem>>, vector<8x256xf32>
    %c-1_i32_11 = arith.constant -1 : i32
    %31 = vector.broadcast %c-1_i32_11 : i32 to vector<1x256xi32>
    %32 = arith.addi %4, %31 : vector<1x256xi32>
    %c0_i32_12 = arith.constant 0 : i32
    %33 = vector.broadcast %c0_i32_12 : i32 to vector<1x256xi32>
    %34 = arith.addi %6, %33 : vector<1x256xi32>
    %c0_i32_13 = arith.constant 0 : i32
    %35 = vector.broadcast %c0_i32_13 : i32 to vector<1x256xi32>
    %36 = arith.cmpi sge, %32, %35 : vector<1x256xi32>
    %c16_i32_14 = arith.constant 16 : i32
    %37 = vector.broadcast %c16_i32_14 : i32 to vector<1x256xi32>
    %38 = arith.cmpi slt, %32, %37 : vector<1x256xi32>
    %39 = arith.andi %36, %38 : vector<1x256xi1>
    %c0_i32_15 = arith.constant 0 : i32
    %40 = vector.broadcast %c0_i32_15 : i32 to vector<1x256xi32>
    %41 = arith.cmpi sge, %34, %40 : vector<1x256xi32>
    %42 = arith.andi %39, %41 : vector<1x256xi1>
    %c16_i32_16 = arith.constant 16 : i32
    %43 = vector.broadcast %c16_i32_16 : i32 to vector<1x256xi32>
    %44 = arith.cmpi slt, %34, %43 : vector<1x256xi32>
    %45 = arith.andi %42, %44 : vector<1x256xi1>
    %cst_17 = arith.constant 0.000000e+00 : f32
    %46 = vector.shape_cast %45 : vector<1x256xi1> to vector<1x256xi1>
    %47 = vector.broadcast %46 : vector<1x256xi1> to vector<8x256xi1>
    %48 = vector.broadcast %cst_17 : f32 to vector<8x256xf32>
    %49 = arith.select %47, %30, %48 : vector<8x256xi1>, vector<8x256xf32>
    %c0_18 = arith.constant 0 : index
    %c113 = arith.constant 113 : index
    %50 = vector.load %arg19[%c0_18, %c113] : memref<16x512xf32, #tpu.memory_space<vmem>>, vector<8x256xf32>
    %c-1_i32_19 = arith.constant -1 : i32
    %51 = vector.broadcast %c-1_i32_19 : i32 to vector<1x256xi32>
    %52 = arith.addi %4, %51 : vector<1x256xi32>
    %c1_i32 = arith.constant 1 : i32
    %53 = vector.broadcast %c1_i32 : i32 to vector<1x256xi32>
    %54 = arith.addi %6, %53 : vector<1x256xi32>
    %c0_i32_20 = arith.constant 0 : i32
    %55 = vector.broadcast %c0_i32_20 : i32 to vector<1x256xi32>
    %56 = arith.cmpi sge, %52, %55 : vector<1x256xi32>
    %c16_i32_21 = arith.constant 16 : i32
    %57 = vector.broadcast %c16_i32_21 : i32 to vector<1x256xi32>
    %58 = arith.cmpi slt, %52, %57 : vector<1x256xi32>
    %59 = arith.andi %56, %58 : vector<1x256xi1>
    %c0_i32_22 = arith.constant 0 : i32
    %60 = vector.broadcast %c0_i32_22 : i32 to vector<1x256xi32>
    %61 = arith.cmpi sge, %54, %60 : vector<1x256xi32>
    %62 = arith.andi %59, %61 : vector<1x256xi1>
    %c16_i32_23 = arith.constant 16 : i32
    %63 = vector.broadcast %c16_i32_23 : i32 to vector<1x256xi32>
    %64 = arith.cmpi slt, %54, %63 : vector<1x256xi32>
    %65 = arith.andi %62, %64 : vector<1x256xi1>
    %cst_24 = arith.constant 0.000000e+00 : f32
    %66 = vector.shape_cast %65 : vector<1x256xi1> to vector<1x256xi1>
    %67 = vector.broadcast %66 : vector<1x256xi1> to vector<8x256xi1>
    %68 = vector.broadcast %cst_24 : f32 to vector<8x256xf32>
    %69 = arith.select %67, %50, %68 : vector<8x256xi1>, vector<8x256xf32>
    %c0_25 = arith.constant 0 : index
    %c127 = arith.constant 127 : index
    %70 = vector.load %arg19[%c0_25, %c127] : memref<16x512xf32, #tpu.memory_space<vmem>>, vector<8x256xf32>
    %c0_i32_26 = arith.constant 0 : i32
    %71 = vector.broadcast %c0_i32_26 : i32 to vector<1x256xi32>
    %72 = arith.addi %4, %71 : vector<1x256xi32>
    %c-1_i32_27 = arith.constant -1 : i32
    %73 = vector.broadcast %c-1_i32_27 : i32 to vector<1x256xi32>
    %74 = arith.addi %6, %73 : vector<1x256xi32>
    %c0_i32_28 = arith.constant 0 : i32
    %75 = vector.broadcast %c0_i32_28 : i32 to vector<1x256xi32>
    %76 = arith.cmpi sge, %72, %75 : vector<1x256xi32>
    %c16_i32_29 = arith.constant 16 : i32
    %77 = vector.broadcast %c16_i32_29 : i32 to vector<1x256xi32>
    %78 = arith.cmpi slt, %72, %77 : vector<1x256xi32>
    %79 = arith.andi %76, %78 : vector<1x256xi1>
    %c0_i32_30 = arith.constant 0 : i32
    %80 = vector.broadcast %c0_i32_30 : i32 to vector<1x256xi32>
    %81 = arith.cmpi sge, %74, %80 : vector<1x256xi32>
    %82 = arith.andi %79, %81 : vector<1x256xi1>
    %c16_i32_31 = arith.constant 16 : i32
    %83 = vector.broadcast %c16_i32_31 : i32 to vector<1x256xi32>
    %84 = arith.cmpi slt, %74, %83 : vector<1x256xi32>
    %85 = arith.andi %82, %84 : vector<1x256xi1>
    %cst_32 = arith.constant 0.000000e+00 : f32
    %86 = vector.shape_cast %85 : vector<1x256xi1> to vector<1x256xi1>
    %87 = vector.broadcast %86 : vector<1x256xi1> to vector<8x256xi1>
    %88 = vector.broadcast %cst_32 : f32 to vector<8x256xf32>
    %89 = arith.select %87, %70, %88 : vector<8x256xi1>, vector<8x256xf32>
    %c0_33 = arith.constant 0 : index
    %c128_34 = arith.constant 128 : index
    %90 = vector.load %arg19[%c0_33, %c128_34] : memref<16x512xf32, #tpu.memory_space<vmem>>, vector<8x256xf32>
    %c0_i32_35 = arith.constant 0 : i32
    %91 = vector.broadcast %c0_i32_35 : i32 to vector<1x256xi32>
    %92 = arith.addi %4, %91 : vector<1x256xi32>
    %c0_i32_36 = arith.constant 0 : i32
    %93 = vector.broadcast %c0_i32_36 : i32 to vector<1x256xi32>
    %94 = arith.addi %6, %93 : vector<1x256xi32>
    %c0_i32_37 = arith.constant 0 : i32
    %95 = vector.broadcast %c0_i32_37 : i32 to vector<1x256xi32>
    %96 = arith.cmpi sge, %92, %95 : vector<1x256xi32>
    %c16_i32_38 = arith.constant 16 : i32
    %97 = vector.broadcast %c16_i32_38 : i32 to vector<1x256xi32>
    %98 = arith.cmpi slt, %92, %97 : vector<1x256xi32>
    %99 = arith.andi %96, %98 : vector<1x256xi1>
    %c0_i32_39 = arith.constant 0 : i32
    %100 = vector.broadcast %c0_i32_39 : i32 to vector<1x256xi32>
    %101 = arith.cmpi sge, %94, %100 : vector<1x256xi32>
    %102 = arith.andi %99, %101 : vector<1x256xi1>
    %c16_i32_40 = arith.constant 16 : i32
    %103 = vector.broadcast %c16_i32_40 : i32 to vector<1x256xi32>
    %104 = arith.cmpi slt, %94, %103 : vector<1x256xi32>
    %105 = arith.andi %102, %104 : vector<1x256xi1>
    %cst_41 = arith.constant 0.000000e+00 : f32
    %106 = vector.shape_cast %105 : vector<1x256xi1> to vector<1x256xi1>
    %107 = vector.broadcast %106 : vector<1x256xi1> to vector<8x256xi1>
    %108 = vector.broadcast %cst_41 : f32 to vector<8x256xf32>
    %109 = arith.select %107, %90, %108 : vector<8x256xi1>, vector<8x256xf32>
    %c0_42 = arith.constant 0 : index
    %c129 = arith.constant 129 : index
    %110 = vector.load %arg19[%c0_42, %c129] : memref<16x512xf32, #tpu.memory_space<vmem>>, vector<8x256xf32>
    %c0_i32_43 = arith.constant 0 : i32
    %111 = vector.broadcast %c0_i32_43 : i32 to vector<1x256xi32>
    %112 = arith.addi %4, %111 : vector<1x256xi32>
    %c1_i32_44 = arith.constant 1 : i32
    %113 = vector.broadcast %c1_i32_44 : i32 to vector<1x256xi32>
    %114 = arith.addi %6, %113 : vector<1x256xi32>
    %c0_i32_45 = arith.constant 0 : i32
    %115 = vector.broadcast %c0_i32_45 : i32 to vector<1x256xi32>
    %116 = arith.cmpi sge, %112, %115 : vector<1x256xi32>
    %c16_i32_46 = arith.constant 16 : i32
    %117 = vector.broadcast %c16_i32_46 : i32 to vector<1x256xi32>
    %118 = arith.cmpi slt, %112, %117 : vector<1x256xi32>
    %119 = arith.andi %116, %118 : vector<1x256xi1>
    %c0_i32_47 = arith.constant 0 : i32
    %120 = vector.broadcast %c0_i32_47 : i32 to vector<1x256xi32>
    %121 = arith.cmpi sge, %114, %120 : vector<1x256xi32>
    %122 = arith.andi %119, %121 : vector<1x256xi1>
    %c16_i32_48 = arith.constant 16 : i32
    %123 = vector.broadcast %c16_i32_48 : i32 to vector<1x256xi32>
    %124 = arith.cmpi slt, %114, %123 : vector<1x256xi32>
    %125 = arith.andi %122, %124 : vector<1x256xi1>
    %cst_49 = arith.constant 0.000000e+00 : f32
    %126 = vector.shape_cast %125 : vector<1x256xi1> to vector<1x256xi1>
    %127 = vector.broadcast %126 : vector<1x256xi1> to vector<8x256xi1>
    %128 = vector.broadcast %cst_49 : f32 to vector<8x256xf32>
    %129 = arith.select %127, %110, %128 : vector<8x256xi1>, vector<8x256xf32>
    %c0_50 = arith.constant 0 : index
    %c143 = arith.constant 143 : index
    %130 = vector.load %arg19[%c0_50, %c143] : memref<16x512xf32, #tpu.memory_space<vmem>>, vector<8x256xf32>
    %c1_i32_51 = arith.constant 1 : i32
    %131 = vector.broadcast %c1_i32_51 : i32 to vector<1x256xi32>
    %132 = arith.addi %4, %131 : vector<1x256xi32>
    %c-1_i32_52 = arith.constant -1 : i32
    %133 = vector.broadcast %c-1_i32_52 : i32 to vector<1x256xi32>
    %134 = arith.addi %6, %133 : vector<1x256xi32>
    %c0_i32_53 = arith.constant 0 : i32
    %135 = vector.broadcast %c0_i32_53 : i32 to vector<1x256xi32>
    %136 = arith.cmpi sge, %132, %135 : vector<1x256xi32>
    %c16_i32_54 = arith.constant 16 : i32
    %137 = vector.broadcast %c16_i32_54 : i32 to vector<1x256xi32>
    %138 = arith.cmpi slt, %132, %137 : vector<1x256xi32>
    %139 = arith.andi %136, %138 : vector<1x256xi1>
    %c0_i32_55 = arith.constant 0 : i32
    %140 = vector.broadcast %c0_i32_55 : i32 to vector<1x256xi32>
    %141 = arith.cmpi sge, %134, %140 : vector<1x256xi32>
    %142 = arith.andi %139, %141 : vector<1x256xi1>
    %c16_i32_56 = arith.constant 16 : i32
    %143 = vector.broadcast %c16_i32_56 : i32 to vector<1x256xi32>
    %144 = arith.cmpi slt, %134, %143 : vector<1x256xi32>
    %145 = arith.andi %142, %144 : vector<1x256xi1>
    %cst_57 = arith.constant 0.000000e+00 : f32
    %146 = vector.shape_cast %145 : vector<1x256xi1> to vector<1x256xi1>
    %147 = vector.broadcast %146 : vector<1x256xi1> to vector<8x256xi1>
    %148 = vector.broadcast %cst_57 : f32 to vector<8x256xf32>
    %149 = arith.select %147, %130, %148 : vector<8x256xi1>, vector<8x256xf32>
    %c0_58 = arith.constant 0 : index
    %c144 = arith.constant 144 : index
    %150 = vector.load %arg19[%c0_58, %c144] : memref<16x512xf32, #tpu.memory_space<vmem>>, vector<8x256xf32>
    %c1_i32_59 = arith.constant 1 : i32
    %151 = vector.broadcast %c1_i32_59 : i32 to vector<1x256xi32>
    %152 = arith.addi %4, %151 : vector<1x256xi32>
    %c0_i32_60 = arith.constant 0 : i32
    %153 = vector.broadcast %c0_i32_60 : i32 to vector<1x256xi32>
    %154 = arith.addi %6, %153 : vector<1x256xi32>
    %c0_i32_61 = arith.constant 0 : i32
    %155 = vector.broadcast %c0_i32_61 : i32 to vector<1x256xi32>
    %156 = arith.cmpi sge, %152, %155 : vector<1x256xi32>
    %c16_i32_62 = arith.constant 16 : i32
    %157 = vector.broadcast %c16_i32_62 : i32 to vector<1x256xi32>
    %158 = arith.cmpi slt, %152, %157 : vector<1x256xi32>
    %159 = arith.andi %156, %158 : vector<1x256xi1>
    %c0_i32_63 = arith.constant 0 : i32
    %160 = vector.broadcast %c0_i32_63 : i32 to vector<1x256xi32>
    %161 = arith.cmpi sge, %154, %160 : vector<1x256xi32>
    %162 = arith.andi %159, %161 : vector<1x256xi1>
    %c16_i32_64 = arith.constant 16 : i32
    %163 = vector.broadcast %c16_i32_64 : i32 to vector<1x256xi32>
    %164 = arith.cmpi slt, %154, %163 : vector<1x256xi32>
    %165 = arith.andi %162, %164 : vector<1x256xi1>
    %cst_65 = arith.constant 0.000000e+00 : f32
    %166 = vector.shape_cast %165 : vector<1x256xi1> to vector<1x256xi1>
    %167 = vector.broadcast %166 : vector<1x256xi1> to vector<8x256xi1>
    %168 = vector.broadcast %cst_65 : f32 to vector<8x256xf32>
    %169 = arith.select %167, %150, %168 : vector<8x256xi1>, vector<8x256xf32>
    %c0_66 = arith.constant 0 : index
    %c145 = arith.constant 145 : index
    %170 = vector.load %arg19[%c0_66, %c145] : memref<16x512xf32, #tpu.memory_space<vmem>>, vector<8x256xf32>
    %c1_i32_67 = arith.constant 1 : i32
    %171 = vector.broadcast %c1_i32_67 : i32 to vector<1x256xi32>
    %172 = arith.addi %4, %171 : vector<1x256xi32>
    %c1_i32_68 = arith.constant 1 : i32
    %173 = vector.broadcast %c1_i32_68 : i32 to vector<1x256xi32>
    %174 = arith.addi %6, %173 : vector<1x256xi32>
    %c0_i32_69 = arith.constant 0 : i32
    %175 = vector.broadcast %c0_i32_69 : i32 to vector<1x256xi32>
    %176 = arith.cmpi sge, %172, %175 : vector<1x256xi32>
    %c16_i32_70 = arith.constant 16 : i32
    %177 = vector.broadcast %c16_i32_70 : i32 to vector<1x256xi32>
    %178 = arith.cmpi slt, %172, %177 : vector<1x256xi32>
    %179 = arith.andi %176, %178 : vector<1x256xi1>
    %c0_i32_71 = arith.constant 0 : i32
    %180 = vector.broadcast %c0_i32_71 : i32 to vector<1x256xi32>
    %181 = arith.cmpi sge, %174, %180 : vector<1x256xi32>
    %182 = arith.andi %179, %181 : vector<1x256xi1>
    %c16_i32_72 = arith.constant 16 : i32
    %183 = vector.broadcast %c16_i32_72 : i32 to vector<1x256xi32>
    %184 = arith.cmpi slt, %174, %183 : vector<1x256xi32>
    %185 = arith.andi %182, %184 : vector<1x256xi1>
    %cst_73 = arith.constant 0.000000e+00 : f32
    %186 = vector.shape_cast %185 : vector<1x256xi1> to vector<1x256xi1>
    %187 = vector.broadcast %186 : vector<1x256xi1> to vector<8x256xi1>
    %188 = vector.broadcast %cst_73 : f32 to vector<8x256xf32>
    %189 = arith.select %187, %170, %188 : vector<8x256xi1>, vector<8x256xf32>
    %190 = tpu.concatenate %29, %49, %69, %89, %109, %129, %149, %169, %189 in 0 : vector<8x256xf32>, vector<8x256xf32>, vector<8x256xf32>, vector<8x256xf32>, vector<8x256xf32>, vector<8x256xf32>, vector<8x256xf32>, vector<8x256xf32>, vector<8x256xf32> -> vector<72x256xf32>
    %c0_74 = arith.constant 0 : index
    %c0_75 = arith.constant 0 : index
    %191 = vector.load %arg2[%c0_74, %c0_75] : memref<8x72xf32, #tpu.memory_space<vmem>>, vector<8x72xf32>
    %cst_76 = arith.constant dense<0.000000e+00> : vector<8x256xf32>
    %192 = tpu.matmul %191, %190, %cst_76 {dimension_numbers = #tpu.dot_dimension_numbers<[1], [0], [0], [1], [0, 0, 1, 1], [], []>} : vector<8x72xf32>, vector<72x256xf32>, vector<8x256xf32> -> vector<8x256xf32>
    %c0_77 = arith.constant 0 : index
    %c0_78 = arith.constant 0 : index
    %193 = vector.load %arg3[%c0_77, %c0_78] : memref<8x1xf32, #tpu.memory_space<vmem>>, vector<8x1xf32>
    %194 = vector.broadcast %193 : vector<8x1xf32> to vector<8x256xf32>
    %195 = arith.addf %192, %194 : vector<8x256xf32>
    %cst_79 = arith.constant 0.000000e+00 : f32
    %196 = vector.broadcast %cst_79 : f32 to vector<8x256xf32>
    %197 = arith.maximumf %195, %196 : vector<8x256xf32>
    %c0_80 = arith.constant 0 : index
    %c128_81 = arith.constant 128 : index
    %198 = vector.load %arg19[%c0_80, %c128_81] : memref<16x512xf32, #tpu.memory_space<vmem>>, vector<8x256xf32>
    tpu.vector_store %arg19[%c0_80, %c128_81], %197 {strides = array<i32>} : memref<16x512xf32, #tpu.memory_space<vmem>>, vector<8x256xf32>,
    %c0_82 = arith.constant 0 : index
    %c111_83 = arith.constant 111 : index
    %199 = vector.load %arg19[%c0_82, %c111_83] : memref<16x512xf32, #tpu.memory_space<vmem>>, vector<8x256xf32>
    %c-1_i32_84 = arith.constant -1 : i32
    %200 = vector.broadcast %c-1_i32_84 : i32 to vector<1x256xi32>
    %201 = arith.addi %4, %200 : vector<1x256xi32>
    %c-1_i32_85 = arith.constant -1 : i32
    %202 = vector.broadcast %c-1_i32_85 : i32 to vector<1x256xi32>
    %203 = arith.addi %6, %202 : vector<1x256xi32>
    %c0_i32_86 = arith.constant 0 : i32
    %204 = vector.broadcast %c0_i32_86 : i32 to vector<1x256xi32>
    %205 = arith.cmpi sge, %201, %204 : vector<1x256xi32>
    %c16_i32_87 = arith.constant 16 : i32
    %206 = vector.broadcast %c16_i32_87 : i32 to vector<1x256xi32>
    %207 = arith.cmpi slt, %201, %206 : vector<1x256xi32>
    %208 = arith.andi %205, %207 : vector<1x256xi1>
    %c0_i32_88 = arith.constant 0 : i32
    %209 = vector.broadcast %c0_i32_88 : i32 to vector<1x256xi32>
    %210 = arith.cmpi sge, %203, %209 : vector<1x256xi32>
    %211 = arith.andi %208, %210 : vector<1x256xi1>
    %c16_i32_89 = arith.constant 16 : i32
    %212 = vector.broadcast %c16_i32_89 : i32 to vector<1x256xi32>
    %213 = arith.cmpi slt, %203, %212 : vector<1x256xi32>
    %214 = arith.andi %211, %213 : vector<1x256xi1>
    %cst_90 = arith.constant 0.000000e+00 : f32
    %215 = vector.shape_cast %214 : vector<1x256xi1> to vector<1x256xi1>
    %216 = vector.broadcast %215 : vector<1x256xi1> to vector<8x256xi1>
    %217 = vector.broadcast %cst_90 : f32 to vector<8x256xf32>
    %218 = arith.select %216, %199, %217 : vector<8x256xi1>, vector<8x256xf32>
    %c0_91 = arith.constant 0 : index
    %c112_92 = arith.constant 112 : index
    %219 = vector.load %arg19[%c0_91, %c112_92] : memref<16x512xf32, #tpu.memory_space<vmem>>, vector<8x256xf32>
    %c-1_i32_93 = arith.constant -1 : i32
    %220 = vector.broadcast %c-1_i32_93 : i32 to vector<1x256xi32>
    %221 = arith.addi %4, %220 : vector<1x256xi32>
    %c0_i32_94 = arith.constant 0 : i32
    %222 = vector.broadcast %c0_i32_94 : i32 to vector<1x256xi32>
    %223 = arith.addi %6, %222 : vector<1x256xi32>
    %c0_i32_95 = arith.constant 0 : i32
    %224 = vector.broadcast %c0_i32_95 : i32 to vector<1x256xi32>
    %225 = arith.cmpi sge, %221, %224 : vector<1x256xi32>
    %c16_i32_96 = arith.constant 16 : i32
    %226 = vector.broadcast %c16_i32_96 : i32 to vector<1x256xi32>
    %227 = arith.cmpi slt, %221, %226 : vector<1x256xi32>
    %228 = arith.andi %225, %227 : vector<1x256xi1>
    %c0_i32_97 = arith.constant 0 : i32
    %229 = vector.broadcast %c0_i32_97 : i32 to vector<1x256xi32>
    %230 = arith.cmpi sge, %223, %229 : vector<1x256xi32>
    %231 = arith.andi %228, %230 : vector<1x256xi1>
    %c16_i32_98 = arith.constant 16 : i32
    %232 = vector.broadcast %c16_i32_98 : i32 to vector<1x256xi32>
    %233 = arith.cmpi slt, %223, %232 : vector<1x256xi32>
    %234 = arith.andi %231, %233 : vector<1x256xi1>
    %cst_99 = arith.constant 0.000000e+00 : f32
    %235 = vector.shape_cast %234 : vector<1x256xi1> to vector<1x256xi1>
    %236 = vector.broadcast %235 : vector<1x256xi1> to vector<8x256xi1>
    %237 = vector.broadcast %cst_99 : f32 to vector<8x256xf32>
    %238 = arith.select %236, %219, %237 : vector<8x256xi1>, vector<8x256xf32>
    %c0_100 = arith.constant 0 : index
    %c113_101 = arith.constant 113 : index
    %239 = vector.load %arg19[%c0_100, %c113_101] : memref<16x512xf32, #tpu.memory_space<vmem>>, vector<8x256xf32>
    %c-1_i32_102 = arith.constant -1 : i32
    %240 = vector.broadcast %c-1_i32_102 : i32 to vector<1x256xi32>
    %241 = arith.addi %4, %240 : vector<1x256xi32>
    %c1_i32_103 = arith.constant 1 : i32
    %242 = vector.broadcast %c1_i32_103 : i32 to vector<1x256xi32>
    %243 = arith.addi %6, %242 : vector<1x256xi32>
    %c0_i32_104 = arith.constant 0 : i32
    %244 = vector.broadcast %c0_i32_104 : i32 to vector<1x256xi32>
    %245 = arith.cmpi sge, %241, %244 : vector<1x256xi32>
    %c16_i32_105 = arith.constant 16 : i32
    %246 = vector.broadcast %c16_i32_105 : i32 to vector<1x256xi32>
    %247 = arith.cmpi slt, %241, %246 : vector<1x256xi32>
    %248 = arith.andi %245, %247 : vector<1x256xi1>
    %c0_i32_106 = arith.constant 0 : i32
    %249 = vector.broadcast %c0_i32_106 : i32 to vector<1x256xi32>
    %250 = arith.cmpi sge, %243, %249 : vector<1x256xi32>
    %251 = arith.andi %248, %250 : vector<1x256xi1>
    %c16_i32_107 = arith.constant 16 : i32
    %252 = vector.broadcast %c16_i32_107 : i32 to vector<1x256xi32>
    %253 = arith.cmpi slt, %243, %252 : vector<1x256xi32>
    %254 = arith.andi %251, %253 : vector<1x256xi1>
    %cst_108 = arith.constant 0.000000e+00 : f32
    %255 = vector.shape_cast %254 : vector<1x256xi1> to vector<1x256xi1>
    %256 = vector.broadcast %255 : vector<1x256xi1> to vector<8x256xi1>
    %257 = vector.broadcast %cst_108 : f32 to vector<8x256xf32>
    %258 = arith.select %256, %239, %257 : vector<8x256xi1>, vector<8x256xf32>
    %c0_109 = arith.constant 0 : index
    %c127_110 = arith.constant 127 : index
    %259 = vector.load %arg19[%c0_109, %c127_110] : memref<16x512xf32, #tpu.memory_space<vmem>>, vector<8x256xf32>
    %c0_i32_111 = arith.constant 0 : i32
    %260 = vector.broadcast %c0_i32_111 : i32 to vector<1x256xi32>
    %261 = arith.addi %4, %260 : vector<1x256xi32>
    %c-1_i32_112 = arith.constant -1 : i32
    %262 = vector.broadcast %c-1_i32_112 : i32 to vector<1x256xi32>
    %263 = arith.addi %6, %262 : vector<1x256xi32>
    %c0_i32_113 = arith.constant 0 : i32
    %264 = vector.broadcast %c0_i32_113 : i32 to vector<1x256xi32>
    %265 = arith.cmpi sge, %261, %264 : vector<1x256xi32>
    %c16_i32_114 = arith.constant 16 : i32
    %266 = vector.broadcast %c16_i32_114 : i32 to vector<1x256xi32>
    %267 = arith.cmpi slt, %261, %266 : vector<1x256xi32>
    %268 = arith.andi %265, %267 : vector<1x256xi1>
    %c0_i32_115 = arith.constant 0 : i32
    %269 = vector.broadcast %c0_i32_115 : i32 to vector<1x256xi32>
    %270 = arith.cmpi sge, %263, %269 : vector<1x256xi32>
    %271 = arith.andi %268, %270 : vector<1x256xi1>
    %c16_i32_116 = arith.constant 16 : i32
    %272 = vector.broadcast %c16_i32_116 : i32 to vector<1x256xi32>
    %273 = arith.cmpi slt, %263, %272 : vector<1x256xi32>
    %274 = arith.andi %271, %273 : vector<1x256xi1>
    %cst_117 = arith.constant 0.000000e+00 : f32
    %275 = vector.shape_cast %274 : vector<1x256xi1> to vector<1x256xi1>
    %276 = vector.broadcast %275 : vector<1x256xi1> to vector<8x256xi1>
    %277 = vector.broadcast %cst_117 : f32 to vector<8x256xf32>
    %278 = arith.select %276, %259, %277 : vector<8x256xi1>, vector<8x256xf32>
    %c0_118 = arith.constant 0 : index
    %c128_119 = arith.constant 128 : index
    %279 = vector.load %arg19[%c0_118, %c128_119] : memref<16x512xf32, #tpu.memory_space<vmem>>, vector<8x256xf32>
    %c0_i32_120 = arith.constant 0 : i32
    %280 = vector.broadcast %c0_i32_120 : i32 to vector<1x256xi32>
    %281 = arith.addi %4, %280 : vector<1x256xi32>
    %c0_i32_121 = arith.constant 0 : i32
    %282 = vector.broadcast %c0_i32_121 : i32 to vector<1x256xi32>
    %283 = arith.addi %6, %282 : vector<1x256xi32>
    %c0_i32_122 = arith.constant 0 : i32
    %284 = vector.broadcast %c0_i32_122 : i32 to vector<1x256xi32>
    %285 = arith.cmpi sge, %281, %284 : vector<1x256xi32>
    %c16_i32_123 = arith.constant 16 : i32
    %286 = vector.broadcast %c16_i32_123 : i32 to vector<1x256xi32>
    %287 = arith.cmpi slt, %281, %286 : vector<1x256xi32>
    %288 = arith.andi %285, %287 : vector<1x256xi1>
    %c0_i32_124 = arith.constant 0 : i32
    %289 = vector.broadcast %c0_i32_124 : i32 to vector<1x256xi32>
    %290 = arith.cmpi sge, %283, %289 : vector<1x256xi32>
    %291 = arith.andi %288, %290 : vector<1x256xi1>
    %c16_i32_125 = arith.constant 16 : i32
    %292 = vector.broadcast %c16_i32_125 : i32 to vector<1x256xi32>
    %293 = arith.cmpi slt, %283, %292 : vector<1x256xi32>
    %294 = arith.andi %291, %293 : vector<1x256xi1>
    %cst_126 = arith.constant 0.000000e+00 : f32
    %295 = vector.shape_cast %294 : vector<1x256xi1> to vector<1x256xi1>
    %296 = vector.broadcast %295 : vector<1x256xi1> to vector<8x256xi1>
    %297 = vector.broadcast %cst_126 : f32 to vector<8x256xf32>
    %298 = arith.select %296, %279, %297 : vector<8x256xi1>, vector<8x256xf32>
    %c0_127 = arith.constant 0 : index
    %c129_128 = arith.constant 129 : index
    %299 = vector.load %arg19[%c0_127, %c129_128] : memref<16x512xf32, #tpu.memory_space<vmem>>, vector<8x256xf32>
    %c0_i32_129 = arith.constant 0 : i32
    %300 = vector.broadcast %c0_i32_129 : i32 to vector<1x256xi32>
    %301 = arith.addi %4, %300 : vector<1x256xi32>
    %c1_i32_130 = arith.constant 1 : i32
    %302 = vector.broadcast %c1_i32_130 : i32 to vector<1x256xi32>
    %303 = arith.addi %6, %302 : vector<1x256xi32>
    %c0_i32_131 = arith.constant 0 : i32
    %304 = vector.broadcast %c0_i32_131 : i32 to vector<1x256xi32>
    %305 = arith.cmpi sge, %301, %304 : vector<1x256xi32>
    %c16_i32_132 = arith.constant 16 : i32
    %306 = vector.broadcast %c16_i32_132 : i32 to vector<1x256xi32>
    %307 = arith.cmpi slt, %301, %306 : vector<1x256xi32>
    %308 = arith.andi %305, %307 : vector<1x256xi1>
    %c0_i32_133 = arith.constant 0 : i32
    %309 = vector.broadcast %c0_i32_133 : i32 to vector<1x256xi32>
    %310 = arith.cmpi sge, %303, %309 : vector<1x256xi32>
    %311 = arith.andi %308, %310 : vector<1x256xi1>
    %c16_i32_134 = arith.constant 16 : i32
    %312 = vector.broadcast %c16_i32_134 : i32 to vector<1x256xi32>
    %313 = arith.cmpi slt, %303, %312 : vector<1x256xi32>
    %314 = arith.andi %311, %313 : vector<1x256xi1>
    %cst_135 = arith.constant 0.000000e+00 : f32
    %315 = vector.shape_cast %314 : vector<1x256xi1> to vector<1x256xi1>
    %316 = vector.broadcast %315 : vector<1x256xi1> to vector<8x256xi1>
    %317 = vector.broadcast %cst_135 : f32 to vector<8x256xf32>
    %318 = arith.select %316, %299, %317 : vector<8x256xi1>, vector<8x256xf32>
    %c0_136 = arith.constant 0 : index
    %c143_137 = arith.constant 143 : index
    %319 = vector.load %arg19[%c0_136, %c143_137] : memref<16x512xf32, #tpu.memory_space<vmem>>, vector<8x256xf32>
    %c1_i32_138 = arith.constant 1 : i32
    %320 = vector.broadcast %c1_i32_138 : i32 to vector<1x256xi32>
    %321 = arith.addi %4, %320 : vector<1x256xi32>
    %c-1_i32_139 = arith.constant -1 : i32
    %322 = vector.broadcast %c-1_i32_139 : i32 to vector<1x256xi32>
    %323 = arith.addi %6, %322 : vector<1x256xi32>
    %c0_i32_140 = arith.constant 0 : i32
    %324 = vector.broadcast %c0_i32_140 : i32 to vector<1x256xi32>
    %325 = arith.cmpi sge, %321, %324 : vector<1x256xi32>
    %c16_i32_141 = arith.constant 16 : i32
    %326 = vector.broadcast %c16_i32_141 : i32 to vector<1x256xi32>
    %327 = arith.cmpi slt, %321, %326 : vector<1x256xi32>
    %328 = arith.andi %325, %327 : vector<1x256xi1>
    %c0_i32_142 = arith.constant 0 : i32
    %329 = vector.broadcast %c0_i32_142 : i32 to vector<1x256xi32>
    %330 = arith.cmpi sge, %323, %329 : vector<1x256xi32>
    %331 = arith.andi %328, %330 : vector<1x256xi1>
    %c16_i32_143 = arith.constant 16 : i32
    %332 = vector.broadcast %c16_i32_143 : i32 to vector<1x256xi32>
    %333 = arith.cmpi slt, %323, %332 : vector<1x256xi32>
    %334 = arith.andi %331, %333 : vector<1x256xi1>
    %cst_144 = arith.constant 0.000000e+00 : f32
    %335 = vector.shape_cast %334 : vector<1x256xi1> to vector<1x256xi1>
    %336 = vector.broadcast %335 : vector<1x256xi1> to vector<8x256xi1>
    %337 = vector.broadcast %cst_144 : f32 to vector<8x256xf32>
    %338 = arith.select %336, %319, %337 : vector<8x256xi1>, vector<8x256xf32>
    %c0_145 = arith.constant 0 : index
    %c144_146 = arith.constant 144 : index
    %339 = vector.load %arg19[%c0_145, %c144_146] : memref<16x512xf32, #tpu.memory_space<vmem>>, vector<8x256xf32>
    %c1_i32_147 = arith.constant 1 : i32
    %340 = vector.broadcast %c1_i32_147 : i32 to vector<1x256xi32>
    %341 = arith.addi %4, %340 : vector<1x256xi32>
    %c0_i32_148 = arith.constant 0 : i32
    %342 = vector.broadcast %c0_i32_148 : i32 to vector<1x256xi32>
    %343 = arith.addi %6, %342 : vector<1x256xi32>
    %c0_i32_149 = arith.constant 0 : i32
    %344 = vector.broadcast %c0_i32_149 : i32 to vector<1x256xi32>
    %345 = arith.cmpi sge, %341, %344 : vector<1x256xi32>
    %c16_i32_150 = arith.constant 16 : i32
    %346 = vector.broadcast %c16_i32_150 : i32 to vector<1x256xi32>
    %347 = arith.cmpi slt, %341, %346 : vector<1x256xi32>
    %348 = arith.andi %345, %347 : vector<1x256xi1>
    %c0_i32_151 = arith.constant 0 : i32
    %349 = vector.broadcast %c0_i32_151 : i32 to vector<1x256xi32>
    %350 = arith.cmpi sge, %343, %349 : vector<1x256xi32>
    %351 = arith.andi %348, %350 : vector<1x256xi1>
    %c16_i32_152 = arith.constant 16 : i32
    %352 = vector.broadcast %c16_i32_152 : i32 to vector<1x256xi32>
    %353 = arith.cmpi slt, %343, %352 : vector<1x256xi32>
    %354 = arith.andi %351, %353 : vector<1x256xi1>
    %cst_153 = arith.constant 0.000000e+00 : f32
    %355 = vector.shape_cast %354 : vector<1x256xi1> to vector<1x256xi1>
    %356 = vector.broadcast %355 : vector<1x256xi1> to vector<8x256xi1>
    %357 = vector.broadcast %cst_153 : f32 to vector<8x256xf32>
    %358 = arith.select %356, %339, %357 : vector<8x256xi1>, vector<8x256xf32>
    %c0_154 = arith.constant 0 : index
    %c145_155 = arith.constant 145 : index
    %359 = vector.load %arg19[%c0_154, %c145_155] : memref<16x512xf32, #tpu.memory_space<vmem>>, vector<8x256xf32>
    %c1_i32_156 = arith.constant 1 : i32
    %360 = vector.broadcast %c1_i32_156 : i32 to vector<1x256xi32>
    %361 = arith.addi %4, %360 : vector<1x256xi32>
    %c1_i32_157 = arith.constant 1 : i32
    %362 = vector.broadcast %c1_i32_157 : i32 to vector<1x256xi32>
    %363 = arith.addi %6, %362 : vector<1x256xi32>
    %c0_i32_158 = arith.constant 0 : i32
    %364 = vector.broadcast %c0_i32_158 : i32 to vector<1x256xi32>
    %365 = arith.cmpi sge, %361, %364 : vector<1x256xi32>
    %c16_i32_159 = arith.constant 16 : i32
    %366 = vector.broadcast %c16_i32_159 : i32 to vector<1x256xi32>
    %367 = arith.cmpi slt, %361, %366 : vector<1x256xi32>
    %368 = arith.andi %365, %367 : vector<1x256xi1>
    %c0_i32_160 = arith.constant 0 : i32
    %369 = vector.broadcast %c0_i32_160 : i32 to vector<1x256xi32>
    %370 = arith.cmpi sge, %363, %369 : vector<1x256xi32>
    %371 = arith.andi %368, %370 : vector<1x256xi1>
    %c16_i32_161 = arith.constant 16 : i32
    %372 = vector.broadcast %c16_i32_161 : i32 to vector<1x256xi32>
    %373 = arith.cmpi slt, %363, %372 : vector<1x256xi32>
    %374 = arith.andi %371, %373 : vector<1x256xi1>
    %cst_162 = arith.constant 0.000000e+00 : f32
    %375 = vector.shape_cast %374 : vector<1x256xi1> to vector<1x256xi1>
    %376 = vector.broadcast %375 : vector<1x256xi1> to vector<8x256xi1>
    %377 = vector.broadcast %cst_162 : f32 to vector<8x256xf32>
    %378 = arith.select %376, %359, %377 : vector<8x256xi1>, vector<8x256xf32>
    %379 = tpu.concatenate %218, %238, %258, %278, %298, %318, %338, %358, %378 in 0 : vector<8x256xf32>, vector<8x256xf32>, vector<8x256xf32>, vector<8x256xf32>, vector<8x256xf32>, vector<8x256xf32>, vector<8x256xf32>, vector<8x256xf32>, vector<8x256xf32> -> vector<72x256xf32>
    %c0_163 = arith.constant 0 : index
    %c0_164 = arith.constant 0 : index
    %380 = vector.load %arg4[%c0_163, %c0_164] : memref<8x72xf32, #tpu.memory_space<vmem>>, vector<8x72xf32>
    %cst_165 = arith.constant dense<0.000000e+00> : vector<8x256xf32>
    %381 = tpu.matmul %380, %379, %cst_165 {dimension_numbers = #tpu.dot_dimension_numbers<[1], [0], [0], [1], [0, 0, 1, 1], [], []>} : vector<8x72xf32>, vector<72x256xf32>, vector<8x256xf32> -> vector<8x256xf32>
    %c0_166 = arith.constant 0 : index
    %c0_167 = arith.constant 0 : index
    %382 = vector.load %arg5[%c0_166, %c0_167] : memref<8x1xf32, #tpu.memory_space<vmem>>, vector<8x1xf32>
    %383 = vector.broadcast %382 : vector<8x1xf32> to vector<8x256xf32>
    %384 = arith.addf %381, %383 : vector<8x256xf32>
    %cst_168 = arith.constant 0.000000e+00 : f32
    %385 = vector.broadcast %cst_168 : f32 to vector<8x256xf32>
    %386 = arith.maximumf %384, %385 : vector<8x256xf32>
    %c0_169 = arith.constant 0 : index
    %c128_170 = arith.constant 128 : index
    %387 = vector.load %arg19[%c0_169, %c128_170] : memref<16x512xf32, #tpu.memory_space<vmem>>, vector<8x256xf32>
    tpu.vector_store %arg19[%c0_169, %c128_170], %386 {strides = array<i32>} : memref<16x512xf32, #tpu.memory_space<vmem>>, vector<8x256xf32>,
    %c0_171 = arith.constant 0 : index
    %c128_172 = arith.constant 128 : index
    %388 = vector.load %arg19[%c0_171, %c128_172] : memref<16x512xf32, #tpu.memory_space<vmem>>, vector<8x256xf32>
    %c0_173 = arith.constant 0 : index
    %c129_174 = arith.constant 129 : index
    %389 = vector.load %arg19[%c0_173, %c129_174] : memref<16x512xf32, #tpu.memory_space<vmem>>, vector<8x256xf32>
    %390 = arith.maximumf %388, %389 : vector<8x256xf32>
    %c0_175 = arith.constant 0 : index
    %c144_176 = arith.constant 144 : index
    %391 = vector.load %arg19[%c0_175, %c144_176] : memref<16x512xf32, #tpu.memory_space<vmem>>, vector<8x256xf32>
    %392 = arith.maximumf %390, %391 : vector<8x256xf32>
    %c0_177 = arith.constant 0 : index
    %c145_178 = arith.constant 145 : index
    %393 = vector.load %arg19[%c0_177, %c145_178] : memref<16x512xf32, #tpu.memory_space<vmem>>, vector<8x256xf32>
    %394 = arith.maximumf %392, %393 : vector<8x256xf32>
    %c0_179 = arith.constant 0 : index
    %c128_180 = arith.constant 128 : index
    %395 = vector.load %arg19[%c0_179, %c128_180] : memref<16x512xf32, #tpu.memory_space<vmem>>, vector<8x256xf32>
    tpu.vector_store %arg19[%c0_179, %c128_180], %394 {strides = array<i32>} : memref<16x512xf32, #tpu.memory_space<vmem>>, vector<8x256xf32>,
    %c0_181 = arith.constant 0 : index
    %c94 = arith.constant 94 : index
    %396 = vector.load %arg19[%c0_181, %c94] : memref<16x512xf32, #tpu.memory_space<vmem>>, vector<8x256xf32>
    %c-2_i32 = arith.constant -2 : i32
    %397 = vector.broadcast %c-2_i32 : i32 to vector<1x256xi32>
    %398 = arith.addi %4, %397 : vector<1x256xi32>
    %c-2_i32_182 = arith.constant -2 : i32
    %399 = vector.broadcast %c-2_i32_182 : i32 to vector<1x256xi32>
    %400 = arith.addi %6, %399 : vector<1x256xi32>
    %c0_i32_183 = arith.constant 0 : i32
    %401 = vector.broadcast %c0_i32_183 : i32 to vector<1x256xi32>
    %402 = arith.cmpi sge, %398, %401 : vector<1x256xi32>
    %c16_i32_184 = arith.constant 16 : i32
    %403 = vector.broadcast %c16_i32_184 : i32 to vector<1x256xi32>
    %404 = arith.cmpi slt, %398, %403 : vector<1x256xi32>
    %405 = arith.andi %402, %404 : vector<1x256xi1>
    %c0_i32_185 = arith.constant 0 : i32
    %406 = vector.broadcast %c0_i32_185 : i32 to vector<1x256xi32>
    %407 = arith.cmpi sge, %400, %406 : vector<1x256xi32>
    %408 = arith.andi %405, %407 : vector<1x256xi1>
    %c16_i32_186 = arith.constant 16 : i32
    %409 = vector.broadcast %c16_i32_186 : i32 to vector<1x256xi32>
    %410 = arith.cmpi slt, %400, %409 : vector<1x256xi32>
    %411 = arith.andi %408, %410 : vector<1x256xi1>
    %cst_187 = arith.constant 0.000000e+00 : f32
    %412 = vector.shape_cast %411 : vector<1x256xi1> to vector<1x256xi1>
    %413 = vector.broadcast %412 : vector<1x256xi1> to vector<8x256xi1>
    %414 = vector.broadcast %cst_187 : f32 to vector<8x256xf32>
    %415 = arith.select %413, %396, %414 : vector<8x256xi1>, vector<8x256xf32>
    %c0_188 = arith.constant 0 : index
    %c96 = arith.constant 96 : index
    %416 = vector.load %arg19[%c0_188, %c96] : memref<16x512xf32, #tpu.memory_space<vmem>>, vector<8x256xf32>
    %c-2_i32_189 = arith.constant -2 : i32
    %417 = vector.broadcast %c-2_i32_189 : i32 to vector<1x256xi32>
    %418 = arith.addi %4, %417 : vector<1x256xi32>
    %c0_i32_190 = arith.constant 0 : i32
    %419 = vector.broadcast %c0_i32_190 : i32 to vector<1x256xi32>
    %420 = arith.addi %6, %419 : vector<1x256xi32>
    %c0_i32_191 = arith.constant 0 : i32
    %421 = vector.broadcast %c0_i32_191 : i32 to vector<1x256xi32>
    %422 = arith.cmpi sge, %418, %421 : vector<1x256xi32>
    %c16_i32_192 = arith.constant 16 : i32
    %423 = vector.broadcast %c16_i32_192 : i32 to vector<1x256xi32>
    %424 = arith.cmpi slt, %418, %423 : vector<1x256xi32>
    %425 = arith.andi %422, %424 : vector<1x256xi1>
    %c0_i32_193 = arith.constant 0 : i32
    %426 = vector.broadcast %c0_i32_193 : i32 to vector<1x256xi32>
    %427 = arith.cmpi sge, %420, %426 : vector<1x256xi32>
    %428 = arith.andi %425, %427 : vector<1x256xi1>
    %c16_i32_194 = arith.constant 16 : i32
    %429 = vector.broadcast %c16_i32_194 : i32 to vector<1x256xi32>
    %430 = arith.cmpi slt, %420, %429 : vector<1x256xi32>
    %431 = arith.andi %428, %430 : vector<1x256xi1>
    %cst_195 = arith.constant 0.000000e+00 : f32
    %432 = vector.shape_cast %431 : vector<1x256xi1> to vector<1x256xi1>
    %433 = vector.broadcast %432 : vector<1x256xi1> to vector<8x256xi1>
    %434 = vector.broadcast %cst_195 : f32 to vector<8x256xf32>
    %435 = arith.select %433, %416, %434 : vector<8x256xi1>, vector<8x256xf32>
    %c0_196 = arith.constant 0 : index
    %c98 = arith.constant 98 : index
    %436 = vector.load %arg19[%c0_196, %c98] : memref<16x512xf32, #tpu.memory_space<vmem>>, vector<8x256xf32>
    %c-2_i32_197 = arith.constant -2 : i32
    %437 = vector.broadcast %c-2_i32_197 : i32 to vector<1x256xi32>
    %438 = arith.addi %4, %437 : vector<1x256xi32>
    %c2_i32 = arith.constant 2 : i32
    %439 = vector.broadcast %c2_i32 : i32 to vector<1x256xi32>
    %440 = arith.addi %6, %439 : vector<1x256xi32>
    %c0_i32_198 = arith.constant 0 : i32
    %441 = vector.broadcast %c0_i32_198 : i32 to vector<1x256xi32>
    %442 = arith.cmpi sge, %438, %441 : vector<1x256xi32>
    %c16_i32_199 = arith.constant 16 : i32
    %443 = vector.broadcast %c16_i32_199 : i32 to vector<1x256xi32>
    %444 = arith.cmpi slt, %438, %443 : vector<1x256xi32>
    %445 = arith.andi %442, %444 : vector<1x256xi1>
    %c0_i32_200 = arith.constant 0 : i32
    %446 = vector.broadcast %c0_i32_200 : i32 to vector<1x256xi32>
    %447 = arith.cmpi sge, %440, %446 : vector<1x256xi32>
    %448 = arith.andi %445, %447 : vector<1x256xi1>
    %c16_i32_201 = arith.constant 16 : i32
    %449 = vector.broadcast %c16_i32_201 : i32 to vector<1x256xi32>
    %450 = arith.cmpi slt, %440, %449 : vector<1x256xi32>
    %451 = arith.andi %448, %450 : vector<1x256xi1>
    %cst_202 = arith.constant 0.000000e+00 : f32
    %452 = vector.shape_cast %451 : vector<1x256xi1> to vector<1x256xi1>
    %453 = vector.broadcast %452 : vector<1x256xi1> to vector<8x256xi1>
    %454 = vector.broadcast %cst_202 : f32 to vector<8x256xf32>
    %455 = arith.select %453, %436, %454 : vector<8x256xi1>, vector<8x256xf32>
    %c0_203 = arith.constant 0 : index
    %c126 = arith.constant 126 : index
    %456 = vector.load %arg19[%c0_203, %c126] : memref<16x512xf32, #tpu.memory_space<vmem>>, vector<8x256xf32>
    %c0_i32_204 = arith.constant 0 : i32
    %457 = vector.broadcast %c0_i32_204 : i32 to vector<1x256xi32>
    %458 = arith.addi %4, %457 : vector<1x256xi32>
    %c-2_i32_205 = arith.constant -2 : i32
    %459 = vector.broadcast %c-2_i32_205 : i32 to vector<1x256xi32>
    %460 = arith.addi %6, %459 : vector<1x256xi32>
    %c0_i32_206 = arith.constant 0 : i32
    %461 = vector.broadcast %c0_i32_206 : i32 to vector<1x256xi32>
    %462 = arith.cmpi sge, %458, %461 : vector<1x256xi32>
    %c16_i32_207 = arith.constant 16 : i32
    %463 = vector.broadcast %c16_i32_207 : i32 to vector<1x256xi32>
    %464 = arith.cmpi slt, %458, %463 : vector<1x256xi32>
    %465 = arith.andi %462, %464 : vector<1x256xi1>
    %c0_i32_208 = arith.constant 0 : i32
    %466 = vector.broadcast %c0_i32_208 : i32 to vector<1x256xi32>
    %467 = arith.cmpi sge, %460, %466 : vector<1x256xi32>
    %468 = arith.andi %465, %467 : vector<1x256xi1>
    %c16_i32_209 = arith.constant 16 : i32
    %469 = vector.broadcast %c16_i32_209 : i32 to vector<1x256xi32>
    %470 = arith.cmpi slt, %460, %469 : vector<1x256xi32>
    %471 = arith.andi %468, %470 : vector<1x256xi1>
    %cst_210 = arith.constant 0.000000e+00 : f32
    %472 = vector.shape_cast %471 : vector<1x256xi1> to vector<1x256xi1>
    %473 = vector.broadcast %472 : vector<1x256xi1> to vector<8x256xi1>
    %474 = vector.broadcast %cst_210 : f32 to vector<8x256xf32>
    %475 = arith.select %473, %456, %474 : vector<8x256xi1>, vector<8x256xf32>
    %c0_211 = arith.constant 0 : index
    %c128_212 = arith.constant 128 : index
    %476 = vector.load %arg19[%c0_211, %c128_212] : memref<16x512xf32, #tpu.memory_space<vmem>>, vector<8x256xf32>
    %c0_i32_213 = arith.constant 0 : i32
    %477 = vector.broadcast %c0_i32_213 : i32 to vector<1x256xi32>
    %478 = arith.addi %4, %477 : vector<1x256xi32>
    %c0_i32_214 = arith.constant 0 : i32
    %479 = vector.broadcast %c0_i32_214 : i32 to vector<1x256xi32>
    %480 = arith.addi %6, %479 : vector<1x256xi32>
    %c0_i32_215 = arith.constant 0 : i32
    %481 = vector.broadcast %c0_i32_215 : i32 to vector<1x256xi32>
    %482 = arith.cmpi sge, %478, %481 : vector<1x256xi32>
    %c16_i32_216 = arith.constant 16 : i32
    %483 = vector.broadcast %c16_i32_216 : i32 to vector<1x256xi32>
    %484 = arith.cmpi slt, %478, %483 : vector<1x256xi32>
    %485 = arith.andi %482, %484 : vector<1x256xi1>
    %c0_i32_217 = arith.constant 0 : i32
    %486 = vector.broadcast %c0_i32_217 : i32 to vector<1x256xi32>
    %487 = arith.cmpi sge, %480, %486 : vector<1x256xi32>
    %488 = arith.andi %485, %487 : vector<1x256xi1>
    %c16_i32_218 = arith.constant 16 : i32
    %489 = vector.broadcast %c16_i32_218 : i32 to vector<1x256xi32>
    %490 = arith.cmpi slt, %480, %489 : vector<1x256xi32>
    %491 = arith.andi %488, %490 : vector<1x256xi1>
    %cst_219 = arith.constant 0.000000e+00 : f32
    %492 = vector.shape_cast %491 : vector<1x256xi1> to vector<1x256xi1>
    %493 = vector.broadcast %492 : vector<1x256xi1> to vector<8x256xi1>
    %494 = vector.broadcast %cst_219 : f32 to vector<8x256xf32>
    %495 = arith.select %493, %476, %494 : vector<8x256xi1>, vector<8x256xf32>
    %c0_220 = arith.constant 0 : index
    %c130 = arith.constant 130 : index
    %496 = vector.load %arg19[%c0_220, %c130] : memref<16x512xf32, #tpu.memory_space<vmem>>, vector<8x256xf32>
    %c0_i32_221 = arith.constant 0 : i32
    %497 = vector.broadcast %c0_i32_221 : i32 to vector<1x256xi32>
    %498 = arith.addi %4, %497 : vector<1x256xi32>
    %c2_i32_222 = arith.constant 2 : i32
    %499 = vector.broadcast %c2_i32_222 : i32 to vector<1x256xi32>
    %500 = arith.addi %6, %499 : vector<1x256xi32>
    %c0_i32_223 = arith.constant 0 : i32
    %501 = vector.broadcast %c0_i32_223 : i32 to vector<1x256xi32>
    %502 = arith.cmpi sge, %498, %501 : vector<1x256xi32>
    %c16_i32_224 = arith.constant 16 : i32
    %503 = vector.broadcast %c16_i32_224 : i32 to vector<1x256xi32>
    %504 = arith.cmpi slt, %498, %503 : vector<1x256xi32>
    %505 = arith.andi %502, %504 : vector<1x256xi1>
    %c0_i32_225 = arith.constant 0 : i32
    %506 = vector.broadcast %c0_i32_225 : i32 to vector<1x256xi32>
    %507 = arith.cmpi sge, %500, %506 : vector<1x256xi32>
    %508 = arith.andi %505, %507 : vector<1x256xi1>
    %c16_i32_226 = arith.constant 16 : i32
    %509 = vector.broadcast %c16_i32_226 : i32 to vector<1x256xi32>
    %510 = arith.cmpi slt, %500, %509 : vector<1x256xi32>
    %511 = arith.andi %508, %510 : vector<1x256xi1>
    %cst_227 = arith.constant 0.000000e+00 : f32
    %512 = vector.shape_cast %511 : vector<1x256xi1> to vector<1x256xi1>
    %513 = vector.broadcast %512 : vector<1x256xi1> to vector<8x256xi1>
    %514 = vector.broadcast %cst_227 : f32 to vector<8x256xf32>
    %515 = arith.select %513, %496, %514 : vector<8x256xi1>, vector<8x256xf32>
    %c0_228 = arith.constant 0 : index
    %c158 = arith.constant 158 : index
    %516 = vector.load %arg19[%c0_228, %c158] : memref<16x512xf32, #tpu.memory_space<vmem>>, vector<8x256xf32>
    %c2_i32_229 = arith.constant 2 : i32
    %517 = vector.broadcast %c2_i32_229 : i32 to vector<1x256xi32>
    %518 = arith.addi %4, %517 : vector<1x256xi32>
    %c-2_i32_230 = arith.constant -2 : i32
    %519 = vector.broadcast %c-2_i32_230 : i32 to vector<1x256xi32>
    %520 = arith.addi %6, %519 : vector<1x256xi32>
    %c0_i32_231 = arith.constant 0 : i32
    %521 = vector.broadcast %c0_i32_231 : i32 to vector<1x256xi32>
    %522 = arith.cmpi sge, %518, %521 : vector<1x256xi32>
    %c16_i32_232 = arith.constant 16 : i32
    %523 = vector.broadcast %c16_i32_232 : i32 to vector<1x256xi32>
    %524 = arith.cmpi slt, %518, %523 : vector<1x256xi32>
    %525 = arith.andi %522, %524 : vector<1x256xi1>
    %c0_i32_233 = arith.constant 0 : i32
    %526 = vector.broadcast %c0_i32_233 : i32 to vector<1x256xi32>
    %527 = arith.cmpi sge, %520, %526 : vector<1x256xi32>
    %528 = arith.andi %525, %527 : vector<1x256xi1>
    %c16_i32_234 = arith.constant 16 : i32
    %529 = vector.broadcast %c16_i32_234 : i32 to vector<1x256xi32>
    %530 = arith.cmpi slt, %520, %529 : vector<1x256xi32>
    %531 = arith.andi %528, %530 : vector<1x256xi1>
    %cst_235 = arith.constant 0.000000e+00 : f32
    %532 = vector.shape_cast %531 : vector<1x256xi1> to vector<1x256xi1>
    %533 = vector.broadcast %532 : vector<1x256xi1> to vector<8x256xi1>
    %534 = vector.broadcast %cst_235 : f32 to vector<8x256xf32>
    %535 = arith.select %533, %516, %534 : vector<8x256xi1>, vector<8x256xf32>
    %c0_236 = arith.constant 0 : index
    %c160 = arith.constant 160 : index
    %536 = vector.load %arg19[%c0_236, %c160] : memref<16x512xf32, #tpu.memory_space<vmem>>, vector<8x256xf32>
    %c2_i32_237 = arith.constant 2 : i32
    %537 = vector.broadcast %c2_i32_237 : i32 to vector<1x256xi32>
    %538 = arith.addi %4, %537 : vector<1x256xi32>
    %c0_i32_238 = arith.constant 0 : i32
    %539 = vector.broadcast %c0_i32_238 : i32 to vector<1x256xi32>
    %540 = arith.addi %6, %539 : vector<1x256xi32>
    %c0_i32_239 = arith.constant 0 : i32
    %541 = vector.broadcast %c0_i32_239 : i32 to vector<1x256xi32>
    %542 = arith.cmpi sge, %538, %541 : vector<1x256xi32>
    %c16_i32_240 = arith.constant 16 : i32
    %543 = vector.broadcast %c16_i32_240 : i32 to vector<1x256xi32>
    %544 = arith.cmpi slt, %538, %543 : vector<1x256xi32>
    %545 = arith.andi %542, %544 : vector<1x256xi1>
    %c0_i32_241 = arith.constant 0 : i32
    %546 = vector.broadcast %c0_i32_241 : i32 to vector<1x256xi32>
    %547 = arith.cmpi sge, %540, %546 : vector<1x256xi32>
    %548 = arith.andi %545, %547 : vector<1x256xi1>
    %c16_i32_242 = arith.constant 16 : i32
    %549 = vector.broadcast %c16_i32_242 : i32 to vector<1x256xi32>
    %550 = arith.cmpi slt, %540, %549 : vector<1x256xi32>
    %551 = arith.andi %548, %550 : vector<1x256xi1>
    %cst_243 = arith.constant 0.000000e+00 : f32
    %552 = vector.shape_cast %551 : vector<1x256xi1> to vector<1x256xi1>
    %553 = vector.broadcast %552 : vector<1x256xi1> to vector<8x256xi1>
    %554 = vector.broadcast %cst_243 : f32 to vector<8x256xf32>
    %555 = arith.select %553, %536, %554 : vector<8x256xi1>, vector<8x256xf32>
    %c0_244 = arith.constant 0 : index
    %c162 = arith.constant 162 : index
    %556 = vector.load %arg19[%c0_244, %c162] : memref<16x512xf32, #tpu.memory_space<vmem>>, vector<8x256xf32>
    %c2_i32_245 = arith.constant 2 : i32
    %557 = vector.broadcast %c2_i32_245 : i32 to vector<1x256xi32>
    %558 = arith.addi %4, %557 : vector<1x256xi32>
    %c2_i32_246 = arith.constant 2 : i32
    %559 = vector.broadcast %c2_i32_246 : i32 to vector<1x256xi32>
    %560 = arith.addi %6, %559 : vector<1x256xi32>
    %c0_i32_247 = arith.constant 0 : i32
    %561 = vector.broadcast %c0_i32_247 : i32 to vector<1x256xi32>
    %562 = arith.cmpi sge, %558, %561 : vector<1x256xi32>
    %c16_i32_248 = arith.constant 16 : i32
    %563 = vector.broadcast %c16_i32_248 : i32 to vector<1x256xi32>
    %564 = arith.cmpi slt, %558, %563 : vector<1x256xi32>
    %565 = arith.andi %562, %564 : vector<1x256xi1>
    %c0_i32_249 = arith.constant 0 : i32
    %566 = vector.broadcast %c0_i32_249 : i32 to vector<1x256xi32>
    %567 = arith.cmpi sge, %560, %566 : vector<1x256xi32>
    %568 = arith.andi %565, %567 : vector<1x256xi1>
    %c16_i32_250 = arith.constant 16 : i32
    %569 = vector.broadcast %c16_i32_250 : i32 to vector<1x256xi32>
    %570 = arith.cmpi slt, %560, %569 : vector<1x256xi32>
    %571 = arith.andi %568, %570 : vector<1x256xi1>
    %cst_251 = arith.constant 0.000000e+00 : f32
    %572 = vector.shape_cast %571 : vector<1x256xi1> to vector<1x256xi1>
    %573 = vector.broadcast %572 : vector<1x256xi1> to vector<8x256xi1>
    %574 = vector.broadcast %cst_251 : f32 to vector<8x256xf32>
    %575 = arith.select %573, %556, %574 : vector<8x256xi1>, vector<8x256xf32>
    %576 = tpu.concatenate %415, %435, %455, %475, %495, %515, %535, %555, %575 in 0 : vector<8x256xf32>, vector<8x256xf32>, vector<8x256xf32>, vector<8x256xf32>, vector<8x256xf32>, vector<8x256xf32>, vector<8x256xf32>, vector<8x256xf32>, vector<8x256xf32> -> vector<72x256xf32>
    %c0_252 = arith.constant 0 : index
    %c0_253 = arith.constant 0 : index
    %577 = vector.load %arg6[%c0_252, %c0_253] : memref<16x72xf32, #tpu.memory_space<vmem>>, vector<16x72xf32>
    %cst_254 = arith.constant dense<0.000000e+00> : vector<16x256xf32>
    %578 = tpu.matmul %577, %576, %cst_254 {dimension_numbers = #tpu.dot_dimension_numbers<[1], [0], [0], [1], [0, 0, 1, 1], [], []>} : vector<16x72xf32>, vector<72x256xf32>, vector<16x256xf32> -> vector<16x256xf32>
    %c0_255 = arith.constant 0 : index
    %c0_256 = arith.constant 0 : index
    %579 = vector.load %arg7[%c0_255, %c0_256] : memref<16x1xf32, #tpu.memory_space<vmem>>, vector<16x1xf32>
    %580 = vector.broadcast %579 : vector<16x1xf32> to vector<16x256xf32>
    %581 = arith.addf %578, %580 : vector<16x256xf32>
    %cst_257 = arith.constant 0.000000e+00 : f32
    %582 = vector.broadcast %cst_257 : f32 to vector<16x256xf32>
    %583 = arith.maximumf %581, %582 : vector<16x256xf32>
    %c0_258 = arith.constant 0 : index
    %c128_259 = arith.constant 128 : index
    %584 = vector.load %arg19[%c0_258, %c128_259] : memref<16x512xf32, #tpu.memory_space<vmem>>, vector<16x256xf32>
    tpu.vector_store %arg19[%c0_258, %c128_259], %583 {strides = array<i32>} : memref<16x512xf32, #tpu.memory_space<vmem>>, vector<16x256xf32>,
    %c0_260 = arith.constant 0 : index
    %c94_261 = arith.constant 94 : index
    %585 = vector.load %arg19[%c0_260, %c94_261] : memref<16x512xf32, #tpu.memory_space<vmem>>, vector<16x256xf32>
    %c-2_i32_262 = arith.constant -2 : i32
    %586 = vector.broadcast %c-2_i32_262 : i32 to vector<1x256xi32>
    %587 = arith.addi %4, %586 : vector<1x256xi32>
    %c-2_i32_263 = arith.constant -2 : i32
    %588 = vector.broadcast %c-2_i32_263 : i32 to vector<1x256xi32>
    %589 = arith.addi %6, %588 : vector<1x256xi32>
    %c0_i32_264 = arith.constant 0 : i32
    %590 = vector.broadcast %c0_i32_264 : i32 to vector<1x256xi32>
    %591 = arith.cmpi sge, %587, %590 : vector<1x256xi32>
    %c16_i32_265 = arith.constant 16 : i32
    %592 = vector.broadcast %c16_i32_265 : i32 to vector<1x256xi32>
    %593 = arith.cmpi slt, %587, %592 : vector<1x256xi32>
    %594 = arith.andi %591, %593 : vector<1x256xi1>
    %c0_i32_266 = arith.constant 0 : i32
    %595 = vector.broadcast %c0_i32_266 : i32 to vector<1x256xi32>
    %596 = arith.cmpi sge, %589, %595 : vector<1x256xi32>
    %597 = arith.andi %594, %596 : vector<1x256xi1>
    %c16_i32_267 = arith.constant 16 : i32
    %598 = vector.broadcast %c16_i32_267 : i32 to vector<1x256xi32>
    %599 = arith.cmpi slt, %589, %598 : vector<1x256xi32>
    %600 = arith.andi %597, %599 : vector<1x256xi1>
    %cst_268 = arith.constant 0.000000e+00 : f32
    %601 = vector.shape_cast %600 : vector<1x256xi1> to vector<1x256xi1>
    %602 = vector.broadcast %601 : vector<1x256xi1> to vector<16x256xi1>
    %603 = vector.broadcast %cst_268 : f32 to vector<16x256xf32>
    %604 = arith.select %602, %585, %603 : vector<16x256xi1>, vector<16x256xf32>
    %c0_269 = arith.constant 0 : index
    %c96_270 = arith.constant 96 : index
    %605 = vector.load %arg19[%c0_269, %c96_270] : memref<16x512xf32, #tpu.memory_space<vmem>>, vector<16x256xf32>
    %c-2_i32_271 = arith.constant -2 : i32
    %606 = vector.broadcast %c-2_i32_271 : i32 to vector<1x256xi32>
    %607 = arith.addi %4, %606 : vector<1x256xi32>
    %c0_i32_272 = arith.constant 0 : i32
    %608 = vector.broadcast %c0_i32_272 : i32 to vector<1x256xi32>
    %609 = arith.addi %6, %608 : vector<1x256xi32>
    %c0_i32_273 = arith.constant 0 : i32
    %610 = vector.broadcast %c0_i32_273 : i32 to vector<1x256xi32>
    %611 = arith.cmpi sge, %607, %610 : vector<1x256xi32>
    %c16_i32_274 = arith.constant 16 : i32
    %612 = vector.broadcast %c16_i32_274 : i32 to vector<1x256xi32>
    %613 = arith.cmpi slt, %607, %612 : vector<1x256xi32>
    %614 = arith.andi %611, %613 : vector<1x256xi1>
    %c0_i32_275 = arith.constant 0 : i32
    %615 = vector.broadcast %c0_i32_275 : i32 to vector<1x256xi32>
    %616 = arith.cmpi sge, %609, %615 : vector<1x256xi32>
    %617 = arith.andi %614, %616 : vector<1x256xi1>
    %c16_i32_276 = arith.constant 16 : i32
    %618 = vector.broadcast %c16_i32_276 : i32 to vector<1x256xi32>
    %619 = arith.cmpi slt, %609, %618 : vector<1x256xi32>
    %620 = arith.andi %617, %619 : vector<1x256xi1>
    %cst_277 = arith.constant 0.000000e+00 : f32
    %621 = vector.shape_cast %620 : vector<1x256xi1> to vector<1x256xi1>
    %622 = vector.broadcast %621 : vector<1x256xi1> to vector<16x256xi1>
    %623 = vector.broadcast %cst_277 : f32 to vector<16x256xf32>
    %624 = arith.select %622, %605, %623 : vector<16x256xi1>, vector<16x256xf32>
    %c0_278 = arith.constant 0 : index
    %c98_279 = arith.constant 98 : index
    %625 = vector.load %arg19[%c0_278, %c98_279] : memref<16x512xf32, #tpu.memory_space<vmem>>, vector<16x256xf32>
    %c-2_i32_280 = arith.constant -2 : i32
    %626 = vector.broadcast %c-2_i32_280 : i32 to vector<1x256xi32>
    %627 = arith.addi %4, %626 : vector<1x256xi32>
    %c2_i32_281 = arith.constant 2 : i32
    %628 = vector.broadcast %c2_i32_281 : i32 to vector<1x256xi32>
    %629 = arith.addi %6, %628 : vector<1x256xi32>
    %c0_i32_282 = arith.constant 0 : i32
    %630 = vector.broadcast %c0_i32_282 : i32 to vector<1x256xi32>
    %631 = arith.cmpi sge, %627, %630 : vector<1x256xi32>
    %c16_i32_283 = arith.constant 16 : i32
    %632 = vector.broadcast %c16_i32_283 : i32 to vector<1x256xi32>
    %633 = arith.cmpi slt, %627, %632 : vector<1x256xi32>
    %634 = arith.andi %631, %633 : vector<1x256xi1>
    %c0_i32_284 = arith.constant 0 : i32
    %635 = vector.broadcast %c0_i32_284 : i32 to vector<1x256xi32>
    %636 = arith.cmpi sge, %629, %635 : vector<1x256xi32>
    %637 = arith.andi %634, %636 : vector<1x256xi1>
    %c16_i32_285 = arith.constant 16 : i32
    %638 = vector.broadcast %c16_i32_285 : i32 to vector<1x256xi32>
    %639 = arith.cmpi slt, %629, %638 : vector<1x256xi32>
    %640 = arith.andi %637, %639 : vector<1x256xi1>
    %cst_286 = arith.constant 0.000000e+00 : f32
    %641 = vector.shape_cast %640 : vector<1x256xi1> to vector<1x256xi1>
    %642 = vector.broadcast %641 : vector<1x256xi1> to vector<16x256xi1>
    %643 = vector.broadcast %cst_286 : f32 to vector<16x256xf32>
    %644 = arith.select %642, %625, %643 : vector<16x256xi1>, vector<16x256xf32>
    %c0_287 = arith.constant 0 : index
    %c126_288 = arith.constant 126 : index
    %645 = vector.load %arg19[%c0_287, %c126_288] : memref<16x512xf32, #tpu.memory_space<vmem>>, vector<16x256xf32>
    %c0_i32_289 = arith.constant 0 : i32
    %646 = vector.broadcast %c0_i32_289 : i32 to vector<1x256xi32>
    %647 = arith.addi %4, %646 : vector<1x256xi32>
    %c-2_i32_290 = arith.constant -2 : i32
    %648 = vector.broadcast %c-2_i32_290 : i32 to vector<1x256xi32>
    %649 = arith.addi %6, %648 : vector<1x256xi32>
    %c0_i32_291 = arith.constant 0 : i32
    %650 = vector.broadcast %c0_i32_291 : i32 to vector<1x256xi32>
    %651 = arith.cmpi sge, %647, %650 : vector<1x256xi32>
    %c16_i32_292 = arith.constant 16 : i32
    %652 = vector.broadcast %c16_i32_292 : i32 to vector<1x256xi32>
    %653 = arith.cmpi slt, %647, %652 : vector<1x256xi32>
    %654 = arith.andi %651, %653 : vector<1x256xi1>
    %c0_i32_293 = arith.constant 0 : i32
    %655 = vector.broadcast %c0_i32_293 : i32 to vector<1x256xi32>
    %656 = arith.cmpi sge, %649, %655 : vector<1x256xi32>
    %657 = arith.andi %654, %656 : vector<1x256xi1>
    %c16_i32_294 = arith.constant 16 : i32
    %658 = vector.broadcast %c16_i32_294 : i32 to vector<1x256xi32>
    %659 = arith.cmpi slt, %649, %658 : vector<1x256xi32>
    %660 = arith.andi %657, %659 : vector<1x256xi1>
    %cst_295 = arith.constant 0.000000e+00 : f32
    %661 = vector.shape_cast %660 : vector<1x256xi1> to vector<1x256xi1>
    %662 = vector.broadcast %661 : vector<1x256xi1> to vector<16x256xi1>
    %663 = vector.broadcast %cst_295 : f32 to vector<16x256xf32>
    %664 = arith.select %662, %645, %663 : vector<16x256xi1>, vector<16x256xf32>
    %c0_296 = arith.constant 0 : index
    %c128_297 = arith.constant 128 : index
    %665 = vector.load %arg19[%c0_296, %c128_297] : memref<16x512xf32, #tpu.memory_space<vmem>>, vector<16x256xf32>
    %c0_i32_298 = arith.constant 0 : i32
    %666 = vector.broadcast %c0_i32_298 : i32 to vector<1x256xi32>
    %667 = arith.addi %4, %666 : vector<1x256xi32>
    %c0_i32_299 = arith.constant 0 : i32
    %668 = vector.broadcast %c0_i32_299 : i32 to vector<1x256xi32>
    %669 = arith.addi %6, %668 : vector<1x256xi32>
    %c0_i32_300 = arith.constant 0 : i32
    %670 = vector.broadcast %c0_i32_300 : i32 to vector<1x256xi32>
    %671 = arith.cmpi sge, %667, %670 : vector<1x256xi32>
    %c16_i32_301 = arith.constant 16 : i32
    %672 = vector.broadcast %c16_i32_301 : i32 to vector<1x256xi32>
    %673 = arith.cmpi slt, %667, %672 : vector<1x256xi32>
    %674 = arith.andi %671, %673 : vector<1x256xi1>
    %c0_i32_302 = arith.constant 0 : i32
    %675 = vector.broadcast %c0_i32_302 : i32 to vector<1x256xi32>
    %676 = arith.cmpi sge, %669, %675 : vector<1x256xi32>
    %677 = arith.andi %674, %676 : vector<1x256xi1>
    %c16_i32_303 = arith.constant 16 : i32
    %678 = vector.broadcast %c16_i32_303 : i32 to vector<1x256xi32>
    %679 = arith.cmpi slt, %669, %678 : vector<1x256xi32>
    %680 = arith.andi %677, %679 : vector<1x256xi1>
    %cst_304 = arith.constant 0.000000e+00 : f32
    %681 = vector.shape_cast %680 : vector<1x256xi1> to vector<1x256xi1>
    %682 = vector.broadcast %681 : vector<1x256xi1> to vector<16x256xi1>
    %683 = vector.broadcast %cst_304 : f32 to vector<16x256xf32>
    %684 = arith.select %682, %665, %683 : vector<16x256xi1>, vector<16x256xf32>
    %c0_305 = arith.constant 0 : index
    %c130_306 = arith.constant 130 : index
    %685 = vector.load %arg19[%c0_305, %c130_306] : memref<16x512xf32, #tpu.memory_space<vmem>>, vector<16x256xf32>
    %c0_i32_307 = arith.constant 0 : i32
    %686 = vector.broadcast %c0_i32_307 : i32 to vector<1x256xi32>
    %687 = arith.addi %4, %686 : vector<1x256xi32>
    %c2_i32_308 = arith.constant 2 : i32
    %688 = vector.broadcast %c2_i32_308 : i32 to vector<1x256xi32>
    %689 = arith.addi %6, %688 : vector<1x256xi32>
    %c0_i32_309 = arith.constant 0 : i32
    %690 = vector.broadcast %c0_i32_309 : i32 to vector<1x256xi32>
    %691 = arith.cmpi sge, %687, %690 : vector<1x256xi32>
    %c16_i32_310 = arith.constant 16 : i32
    %692 = vector.broadcast %c16_i32_310 : i32 to vector<1x256xi32>
    %693 = arith.cmpi slt, %687, %692 : vector<1x256xi32>
    %694 = arith.andi %691, %693 : vector<1x256xi1>
    %c0_i32_311 = arith.constant 0 : i32
    %695 = vector.broadcast %c0_i32_311 : i32 to vector<1x256xi32>
    %696 = arith.cmpi sge, %689, %695 : vector<1x256xi32>
    %697 = arith.andi %694, %696 : vector<1x256xi1>
    %c16_i32_312 = arith.constant 16 : i32
    %698 = vector.broadcast %c16_i32_312 : i32 to vector<1x256xi32>
    %699 = arith.cmpi slt, %689, %698 : vector<1x256xi32>
    %700 = arith.andi %697, %699 : vector<1x256xi1>
    %cst_313 = arith.constant 0.000000e+00 : f32
    %701 = vector.shape_cast %700 : vector<1x256xi1> to vector<1x256xi1>
    %702 = vector.broadcast %701 : vector<1x256xi1> to vector<16x256xi1>
    %703 = vector.broadcast %cst_313 : f32 to vector<16x256xf32>
    %704 = arith.select %702, %685, %703 : vector<16x256xi1>, vector<16x256xf32>
    %c0_314 = arith.constant 0 : index
    %c158_315 = arith.constant 158 : index
    %705 = vector.load %arg19[%c0_314, %c158_315] : memref<16x512xf32, #tpu.memory_space<vmem>>, vector<16x256xf32>
    %c2_i32_316 = arith.constant 2 : i32
    %706 = vector.broadcast %c2_i32_316 : i32 to vector<1x256xi32>
    %707 = arith.addi %4, %706 : vector<1x256xi32>
    %c-2_i32_317 = arith.constant -2 : i32
    %708 = vector.broadcast %c-2_i32_317 : i32 to vector<1x256xi32>
    %709 = arith.addi %6, %708 : vector<1x256xi32>
    %c0_i32_318 = arith.constant 0 : i32
    %710 = vector.broadcast %c0_i32_318 : i32 to vector<1x256xi32>
    %711 = arith.cmpi sge, %707, %710 : vector<1x256xi32>
    %c16_i32_319 = arith.constant 16 : i32
    %712 = vector.broadcast %c16_i32_319 : i32 to vector<1x256xi32>
    %713 = arith.cmpi slt, %707, %712 : vector<1x256xi32>
    %714 = arith.andi %711, %713 : vector<1x256xi1>
    %c0_i32_320 = arith.constant 0 : i32
    %715 = vector.broadcast %c0_i32_320 : i32 to vector<1x256xi32>
    %716 = arith.cmpi sge, %709, %715 : vector<1x256xi32>
    %717 = arith.andi %714, %716 : vector<1x256xi1>
    %c16_i32_321 = arith.constant 16 : i32
    %718 = vector.broadcast %c16_i32_321 : i32 to vector<1x256xi32>
    %719 = arith.cmpi slt, %709, %718 : vector<1x256xi32>
    %720 = arith.andi %717, %719 : vector<1x256xi1>
    %cst_322 = arith.constant 0.000000e+00 : f32
    %721 = vector.shape_cast %720 : vector<1x256xi1> to vector<1x256xi1>
    %722 = vector.broadcast %721 : vector<1x256xi1> to vector<16x256xi1>
    %723 = vector.broadcast %cst_322 : f32 to vector<16x256xf32>
    %724 = arith.select %722, %705, %723 : vector<16x256xi1>, vector<16x256xf32>
    %c0_323 = arith.constant 0 : index
    %c160_324 = arith.constant 160 : index
    %725 = vector.load %arg19[%c0_323, %c160_324] : memref<16x512xf32, #tpu.memory_space<vmem>>, vector<16x256xf32>
    %c2_i32_325 = arith.constant 2 : i32
    %726 = vector.broadcast %c2_i32_325 : i32 to vector<1x256xi32>
    %727 = arith.addi %4, %726 : vector<1x256xi32>
    %c0_i32_326 = arith.constant 0 : i32
    %728 = vector.broadcast %c0_i32_326 : i32 to vector<1x256xi32>
    %729 = arith.addi %6, %728 : vector<1x256xi32>
    %c0_i32_327 = arith.constant 0 : i32
    %730 = vector.broadcast %c0_i32_327 : i32 to vector<1x256xi32>
    %731 = arith.cmpi sge, %727, %730 : vector<1x256xi32>
    %c16_i32_328 = arith.constant 16 : i32
    %732 = vector.broadcast %c16_i32_328 : i32 to vector<1x256xi32>
    %733 = arith.cmpi slt, %727, %732 : vector<1x256xi32>
    %734 = arith.andi %731, %733 : vector<1x256xi1>
    %c0_i32_329 = arith.constant 0 : i32
    %735 = vector.broadcast %c0_i32_329 : i32 to vector<1x256xi32>
    %736 = arith.cmpi sge, %729, %735 : vector<1x256xi32>
    %737 = arith.andi %734, %736 : vector<1x256xi1>
    %c16_i32_330 = arith.constant 16 : i32
    %738 = vector.broadcast %c16_i32_330 : i32 to vector<1x256xi32>
    %739 = arith.cmpi slt, %729, %738 : vector<1x256xi32>
    %740 = arith.andi %737, %739 : vector<1x256xi1>
    %cst_331 = arith.constant 0.000000e+00 : f32
    %741 = vector.shape_cast %740 : vector<1x256xi1> to vector<1x256xi1>
    %742 = vector.broadcast %741 : vector<1x256xi1> to vector<16x256xi1>
    %743 = vector.broadcast %cst_331 : f32 to vector<16x256xf32>
    %744 = arith.select %742, %725, %743 : vector<16x256xi1>, vector<16x256xf32>
    %c0_332 = arith.constant 0 : index
    %c162_333 = arith.constant 162 : index
    %745 = vector.load %arg19[%c0_332, %c162_333] : memref<16x512xf32, #tpu.memory_space<vmem>>, vector<16x256xf32>
    %c2_i32_334 = arith.constant 2 : i32
    %746 = vector.broadcast %c2_i32_334 : i32 to vector<1x256xi32>
    %747 = arith.addi %4, %746 : vector<1x256xi32>
    %c2_i32_335 = arith.constant 2 : i32
    %748 = vector.broadcast %c2_i32_335 : i32 to vector<1x256xi32>
    %749 = arith.addi %6, %748 : vector<1x256xi32>
    %c0_i32_336 = arith.constant 0 : i32
    %750 = vector.broadcast %c0_i32_336 : i32 to vector<1x256xi32>
    %751 = arith.cmpi sge, %747, %750 : vector<1x256xi32>
    %c16_i32_337 = arith.constant 16 : i32
    %752 = vector.broadcast %c16_i32_337 : i32 to vector<1x256xi32>
    %753 = arith.cmpi slt, %747, %752 : vector<1x256xi32>
    %754 = arith.andi %751, %753 : vector<1x256xi1>
    %c0_i32_338 = arith.constant 0 : i32
    %755 = vector.broadcast %c0_i32_338 : i32 to vector<1x256xi32>
    %756 = arith.cmpi sge, %749, %755 : vector<1x256xi32>
    %757 = arith.andi %754, %756 : vector<1x256xi1>
    %c16_i32_339 = arith.constant 16 : i32
    %758 = vector.broadcast %c16_i32_339 : i32 to vector<1x256xi32>
    %759 = arith.cmpi slt, %749, %758 : vector<1x256xi32>
    %760 = arith.andi %757, %759 : vector<1x256xi1>
    %cst_340 = arith.constant 0.000000e+00 : f32
    %761 = vector.shape_cast %760 : vector<1x256xi1> to vector<1x256xi1>
    %762 = vector.broadcast %761 : vector<1x256xi1> to vector<16x256xi1>
    %763 = vector.broadcast %cst_340 : f32 to vector<16x256xf32>
    %764 = arith.select %762, %745, %763 : vector<16x256xi1>, vector<16x256xf32>
    %765 = tpu.concatenate %604, %624, %644, %664, %684, %704, %724, %744, %764 in 0 : vector<16x256xf32>, vector<16x256xf32>, vector<16x256xf32>, vector<16x256xf32>, vector<16x256xf32>, vector<16x256xf32>, vector<16x256xf32>, vector<16x256xf32>, vector<16x256xf32> -> vector<144x256xf32>
    %c0_341 = arith.constant 0 : index
    %c0_342 = arith.constant 0 : index
    %766 = vector.load %arg8[%c0_341, %c0_342] : memref<16x144xf32, #tpu.memory_space<vmem>>, vector<16x144xf32>
    %cst_343 = arith.constant dense<0.000000e+00> : vector<16x256xf32>
    %767 = tpu.matmul %766, %765, %cst_343 {dimension_numbers = #tpu.dot_dimension_numbers<[1], [0], [0], [1], [0, 0, 1, 1], [], []>} : vector<16x144xf32>, vector<144x256xf32>, vector<16x256xf32> -> vector<16x256xf32>
    %c0_344 = arith.constant 0 : index
    %c0_345 = arith.constant 0 : index
    %768 = vector.load %arg9[%c0_344, %c0_345] : memref<16x1xf32, #tpu.memory_space<vmem>>, vector<16x1xf32>
    %769 = vector.broadcast %768 : vector<16x1xf32> to vector<16x256xf32>
    %770 = arith.addf %767, %769 : vector<16x256xf32>
    %cst_346 = arith.constant 0.000000e+00 : f32
    %771 = vector.broadcast %cst_346 : f32 to vector<16x256xf32>
    %772 = arith.maximumf %770, %771 : vector<16x256xf32>
    %cst_347 = arith.constant 0.000000e+00 : f32
    %773 = vector.broadcast %cst_347 : f32 to vector<8x256xf32>
    %c0_348 = arith.constant 0 : index
    %c0_349 = arith.constant 0 : index
    %c0_350 = arith.constant 0 : index
    %774 = vector.load %arg10[%c0_348, %c0_349, %c0_350] : memref<4x8x16xf32, #tpu.memory_space<vmem>>, vector<1x8x16xf32>
    %775 = vector.shape_cast %774 : vector<1x8x16xf32> to vector<8x16xf32>
    %cst_351 = arith.constant dense<0.000000e+00> : vector<8x256xf32>
    %776 = tpu.matmul %775, %772, %cst_351 {dimension_numbers = #tpu.dot_dimension_numbers<[1], [0], [0], [1], [0, 0, 1, 1], [], []>} : vector<8x16xf32>, vector<16x256xf32>, vector<8x256xf32> -> vector<8x256xf32>
    %c0_352 = arith.constant 0 : index
    %c128_353 = arith.constant 128 : index
    %777 = vector.load %arg19[%c0_352, %c128_353] : memref<16x512xf32, #tpu.memory_space<vmem>>, vector<8x256xf32>
    tpu.vector_store %arg19[%c0_352, %c128_353], %776 {strides = array<i32>} : memref<16x512xf32, #tpu.memory_space<vmem>>, vector<8x256xf32>,
    %c0_354 = arith.constant 0 : index
    %c128_355 = arith.constant 128 : index
    %778 = vector.load %arg19[%c0_354, %c128_355] : memref<16x512xf32, #tpu.memory_space<vmem>>, vector<8x256xf32>
    %c1_i32_356 = arith.constant 1 : i32
    %779 = vector.broadcast %c1_i32_356 : i32 to vector<1x256xi32>
    %780 = arith.andi %4, %779 : vector<1x256xi32>
    %c0_i32_357 = arith.constant 0 : i32
    %781 = vector.broadcast %c0_i32_357 : i32 to vector<1x256xi32>
    %782 = arith.cmpi eq, %780, %781 : vector<1x256xi32>
    %c1_i32_358 = arith.constant 1 : i32
    %783 = vector.broadcast %c1_i32_358 : i32 to vector<1x256xi32>
    %784 = arith.andi %6, %783 : vector<1x256xi32>
    %c0_i32_359 = arith.constant 0 : i32
    %785 = vector.broadcast %c0_i32_359 : i32 to vector<1x256xi32>
    %786 = arith.cmpi eq, %784, %785 : vector<1x256xi32>
    %787 = arith.andi %782, %786 : vector<1x256xi1>
    %cst_360 = arith.constant 0.000000e+00 : f32
    %788 = vector.shape_cast %787 : vector<1x256xi1> to vector<1x256xi1>
    %789 = vector.broadcast %788 : vector<1x256xi1> to vector<8x256xi1>
    %790 = vector.broadcast %cst_360 : f32 to vector<8x256xf32>
    %791 = arith.select %789, %778, %790 : vector<8x256xi1>, vector<8x256xf32>
    %792 = arith.addf %773, %791 : vector<8x256xf32>
    %c1 = arith.constant 1 : index
    %c0_361 = arith.constant 0 : index
    %c0_362 = arith.constant 0 : index
    %793 = vector.load %arg10[%c1, %c0_361, %c0_362] : memref<4x8x16xf32, #tpu.memory_space<vmem>>, vector<1x8x16xf32>
    %794 = vector.shape_cast %793 : vector<1x8x16xf32> to vector<8x16xf32>
    %cst_363 = arith.constant dense<0.000000e+00> : vector<8x256xf32>
    %795 = tpu.matmul %794, %772, %cst_363 {dimension_numbers = #tpu.dot_dimension_numbers<[1], [0], [0], [1], [0, 0, 1, 1], [], []>} : vector<8x16xf32>, vector<16x256xf32>, vector<8x256xf32> -> vector<8x256xf32>
    %c0_364 = arith.constant 0 : index
    %c128_365 = arith.constant 128 : index
    %796 = vector.load %arg19[%c0_364, %c128_365] : memref<16x512xf32, #tpu.memory_space<vmem>>, vector<8x256xf32>
    tpu.vector_store %arg19[%c0_364, %c128_365], %795 {strides = array<i32>} : memref<16x512xf32, #tpu.memory_space<vmem>>, vector<8x256xf32>,
    %c0_366 = arith.constant 0 : index
    %c127_367 = arith.constant 127 : index
    %797 = vector.load %arg19[%c0_366, %c127_367] : memref<16x512xf32, #tpu.memory_space<vmem>>, vector<8x256xf32>
    %c1_i32_368 = arith.constant 1 : i32
    %798 = vector.broadcast %c1_i32_368 : i32 to vector<1x256xi32>
    %799 = arith.andi %4, %798 : vector<1x256xi32>
    %c0_i32_369 = arith.constant 0 : i32
    %800 = vector.broadcast %c0_i32_369 : i32 to vector<1x256xi32>
    %801 = arith.cmpi eq, %799, %800 : vector<1x256xi32>
    %c1_i32_370 = arith.constant 1 : i32
    %802 = vector.broadcast %c1_i32_370 : i32 to vector<1x256xi32>
    %803 = arith.andi %6, %802 : vector<1x256xi32>
    %c1_i32_371 = arith.constant 1 : i32
    %804 = vector.broadcast %c1_i32_371 : i32 to vector<1x256xi32>
    %805 = arith.cmpi eq, %803, %804 : vector<1x256xi32>
    %806 = arith.andi %801, %805 : vector<1x256xi1>
    %cst_372 = arith.constant 0.000000e+00 : f32
    %807 = vector.shape_cast %806 : vector<1x256xi1> to vector<1x256xi1>
    %808 = vector.broadcast %807 : vector<1x256xi1> to vector<8x256xi1>
    %809 = vector.broadcast %cst_372 : f32 to vector<8x256xf32>
    %810 = arith.select %808, %797, %809 : vector<8x256xi1>, vector<8x256xf32>
    %811 = arith.addf %792, %810 : vector<8x256xf32>
    %c2 = arith.constant 2 : index
    %c0_373 = arith.constant 0 : index
    %c0_374 = arith.constant 0 : index
    %812 = vector.load %arg10[%c2, %c0_373, %c0_374] : memref<4x8x16xf32, #tpu.memory_space<vmem>>, vector<1x8x16xf32>
    %813 = vector.shape_cast %812 : vector<1x8x16xf32> to vector<8x16xf32>
    %cst_375 = arith.constant dense<0.000000e+00> : vector<8x256xf32>
    %814 = tpu.matmul %813, %772, %cst_375 {dimension_numbers = #tpu.dot_dimension_numbers<[1], [0], [0], [1], [0, 0, 1, 1], [], []>} : vector<8x16xf32>, vector<16x256xf32>, vector<8x256xf32> -> vector<8x256xf32>
    %c0_376 = arith.constant 0 : index
    %c128_377 = arith.constant 128 : index
    %815 = vector.load %arg19[%c0_376, %c128_377] : memref<16x512xf32, #tpu.memory_space<vmem>>, vector<8x256xf32>
    tpu.vector_store %arg19[%c0_376, %c128_377], %814 {strides = array<i32>} : memref<16x512xf32, #tpu.memory_space<vmem>>, vector<8x256xf32>,
    %c0_378 = arith.constant 0 : index
    %c112_379 = arith.constant 112 : index
    %816 = vector.load %arg19[%c0_378, %c112_379] : memref<16x512xf32, #tpu.memory_space<vmem>>, vector<8x256xf32>
    %c1_i32_380 = arith.constant 1 : i32
    %817 = vector.broadcast %c1_i32_380 : i32 to vector<1x256xi32>
    %818 = arith.andi %4, %817 : vector<1x256xi32>
    %c1_i32_381 = arith.constant 1 : i32
    %819 = vector.broadcast %c1_i32_381 : i32 to vector<1x256xi32>
    %820 = arith.cmpi eq, %818, %819 : vector<1x256xi32>
    %c1_i32_382 = arith.constant 1 : i32
    %821 = vector.broadcast %c1_i32_382 : i32 to vector<1x256xi32>
    %822 = arith.andi %6, %821 : vector<1x256xi32>
    %c0_i32_383 = arith.constant 0 : i32
    %823 = vector.broadcast %c0_i32_383 : i32 to vector<1x256xi32>
    %824 = arith.cmpi eq, %822, %823 : vector<1x256xi32>
    %825 = arith.andi %820, %824 : vector<1x256xi1>
    %cst_384 = arith.constant 0.000000e+00 : f32
    %826 = vector.shape_cast %825 : vector<1x256xi1> to vector<1x256xi1>
    %827 = vector.broadcast %826 : vector<1x256xi1> to vector<8x256xi1>
    %828 = vector.broadcast %cst_384 : f32 to vector<8x256xf32>
    %829 = arith.select %827, %816, %828 : vector<8x256xi1>, vector<8x256xf32>
    %830 = arith.addf %811, %829 : vector<8x256xf32>
    %c3 = arith.constant 3 : index
    %c0_385 = arith.constant 0 : index
    %c0_386 = arith.constant 0 : index
    %831 = vector.load %arg10[%c3, %c0_385, %c0_386] : memref<4x8x16xf32, #tpu.memory_space<vmem>>, vector<1x8x16xf32>
    %832 = vector.shape_cast %831 : vector<1x8x16xf32> to vector<8x16xf32>
    %cst_387 = arith.constant dense<0.000000e+00> : vector<8x256xf32>
    %833 = tpu.matmul %832, %772, %cst_387 {dimension_numbers = #tpu.dot_dimension_numbers<[1], [0], [0], [1], [0, 0, 1, 1], [], []>} : vector<8x16xf32>, vector<16x256xf32>, vector<8x256xf32> -> vector<8x256xf32>
    %c0_388 = arith.constant 0 : index
    %c128_389 = arith.constant 128 : index
    %834 = vector.load %arg19[%c0_388, %c128_389] : memref<16x512xf32, #tpu.memory_space<vmem>>, vector<8x256xf32>
    tpu.vector_store %arg19[%c0_388, %c128_389], %833 {strides = array<i32>} : memref<16x512xf32, #tpu.memory_space<vmem>>, vector<8x256xf32>,
    %c0_390 = arith.constant 0 : index
    %c111_391 = arith.constant 111 : index
    %835 = vector.load %arg19[%c0_390, %c111_391] : memref<16x512xf32, #tpu.memory_space<vmem>>, vector<8x256xf32>
    %c1_i32_392 = arith.constant 1 : i32
    %836 = vector.broadcast %c1_i32_392 : i32 to vector<1x256xi32>
    %837 = arith.andi %4, %836 : vector<1x256xi32>
    %c1_i32_393 = arith.constant 1 : i32
    %838 = vector.broadcast %c1_i32_393 : i32 to vector<1x256xi32>
    %839 = arith.cmpi eq, %837, %838 : vector<1x256xi32>
    %c1_i32_394 = arith.constant 1 : i32
    %840 = vector.broadcast %c1_i32_394 : i32 to vector<1x256xi32>
    %841 = arith.andi %6, %840 : vector<1x256xi32>
    %c1_i32_395 = arith.constant 1 : i32
    %842 = vector.broadcast %c1_i32_395 : i32 to vector<1x256xi32>
    %843 = arith.cmpi eq, %841, %842 : vector<1x256xi32>
    %844 = arith.andi %839, %843 : vector<1x256xi1>
    %cst_396 = arith.constant 0.000000e+00 : f32
    %845 = vector.shape_cast %844 : vector<1x256xi1> to vector<1x256xi1>
    %846 = vector.broadcast %845 : vector<1x256xi1> to vector<8x256xi1>
    %847 = vector.broadcast %cst_396 : f32 to vector<8x256xf32>
    %848 = arith.select %846, %835, %847 : vector<8x256xi1>, vector<8x256xf32>
    %849 = arith.addf %830, %848 : vector<8x256xf32>
    %c0_397 = arith.constant 0 : index
    %c0_398 = arith.constant 0 : index
    %850 = vector.load %arg11[%c0_397, %c0_398] : memref<8x1xf32, #tpu.memory_space<vmem>>, vector<8x1xf32>
    %851 = vector.broadcast %850 : vector<8x1xf32> to vector<8x256xf32>
    %852 = arith.addf %849, %851 : vector<8x256xf32>
    %853 = tpu.concatenate %386, %852 in 0 : vector<8x256xf32>, vector<8x256xf32> -> vector<16x256xf32>
    %c0_399 = arith.constant 0 : index
    %c128_400 = arith.constant 128 : index
    %854 = vector.load %arg19[%c0_399, %c128_400] : memref<16x512xf32, #tpu.memory_space<vmem>>, vector<16x256xf32>
    tpu.vector_store %arg19[%c0_399, %c128_400], %853 {strides = array<i32>} : memref<16x512xf32, #tpu.memory_space<vmem>>, vector<16x256xf32>,
    %c0_401 = arith.constant 0 : index
    %c111_402 = arith.constant 111 : index
    %855 = vector.load %arg19[%c0_401, %c111_402] : memref<16x512xf32, #tpu.memory_space<vmem>>, vector<16x256xf32>
    %c-1_i32_403 = arith.constant -1 : i32
    %856 = vector.broadcast %c-1_i32_403 : i32 to vector<1x256xi32>
    %857 = arith.addi %4, %856 : vector<1x256xi32>
    %c-1_i32_404 = arith.constant -1 : i32
    %858 = vector.broadcast %c-1_i32_404 : i32 to vector<1x256xi32>
    %859 = arith.addi %6, %858 : vector<1x256xi32>
    %c0_i32_405 = arith.constant 0 : i32
    %860 = vector.broadcast %c0_i32_405 : i32 to vector<1x256xi32>
    %861 = arith.cmpi sge, %857, %860 : vector<1x256xi32>
    %c16_i32_406 = arith.constant 16 : i32
    %862 = vector.broadcast %c16_i32_406 : i32 to vector<1x256xi32>
    %863 = arith.cmpi slt, %857, %862 : vector<1x256xi32>
    %864 = arith.andi %861, %863 : vector<1x256xi1>
    %c0_i32_407 = arith.constant 0 : i32
    %865 = vector.broadcast %c0_i32_407 : i32 to vector<1x256xi32>
    %866 = arith.cmpi sge, %859, %865 : vector<1x256xi32>
    %867 = arith.andi %864, %866 : vector<1x256xi1>
    %c16_i32_408 = arith.constant 16 : i32
    %868 = vector.broadcast %c16_i32_408 : i32 to vector<1x256xi32>
    %869 = arith.cmpi slt, %859, %868 : vector<1x256xi32>
    %870 = arith.andi %867, %869 : vector<1x256xi1>
    %cst_409 = arith.constant 0.000000e+00 : f32
    %871 = vector.shape_cast %870 : vector<1x256xi1> to vector<1x256xi1>
    %872 = vector.broadcast %871 : vector<1x256xi1> to vector<16x256xi1>
    %873 = vector.broadcast %cst_409 : f32 to vector<16x256xf32>
    %874 = arith.select %872, %855, %873 : vector<16x256xi1>, vector<16x256xf32>
    %c0_410 = arith.constant 0 : index
    %c112_411 = arith.constant 112 : index
    %875 = vector.load %arg19[%c0_410, %c112_411] : memref<16x512xf32, #tpu.memory_space<vmem>>, vector<16x256xf32>
    %c-1_i32_412 = arith.constant -1 : i32
    %876 = vector.broadcast %c-1_i32_412 : i32 to vector<1x256xi32>
    %877 = arith.addi %4, %876 : vector<1x256xi32>
    %c0_i32_413 = arith.constant 0 : i32
    %878 = vector.broadcast %c0_i32_413 : i32 to vector<1x256xi32>
    %879 = arith.addi %6, %878 : vector<1x256xi32>
    %c0_i32_414 = arith.constant 0 : i32
    %880 = vector.broadcast %c0_i32_414 : i32 to vector<1x256xi32>
    %881 = arith.cmpi sge, %877, %880 : vector<1x256xi32>
    %c16_i32_415 = arith.constant 16 : i32
    %882 = vector.broadcast %c16_i32_415 : i32 to vector<1x256xi32>
    %883 = arith.cmpi slt, %877, %882 : vector<1x256xi32>
    %884 = arith.andi %881, %883 : vector<1x256xi1>
    %c0_i32_416 = arith.constant 0 : i32
    %885 = vector.broadcast %c0_i32_416 : i32 to vector<1x256xi32>
    %886 = arith.cmpi sge, %879, %885 : vector<1x256xi32>
    %887 = arith.andi %884, %886 : vector<1x256xi1>
    %c16_i32_417 = arith.constant 16 : i32
    %888 = vector.broadcast %c16_i32_417 : i32 to vector<1x256xi32>
    %889 = arith.cmpi slt, %879, %888 : vector<1x256xi32>
    %890 = arith.andi %887, %889 : vector<1x256xi1>
    %cst_418 = arith.constant 0.000000e+00 : f32
    %891 = vector.shape_cast %890 : vector<1x256xi1> to vector<1x256xi1>
    %892 = vector.broadcast %891 : vector<1x256xi1> to vector<16x256xi1>
    %893 = vector.broadcast %cst_418 : f32 to vector<16x256xf32>
    %894 = arith.select %892, %875, %893 : vector<16x256xi1>, vector<16x256xf32>
    %c0_419 = arith.constant 0 : index
    %c113_420 = arith.constant 113 : index
    %895 = vector.load %arg19[%c0_419, %c113_420] : memref<16x512xf32, #tpu.memory_space<vmem>>, vector<16x256xf32>
    %c-1_i32_421 = arith.constant -1 : i32
    %896 = vector.broadcast %c-1_i32_421 : i32 to vector<1x256xi32>
    %897 = arith.addi %4, %896 : vector<1x256xi32>
    %c1_i32_422 = arith.constant 1 : i32
    %898 = vector.broadcast %c1_i32_422 : i32 to vector<1x256xi32>
    %899 = arith.addi %6, %898 : vector<1x256xi32>
    %c0_i32_423 = arith.constant 0 : i32
    %900 = vector.broadcast %c0_i32_423 : i32 to vector<1x256xi32>
    %901 = arith.cmpi sge, %897, %900 : vector<1x256xi32>
    %c16_i32_424 = arith.constant 16 : i32
    %902 = vector.broadcast %c16_i32_424 : i32 to vector<1x256xi32>
    %903 = arith.cmpi slt, %897, %902 : vector<1x256xi32>
    %904 = arith.andi %901, %903 : vector<1x256xi1>
    %c0_i32_425 = arith.constant 0 : i32
    %905 = vector.broadcast %c0_i32_425 : i32 to vector<1x256xi32>
    %906 = arith.cmpi sge, %899, %905 : vector<1x256xi32>
    %907 = arith.andi %904, %906 : vector<1x256xi1>
    %c16_i32_426 = arith.constant 16 : i32
    %908 = vector.broadcast %c16_i32_426 : i32 to vector<1x256xi32>
    %909 = arith.cmpi slt, %899, %908 : vector<1x256xi32>
    %910 = arith.andi %907, %909 : vector<1x256xi1>
    %cst_427 = arith.constant 0.000000e+00 : f32
    %911 = vector.shape_cast %910 : vector<1x256xi1> to vector<1x256xi1>
    %912 = vector.broadcast %911 : vector<1x256xi1> to vector<16x256xi1>
    %913 = vector.broadcast %cst_427 : f32 to vector<16x256xf32>
    %914 = arith.select %912, %895, %913 : vector<16x256xi1>, vector<16x256xf32>
    %c0_428 = arith.constant 0 : index
    %c127_429 = arith.constant 127 : index
    %915 = vector.load %arg19[%c0_428, %c127_429] : memref<16x512xf32, #tpu.memory_space<vmem>>, vector<16x256xf32>
    %c0_i32_430 = arith.constant 0 : i32
    %916 = vector.broadcast %c0_i32_430 : i32 to vector<1x256xi32>
    %917 = arith.addi %4, %916 : vector<1x256xi32>
    %c-1_i32_431 = arith.constant -1 : i32
    %918 = vector.broadcast %c-1_i32_431 : i32 to vector<1x256xi32>
    %919 = arith.addi %6, %918 : vector<1x256xi32>
    %c0_i32_432 = arith.constant 0 : i32
    %920 = vector.broadcast %c0_i32_432 : i32 to vector<1x256xi32>
    %921 = arith.cmpi sge, %917, %920 : vector<1x256xi32>
    %c16_i32_433 = arith.constant 16 : i32
    %922 = vector.broadcast %c16_i32_433 : i32 to vector<1x256xi32>
    %923 = arith.cmpi slt, %917, %922 : vector<1x256xi32>
    %924 = arith.andi %921, %923 : vector<1x256xi1>
    %c0_i32_434 = arith.constant 0 : i32
    %925 = vector.broadcast %c0_i32_434 : i32 to vector<1x256xi32>
    %926 = arith.cmpi sge, %919, %925 : vector<1x256xi32>
    %927 = arith.andi %924, %926 : vector<1x256xi1>
    %c16_i32_435 = arith.constant 16 : i32
    %928 = vector.broadcast %c16_i32_435 : i32 to vector<1x256xi32>
    %929 = arith.cmpi slt, %919, %928 : vector<1x256xi32>
    %930 = arith.andi %927, %929 : vector<1x256xi1>
    %cst_436 = arith.constant 0.000000e+00 : f32
    %931 = vector.shape_cast %930 : vector<1x256xi1> to vector<1x256xi1>
    %932 = vector.broadcast %931 : vector<1x256xi1> to vector<16x256xi1>
    %933 = vector.broadcast %cst_436 : f32 to vector<16x256xf32>
    %934 = arith.select %932, %915, %933 : vector<16x256xi1>, vector<16x256xf32>
    %c0_437 = arith.constant 0 : index
    %c128_438 = arith.constant 128 : index
    %935 = vector.load %arg19[%c0_437, %c128_438] : memref<16x512xf32, #tpu.memory_space<vmem>>, vector<16x256xf32>
    %c0_i32_439 = arith.constant 0 : i32
    %936 = vector.broadcast %c0_i32_439 : i32 to vector<1x256xi32>
    %937 = arith.addi %4, %936 : vector<1x256xi32>
    %c0_i32_440 = arith.constant 0 : i32
    %938 = vector.broadcast %c0_i32_440 : i32 to vector<1x256xi32>
    %939 = arith.addi %6, %938 : vector<1x256xi32>
    %c0_i32_441 = arith.constant 0 : i32
    %940 = vector.broadcast %c0_i32_441 : i32 to vector<1x256xi32>
    %941 = arith.cmpi sge, %937, %940 : vector<1x256xi32>
    %c16_i32_442 = arith.constant 16 : i32
    %942 = vector.broadcast %c16_i32_442 : i32 to vector<1x256xi32>
    %943 = arith.cmpi slt, %937, %942 : vector<1x256xi32>
    %944 = arith.andi %941, %943 : vector<1x256xi1>
    %c0_i32_443 = arith.constant 0 : i32
    %945 = vector.broadcast %c0_i32_443 : i32 to vector<1x256xi32>
    %946 = arith.cmpi sge, %939, %945 : vector<1x256xi32>
    %947 = arith.andi %944, %946 : vector<1x256xi1>
    %c16_i32_444 = arith.constant 16 : i32
    %948 = vector.broadcast %c16_i32_444 : i32 to vector<1x256xi32>
    %949 = arith.cmpi slt, %939, %948 : vector<1x256xi32>
    %950 = arith.andi %947, %949 : vector<1x256xi1>
    %cst_445 = arith.constant 0.000000e+00 : f32
    %951 = vector.shape_cast %950 : vector<1x256xi1> to vector<1x256xi1>
    %952 = vector.broadcast %951 : vector<1x256xi1> to vector<16x256xi1>
    %953 = vector.broadcast %cst_445 : f32 to vector<16x256xf32>
    %954 = arith.select %952, %935, %953 : vector<16x256xi1>, vector<16x256xf32>
    %c0_446 = arith.constant 0 : index
    %c129_447 = arith.constant 129 : index
    %955 = vector.load %arg19[%c0_446, %c129_447] : memref<16x512xf32, #tpu.memory_space<vmem>>, vector<16x256xf32>
    %c0_i32_448 = arith.constant 0 : i32
    %956 = vector.broadcast %c0_i32_448 : i32 to vector<1x256xi32>
    %957 = arith.addi %4, %956 : vector<1x256xi32>
    %c1_i32_449 = arith.constant 1 : i32
    %958 = vector.broadcast %c1_i32_449 : i32 to vector<1x256xi32>
    %959 = arith.addi %6, %958 : vector<1x256xi32>
    %c0_i32_450 = arith.constant 0 : i32
    %960 = vector.broadcast %c0_i32_450 : i32 to vector<1x256xi32>
    %961 = arith.cmpi sge, %957, %960 : vector<1x256xi32>
    %c16_i32_451 = arith.constant 16 : i32
    %962 = vector.broadcast %c16_i32_451 : i32 to vector<1x256xi32>
    %963 = arith.cmpi slt, %957, %962 : vector<1x256xi32>
    %964 = arith.andi %961, %963 : vector<1x256xi1>
    %c0_i32_452 = arith.constant 0 : i32
    %965 = vector.broadcast %c0_i32_452 : i32 to vector<1x256xi32>
    %966 = arith.cmpi sge, %959, %965 : vector<1x256xi32>
    %967 = arith.andi %964, %966 : vector<1x256xi1>
    %c16_i32_453 = arith.constant 16 : i32
    %968 = vector.broadcast %c16_i32_453 : i32 to vector<1x256xi32>
    %969 = arith.cmpi slt, %959, %968 : vector<1x256xi32>
    %970 = arith.andi %967, %969 : vector<1x256xi1>
    %cst_454 = arith.constant 0.000000e+00 : f32
    %971 = vector.shape_cast %970 : vector<1x256xi1> to vector<1x256xi1>
    %972 = vector.broadcast %971 : vector<1x256xi1> to vector<16x256xi1>
    %973 = vector.broadcast %cst_454 : f32 to vector<16x256xf32>
    %974 = arith.select %972, %955, %973 : vector<16x256xi1>, vector<16x256xf32>
    %c0_455 = arith.constant 0 : index
    %c143_456 = arith.constant 143 : index
    %975 = vector.load %arg19[%c0_455, %c143_456] : memref<16x512xf32, #tpu.memory_space<vmem>>, vector<16x256xf32>
    %c1_i32_457 = arith.constant 1 : i32
    %976 = vector.broadcast %c1_i32_457 : i32 to vector<1x256xi32>
    %977 = arith.addi %4, %976 : vector<1x256xi32>
    %c-1_i32_458 = arith.constant -1 : i32
    %978 = vector.broadcast %c-1_i32_458 : i32 to vector<1x256xi32>
    %979 = arith.addi %6, %978 : vector<1x256xi32>
    %c0_i32_459 = arith.constant 0 : i32
    %980 = vector.broadcast %c0_i32_459 : i32 to vector<1x256xi32>
    %981 = arith.cmpi sge, %977, %980 : vector<1x256xi32>
    %c16_i32_460 = arith.constant 16 : i32
    %982 = vector.broadcast %c16_i32_460 : i32 to vector<1x256xi32>
    %983 = arith.cmpi slt, %977, %982 : vector<1x256xi32>
    %984 = arith.andi %981, %983 : vector<1x256xi1>
    %c0_i32_461 = arith.constant 0 : i32
    %985 = vector.broadcast %c0_i32_461 : i32 to vector<1x256xi32>
    %986 = arith.cmpi sge, %979, %985 : vector<1x256xi32>
    %987 = arith.andi %984, %986 : vector<1x256xi1>
    %c16_i32_462 = arith.constant 16 : i32
    %988 = vector.broadcast %c16_i32_462 : i32 to vector<1x256xi32>
    %989 = arith.cmpi slt, %979, %988 : vector<1x256xi32>
    %990 = arith.andi %987, %989 : vector<1x256xi1>
    %cst_463 = arith.constant 0.000000e+00 : f32
    %991 = vector.shape_cast %990 : vector<1x256xi1> to vector<1x256xi1>
    %992 = vector.broadcast %991 : vector<1x256xi1> to vector<16x256xi1>
    %993 = vector.broadcast %cst_463 : f32 to vector<16x256xf32>
    %994 = arith.select %992, %975, %993 : vector<16x256xi1>, vector<16x256xf32>
    %c0_464 = arith.constant 0 : index
    %c144_465 = arith.constant 144 : index
    %995 = vector.load %arg19[%c0_464, %c144_465] : memref<16x512xf32, #tpu.memory_space<vmem>>, vector<16x256xf32>
    %c1_i32_466 = arith.constant 1 : i32
    %996 = vector.broadcast %c1_i32_466 : i32 to vector<1x256xi32>
    %997 = arith.addi %4, %996 : vector<1x256xi32>
    %c0_i32_467 = arith.constant 0 : i32
    %998 = vector.broadcast %c0_i32_467 : i32 to vector<1x256xi32>
    %999 = arith.addi %6, %998 : vector<1x256xi32>
    %c0_i32_468 = arith.constant 0 : i32
    %1000 = vector.broadcast %c0_i32_468 : i32 to vector<1x256xi32>
    %1001 = arith.cmpi sge, %997, %1000 : vector<1x256xi32>
    %c16_i32_469 = arith.constant 16 : i32
    %1002 = vector.broadcast %c16_i32_469 : i32 to vector<1x256xi32>
    %1003 = arith.cmpi slt, %997, %1002 : vector<1x256xi32>
    %1004 = arith.andi %1001, %1003 : vector<1x256xi1>
    %c0_i32_470 = arith.constant 0 : i32
    %1005 = vector.broadcast %c0_i32_470 : i32 to vector<1x256xi32>
    %1006 = arith.cmpi sge, %999, %1005 : vector<1x256xi32>
    %1007 = arith.andi %1004, %1006 : vector<1x256xi1>
    %c16_i32_471 = arith.constant 16 : i32
    %1008 = vector.broadcast %c16_i32_471 : i32 to vector<1x256xi32>
    %1009 = arith.cmpi slt, %999, %1008 : vector<1x256xi32>
    %1010 = arith.andi %1007, %1009 : vector<1x256xi1>
    %cst_472 = arith.constant 0.000000e+00 : f32
    %1011 = vector.shape_cast %1010 : vector<1x256xi1> to vector<1x256xi1>
    %1012 = vector.broadcast %1011 : vector<1x256xi1> to vector<16x256xi1>
    %1013 = vector.broadcast %cst_472 : f32 to vector<16x256xf32>
    %1014 = arith.select %1012, %995, %1013 : vector<16x256xi1>, vector<16x256xf32>
    %c0_473 = arith.constant 0 : index
    %c145_474 = arith.constant 145 : index
    %1015 = vector.load %arg19[%c0_473, %c145_474] : memref<16x512xf32, #tpu.memory_space<vmem>>, vector<16x256xf32>
    %c1_i32_475 = arith.constant 1 : i32
    %1016 = vector.broadcast %c1_i32_475 : i32 to vector<1x256xi32>
    %1017 = arith.addi %4, %1016 : vector<1x256xi32>
    %c1_i32_476 = arith.constant 1 : i32
    %1018 = vector.broadcast %c1_i32_476 : i32 to vector<1x256xi32>
    %1019 = arith.addi %6, %1018 : vector<1x256xi32>
    %c0_i32_477 = arith.constant 0 : i32
    %1020 = vector.broadcast %c0_i32_477 : i32 to vector<1x256xi32>
    %1021 = arith.cmpi sge, %1017, %1020 : vector<1x256xi32>
    %c16_i32_478 = arith.constant 16 : i32
    %1022 = vector.broadcast %c16_i32_478 : i32 to vector<1x256xi32>
    %1023 = arith.cmpi slt, %1017, %1022 : vector<1x256xi32>
    %1024 = arith.andi %1021, %1023 : vector<1x256xi1>
    %c0_i32_479 = arith.constant 0 : i32
    %1025 = vector.broadcast %c0_i32_479 : i32 to vector<1x256xi32>
    %1026 = arith.cmpi sge, %1019, %1025 : vector<1x256xi32>
    %1027 = arith.andi %1024, %1026 : vector<1x256xi1>
    %c16_i32_480 = arith.constant 16 : i32
    %1028 = vector.broadcast %c16_i32_480 : i32 to vector<1x256xi32>
    %1029 = arith.cmpi slt, %1019, %1028 : vector<1x256xi32>
    %1030 = arith.andi %1027, %1029 : vector<1x256xi1>
    %cst_481 = arith.constant 0.000000e+00 : f32
    %1031 = vector.shape_cast %1030 : vector<1x256xi1> to vector<1x256xi1>
    %1032 = vector.broadcast %1031 : vector<1x256xi1> to vector<16x256xi1>
    %1033 = vector.broadcast %cst_481 : f32 to vector<16x256xf32>
    %1034 = arith.select %1032, %1015, %1033 : vector<16x256xi1>, vector<16x256xf32>
    %1035 = tpu.concatenate %874, %894, %914, %934, %954, %974, %994, %1014, %1034 in 0 : vector<16x256xf32>, vector<16x256xf32>, vector<16x256xf32>, vector<16x256xf32>, vector<16x256xf32>, vector<16x256xf32>, vector<16x256xf32>, vector<16x256xf32>, vector<16x256xf32> -> vector<144x256xf32>
    %c0_482 = arith.constant 0 : index
    %c0_483 = arith.constant 0 : index
    %1036 = vector.load %arg12[%c0_482, %c0_483] : memref<8x144xf32, #tpu.memory_space<vmem>>, vector<8x144xf32>
    %cst_484 = arith.constant dense<0.000000e+00> : vector<8x256xf32>
    %1037 = tpu.matmul %1036, %1035, %cst_484 {dimension_numbers = #tpu.dot_dimension_numbers<[1], [0], [0], [1], [0, 0, 1, 1], [], []>} : vector<8x144xf32>, vector<144x256xf32>, vector<8x256xf32> -> vector<8x256xf32>
    %c0_485 = arith.constant 0 : index
    %c0_486 = arith.constant 0 : index
    %1038 = vector.load %arg13[%c0_485, %c0_486] : memref<8x1xf32, #tpu.memory_space<vmem>>, vector<8x1xf32>
    %1039 = vector.broadcast %1038 : vector<8x1xf32> to vector<8x256xf32>
    %1040 = arith.addf %1037, %1039 : vector<8x256xf32>
    %cst_487 = arith.constant 0.000000e+00 : f32
    %1041 = vector.broadcast %cst_487 : f32 to vector<8x256xf32>
    %1042 = arith.maximumf %1040, %1041 : vector<8x256xf32>
    %c0_488 = arith.constant 0 : index
    %c128_489 = arith.constant 128 : index
    %1043 = vector.load %arg19[%c0_488, %c128_489] : memref<16x512xf32, #tpu.memory_space<vmem>>, vector<8x256xf32>
    tpu.vector_store %arg19[%c0_488, %c128_489], %1042 {strides = array<i32>} : memref<16x512xf32, #tpu.memory_space<vmem>>, vector<8x256xf32>,
    %c0_490 = arith.constant 0 : index
    %c111_491 = arith.constant 111 : index
    %1044 = vector.load %arg19[%c0_490, %c111_491] : memref<16x512xf32, #tpu.memory_space<vmem>>, vector<8x256xf32>
    %c-1_i32_492 = arith.constant -1 : i32
    %1045 = vector.broadcast %c-1_i32_492 : i32 to vector<1x256xi32>
    %1046 = arith.addi %4, %1045 : vector<1x256xi32>
    %c-1_i32_493 = arith.constant -1 : i32
    %1047 = vector.broadcast %c-1_i32_493 : i32 to vector<1x256xi32>
    %1048 = arith.addi %6, %1047 : vector<1x256xi32>
    %c0_i32_494 = arith.constant 0 : i32
    %1049 = vector.broadcast %c0_i32_494 : i32 to vector<1x256xi32>
    %1050 = arith.cmpi sge, %1046, %1049 : vector<1x256xi32>
    %c16_i32_495 = arith.constant 16 : i32
    %1051 = vector.broadcast %c16_i32_495 : i32 to vector<1x256xi32>
    %1052 = arith.cmpi slt, %1046, %1051 : vector<1x256xi32>
    %1053 = arith.andi %1050, %1052 : vector<1x256xi1>
    %c0_i32_496 = arith.constant 0 : i32
    %1054 = vector.broadcast %c0_i32_496 : i32 to vector<1x256xi32>
    %1055 = arith.cmpi sge, %1048, %1054 : vector<1x256xi32>
    %1056 = arith.andi %1053, %1055 : vector<1x256xi1>
    %c16_i32_497 = arith.constant 16 : i32
    %1057 = vector.broadcast %c16_i32_497 : i32 to vector<1x256xi32>
    %1058 = arith.cmpi slt, %1048, %1057 : vector<1x256xi32>
    %1059 = arith.andi %1056, %1058 : vector<1x256xi1>
    %cst_498 = arith.constant 0.000000e+00 : f32
    %1060 = vector.shape_cast %1059 : vector<1x256xi1> to vector<1x256xi1>
    %1061 = vector.broadcast %1060 : vector<1x256xi1> to vector<8x256xi1>
    %1062 = vector.broadcast %cst_498 : f32 to vector<8x256xf32>
    %1063 = arith.select %1061, %1044, %1062 : vector<8x256xi1>, vector<8x256xf32>
    %c0_499 = arith.constant 0 : index
    %c112_500 = arith.constant 112 : index
    %1064 = vector.load %arg19[%c0_499, %c112_500] : memref<16x512xf32, #tpu.memory_space<vmem>>, vector<8x256xf32>
    %c-1_i32_501 = arith.constant -1 : i32
    %1065 = vector.broadcast %c-1_i32_501 : i32 to vector<1x256xi32>
    %1066 = arith.addi %4, %1065 : vector<1x256xi32>
    %c0_i32_502 = arith.constant 0 : i32
    %1067 = vector.broadcast %c0_i32_502 : i32 to vector<1x256xi32>
    %1068 = arith.addi %6, %1067 : vector<1x256xi32>
    %c0_i32_503 = arith.constant 0 : i32
    %1069 = vector.broadcast %c0_i32_503 : i32 to vector<1x256xi32>
    %1070 = arith.cmpi sge, %1066, %1069 : vector<1x256xi32>
    %c16_i32_504 = arith.constant 16 : i32
    %1071 = vector.broadcast %c16_i32_504 : i32 to vector<1x256xi32>
    %1072 = arith.cmpi slt, %1066, %1071 : vector<1x256xi32>
    %1073 = arith.andi %1070, %1072 : vector<1x256xi1>
    %c0_i32_505 = arith.constant 0 : i32
    %1074 = vector.broadcast %c0_i32_505 : i32 to vector<1x256xi32>
    %1075 = arith.cmpi sge, %1068, %1074 : vector<1x256xi32>
    %1076 = arith.andi %1073, %1075 : vector<1x256xi1>
    %c16_i32_506 = arith.constant 16 : i32
    %1077 = vector.broadcast %c16_i32_506 : i32 to vector<1x256xi32>
    %1078 = arith.cmpi slt, %1068, %1077 : vector<1x256xi32>
    %1079 = arith.andi %1076, %1078 : vector<1x256xi1>
    %cst_507 = arith.constant 0.000000e+00 : f32
    %1080 = vector.shape_cast %1079 : vector<1x256xi1> to vector<1x256xi1>
    %1081 = vector.broadcast %1080 : vector<1x256xi1> to vector<8x256xi1>
    %1082 = vector.broadcast %cst_507 : f32 to vector<8x256xf32>
    %1083 = arith.select %1081, %1064, %1082 : vector<8x256xi1>, vector<8x256xf32>
    %c0_508 = arith.constant 0 : index
    %c113_509 = arith.constant 113 : index
    %1084 = vector.load %arg19[%c0_508, %c113_509] : memref<16x512xf32, #tpu.memory_space<vmem>>, vector<8x256xf32>
    %c-1_i32_510 = arith.constant -1 : i32
    %1085 = vector.broadcast %c-1_i32_510 : i32 to vector<1x256xi32>
    %1086 = arith.addi %4, %1085 : vector<1x256xi32>
    %c1_i32_511 = arith.constant 1 : i32
    %1087 = vector.broadcast %c1_i32_511 : i32 to vector<1x256xi32>
    %1088 = arith.addi %6, %1087 : vector<1x256xi32>
    %c0_i32_512 = arith.constant 0 : i32
    %1089 = vector.broadcast %c0_i32_512 : i32 to vector<1x256xi32>
    %1090 = arith.cmpi sge, %1086, %1089 : vector<1x256xi32>
    %c16_i32_513 = arith.constant 16 : i32
    %1091 = vector.broadcast %c16_i32_513 : i32 to vector<1x256xi32>
    %1092 = arith.cmpi slt, %1086, %1091 : vector<1x256xi32>
    %1093 = arith.andi %1090, %1092 : vector<1x256xi1>
    %c0_i32_514 = arith.constant 0 : i32
    %1094 = vector.broadcast %c0_i32_514 : i32 to vector<1x256xi32>
    %1095 = arith.cmpi sge, %1088, %1094 : vector<1x256xi32>
    %1096 = arith.andi %1093, %1095 : vector<1x256xi1>
    %c16_i32_515 = arith.constant 16 : i32
    %1097 = vector.broadcast %c16_i32_515 : i32 to vector<1x256xi32>
    %1098 = arith.cmpi slt, %1088, %1097 : vector<1x256xi32>
    %1099 = arith.andi %1096, %1098 : vector<1x256xi1>
    %cst_516 = arith.constant 0.000000e+00 : f32
    %1100 = vector.shape_cast %1099 : vector<1x256xi1> to vector<1x256xi1>
    %1101 = vector.broadcast %1100 : vector<1x256xi1> to vector<8x256xi1>
    %1102 = vector.broadcast %cst_516 : f32 to vector<8x256xf32>
    %1103 = arith.select %1101, %1084, %1102 : vector<8x256xi1>, vector<8x256xf32>
    %c0_517 = arith.constant 0 : index
    %c127_518 = arith.constant 127 : index
    %1104 = vector.load %arg19[%c0_517, %c127_518] : memref<16x512xf32, #tpu.memory_space<vmem>>, vector<8x256xf32>
    %c0_i32_519 = arith.constant 0 : i32
    %1105 = vector.broadcast %c0_i32_519 : i32 to vector<1x256xi32>
    %1106 = arith.addi %4, %1105 : vector<1x256xi32>
    %c-1_i32_520 = arith.constant -1 : i32
    %1107 = vector.broadcast %c-1_i32_520 : i32 to vector<1x256xi32>
    %1108 = arith.addi %6, %1107 : vector<1x256xi32>
    %c0_i32_521 = arith.constant 0 : i32
    %1109 = vector.broadcast %c0_i32_521 : i32 to vector<1x256xi32>
    %1110 = arith.cmpi sge, %1106, %1109 : vector<1x256xi32>
    %c16_i32_522 = arith.constant 16 : i32
    %1111 = vector.broadcast %c16_i32_522 : i32 to vector<1x256xi32>
    %1112 = arith.cmpi slt, %1106, %1111 : vector<1x256xi32>
    %1113 = arith.andi %1110, %1112 : vector<1x256xi1>
    %c0_i32_523 = arith.constant 0 : i32
    %1114 = vector.broadcast %c0_i32_523 : i32 to vector<1x256xi32>
    %1115 = arith.cmpi sge, %1108, %1114 : vector<1x256xi32>
    %1116 = arith.andi %1113, %1115 : vector<1x256xi1>
    %c16_i32_524 = arith.constant 16 : i32
    %1117 = vector.broadcast %c16_i32_524 : i32 to vector<1x256xi32>
    %1118 = arith.cmpi slt, %1108, %1117 : vector<1x256xi32>
    %1119 = arith.andi %1116, %1118 : vector<1x256xi1>
    %cst_525 = arith.constant 0.000000e+00 : f32
    %1120 = vector.shape_cast %1119 : vector<1x256xi1> to vector<1x256xi1>
    %1121 = vector.broadcast %1120 : vector<1x256xi1> to vector<8x256xi1>
    %1122 = vector.broadcast %cst_525 : f32 to vector<8x256xf32>
    %1123 = arith.select %1121, %1104, %1122 : vector<8x256xi1>, vector<8x256xf32>
    %c0_526 = arith.constant 0 : index
    %c128_527 = arith.constant 128 : index
    %1124 = vector.load %arg19[%c0_526, %c128_527] : memref<16x512xf32, #tpu.memory_space<vmem>>, vector<8x256xf32>
    %c0_i32_528 = arith.constant 0 : i32
    %1125 = vector.broadcast %c0_i32_528 : i32 to vector<1x256xi32>
    %1126 = arith.addi %4, %1125 : vector<1x256xi32>
    %c0_i32_529 = arith.constant 0 : i32
    %1127 = vector.broadcast %c0_i32_529 : i32 to vector<1x256xi32>
    %1128 = arith.addi %6, %1127 : vector<1x256xi32>
    %c0_i32_530 = arith.constant 0 : i32
    %1129 = vector.broadcast %c0_i32_530 : i32 to vector<1x256xi32>
    %1130 = arith.cmpi sge, %1126, %1129 : vector<1x256xi32>
    %c16_i32_531 = arith.constant 16 : i32
    %1131 = vector.broadcast %c16_i32_531 : i32 to vector<1x256xi32>
    %1132 = arith.cmpi slt, %1126, %1131 : vector<1x256xi32>
    %1133 = arith.andi %1130, %1132 : vector<1x256xi1>
    %c0_i32_532 = arith.constant 0 : i32
    %1134 = vector.broadcast %c0_i32_532 : i32 to vector<1x256xi32>
    %1135 = arith.cmpi sge, %1128, %1134 : vector<1x256xi32>
    %1136 = arith.andi %1133, %1135 : vector<1x256xi1>
    %c16_i32_533 = arith.constant 16 : i32
    %1137 = vector.broadcast %c16_i32_533 : i32 to vector<1x256xi32>
    %1138 = arith.cmpi slt, %1128, %1137 : vector<1x256xi32>
    %1139 = arith.andi %1136, %1138 : vector<1x256xi1>
    %cst_534 = arith.constant 0.000000e+00 : f32
    %1140 = vector.shape_cast %1139 : vector<1x256xi1> to vector<1x256xi1>
    %1141 = vector.broadcast %1140 : vector<1x256xi1> to vector<8x256xi1>
    %1142 = vector.broadcast %cst_534 : f32 to vector<8x256xf32>
    %1143 = arith.select %1141, %1124, %1142 : vector<8x256xi1>, vector<8x256xf32>
    %c0_535 = arith.constant 0 : index
    %c129_536 = arith.constant 129 : index
    %1144 = vector.load %arg19[%c0_535, %c129_536] : memref<16x512xf32, #tpu.memory_space<vmem>>, vector<8x256xf32>
    %c0_i32_537 = arith.constant 0 : i32
    %1145 = vector.broadcast %c0_i32_537 : i32 to vector<1x256xi32>
    %1146 = arith.addi %4, %1145 : vector<1x256xi32>
    %c1_i32_538 = arith.constant 1 : i32
    %1147 = vector.broadcast %c1_i32_538 : i32 to vector<1x256xi32>
    %1148 = arith.addi %6, %1147 : vector<1x256xi32>
    %c0_i32_539 = arith.constant 0 : i32
    %1149 = vector.broadcast %c0_i32_539 : i32 to vector<1x256xi32>
    %1150 = arith.cmpi sge, %1146, %1149 : vector<1x256xi32>
    %c16_i32_540 = arith.constant 16 : i32
    %1151 = vector.broadcast %c16_i32_540 : i32 to vector<1x256xi32>
    %1152 = arith.cmpi slt, %1146, %1151 : vector<1x256xi32>
    %1153 = arith.andi %1150, %1152 : vector<1x256xi1>
    %c0_i32_541 = arith.constant 0 : i32
    %1154 = vector.broadcast %c0_i32_541 : i32 to vector<1x256xi32>
    %1155 = arith.cmpi sge, %1148, %1154 : vector<1x256xi32>
    %1156 = arith.andi %1153, %1155 : vector<1x256xi1>
    %c16_i32_542 = arith.constant 16 : i32
    %1157 = vector.broadcast %c16_i32_542 : i32 to vector<1x256xi32>
    %1158 = arith.cmpi slt, %1148, %1157 : vector<1x256xi32>
    %1159 = arith.andi %1156, %1158 : vector<1x256xi1>
    %cst_543 = arith.constant 0.000000e+00 : f32
    %1160 = vector.shape_cast %1159 : vector<1x256xi1> to vector<1x256xi1>
    %1161 = vector.broadcast %1160 : vector<1x256xi1> to vector<8x256xi1>
    %1162 = vector.broadcast %cst_543 : f32 to vector<8x256xf32>
    %1163 = arith.select %1161, %1144, %1162 : vector<8x256xi1>, vector<8x256xf32>
    %c0_544 = arith.constant 0 : index
    %c143_545 = arith.constant 143 : index
    %1164 = vector.load %arg19[%c0_544, %c143_545] : memref<16x512xf32, #tpu.memory_space<vmem>>, vector<8x256xf32>
    %c1_i32_546 = arith.constant 1 : i32
    %1165 = vector.broadcast %c1_i32_546 : i32 to vector<1x256xi32>
    %1166 = arith.addi %4, %1165 : vector<1x256xi32>
    %c-1_i32_547 = arith.constant -1 : i32
    %1167 = vector.broadcast %c-1_i32_547 : i32 to vector<1x256xi32>
    %1168 = arith.addi %6, %1167 : vector<1x256xi32>
    %c0_i32_548 = arith.constant 0 : i32
    %1169 = vector.broadcast %c0_i32_548 : i32 to vector<1x256xi32>
    %1170 = arith.cmpi sge, %1166, %1169 : vector<1x256xi32>
    %c16_i32_549 = arith.constant 16 : i32
    %1171 = vector.broadcast %c16_i32_549 : i32 to vector<1x256xi32>
    %1172 = arith.cmpi slt, %1166, %1171 : vector<1x256xi32>
    %1173 = arith.andi %1170, %1172 : vector<1x256xi1>
    %c0_i32_550 = arith.constant 0 : i32
    %1174 = vector.broadcast %c0_i32_550 : i32 to vector<1x256xi32>
    %1175 = arith.cmpi sge, %1168, %1174 : vector<1x256xi32>
    %1176 = arith.andi %1173, %1175 : vector<1x256xi1>
    %c16_i32_551 = arith.constant 16 : i32
    %1177 = vector.broadcast %c16_i32_551 : i32 to vector<1x256xi32>
    %1178 = arith.cmpi slt, %1168, %1177 : vector<1x256xi32>
    %1179 = arith.andi %1176, %1178 : vector<1x256xi1>
    %cst_552 = arith.constant 0.000000e+00 : f32
    %1180 = vector.shape_cast %1179 : vector<1x256xi1> to vector<1x256xi1>
    %1181 = vector.broadcast %1180 : vector<1x256xi1> to vector<8x256xi1>
    %1182 = vector.broadcast %cst_552 : f32 to vector<8x256xf32>
    %1183 = arith.select %1181, %1164, %1182 : vector<8x256xi1>, vector<8x256xf32>
    %c0_553 = arith.constant 0 : index
    %c144_554 = arith.constant 144 : index
    %1184 = vector.load %arg19[%c0_553, %c144_554] : memref<16x512xf32, #tpu.memory_space<vmem>>, vector<8x256xf32>
    %c1_i32_555 = arith.constant 1 : i32
    %1185 = vector.broadcast %c1_i32_555 : i32 to vector<1x256xi32>
    %1186 = arith.addi %4, %1185 : vector<1x256xi32>
    %c0_i32_556 = arith.constant 0 : i32
    %1187 = vector.broadcast %c0_i32_556 : i32 to vector<1x256xi32>
    %1188 = arith.addi %6, %1187 : vector<1x256xi32>
    %c0_i32_557 = arith.constant 0 : i32
    %1189 = vector.broadcast %c0_i32_557 : i32 to vector<1x256xi32>
    %1190 = arith.cmpi sge, %1186, %1189 : vector<1x256xi32>
    %c16_i32_558 = arith.constant 16 : i32
    %1191 = vector.broadcast %c16_i32_558 : i32 to vector<1x256xi32>
    %1192 = arith.cmpi slt, %1186, %1191 : vector<1x256xi32>
    %1193 = arith.andi %1190, %1192 : vector<1x256xi1>
    %c0_i32_559 = arith.constant 0 : i32
    %1194 = vector.broadcast %c0_i32_559 : i32 to vector<1x256xi32>
    %1195 = arith.cmpi sge, %1188, %1194 : vector<1x256xi32>
    %1196 = arith.andi %1193, %1195 : vector<1x256xi1>
    %c16_i32_560 = arith.constant 16 : i32
    %1197 = vector.broadcast %c16_i32_560 : i32 to vector<1x256xi32>
    %1198 = arith.cmpi slt, %1188, %1197 : vector<1x256xi32>
    %1199 = arith.andi %1196, %1198 : vector<1x256xi1>
    %cst_561 = arith.constant 0.000000e+00 : f32
    %1200 = vector.shape_cast %1199 : vector<1x256xi1> to vector<1x256xi1>
    %1201 = vector.broadcast %1200 : vector<1x256xi1> to vector<8x256xi1>
    %1202 = vector.broadcast %cst_561 : f32 to vector<8x256xf32>
    %1203 = arith.select %1201, %1184, %1202 : vector<8x256xi1>, vector<8x256xf32>
    %c0_562 = arith.constant 0 : index
    %c145_563 = arith.constant 145 : index
    %1204 = vector.load %arg19[%c0_562, %c145_563] : memref<16x512xf32, #tpu.memory_space<vmem>>, vector<8x256xf32>
    %c1_i32_564 = arith.constant 1 : i32
    %1205 = vector.broadcast %c1_i32_564 : i32 to vector<1x256xi32>
    %1206 = arith.addi %4, %1205 : vector<1x256xi32>
    %c1_i32_565 = arith.constant 1 : i32
    %1207 = vector.broadcast %c1_i32_565 : i32 to vector<1x256xi32>
    %1208 = arith.addi %6, %1207 : vector<1x256xi32>
    %c0_i32_566 = arith.constant 0 : i32
    %1209 = vector.broadcast %c0_i32_566 : i32 to vector<1x256xi32>
    %1210 = arith.cmpi sge, %1206, %1209 : vector<1x256xi32>
    %c16_i32_567 = arith.constant 16 : i32
    %1211 = vector.broadcast %c16_i32_567 : i32 to vector<1x256xi32>
    %1212 = arith.cmpi slt, %1206, %1211 : vector<1x256xi32>
    %1213 = arith.andi %1210, %1212 : vector<1x256xi1>
    %c0_i32_568 = arith.constant 0 : i32
    %1214 = vector.broadcast %c0_i32_568 : i32 to vector<1x256xi32>
    %1215 = arith.cmpi sge, %1208, %1214 : vector<1x256xi32>
    %1216 = arith.andi %1213, %1215 : vector<1x256xi1>
    %c16_i32_569 = arith.constant 16 : i32
    %1217 = vector.broadcast %c16_i32_569 : i32 to vector<1x256xi32>
    %1218 = arith.cmpi slt, %1208, %1217 : vector<1x256xi32>
    %1219 = arith.andi %1216, %1218 : vector<1x256xi1>
    %cst_570 = arith.constant 0.000000e+00 : f32
    %1220 = vector.shape_cast %1219 : vector<1x256xi1> to vector<1x256xi1>
    %1221 = vector.broadcast %1220 : vector<1x256xi1> to vector<8x256xi1>
    %1222 = vector.broadcast %cst_570 : f32 to vector<8x256xf32>
    %1223 = arith.select %1221, %1204, %1222 : vector<8x256xi1>, vector<8x256xf32>
    %1224 = tpu.concatenate %1063, %1083, %1103, %1123, %1143, %1163, %1183, %1203, %1223 in 0 : vector<8x256xf32>, vector<8x256xf32>, vector<8x256xf32>, vector<8x256xf32>, vector<8x256xf32>, vector<8x256xf32>, vector<8x256xf32>, vector<8x256xf32>, vector<8x256xf32> -> vector<72x256xf32>
    %c0_571 = arith.constant 0 : index
    %c0_572 = arith.constant 0 : index
    %1225 = vector.load %arg14[%c0_571, %c0_572] : memref<8x72xf32, #tpu.memory_space<vmem>>, vector<8x72xf32>
    %cst_573 = arith.constant dense<0.000000e+00> : vector<8x256xf32>
    %1226 = tpu.matmul %1225, %1224, %cst_573 {dimension_numbers = #tpu.dot_dimension_numbers<[1], [0], [0], [1], [0, 0, 1, 1], [], []>} : vector<8x72xf32>, vector<72x256xf32>, vector<8x256xf32> -> vector<8x256xf32>
    %c0_574 = arith.constant 0 : index
    %c0_575 = arith.constant 0 : index
    %1227 = vector.load %arg15[%c0_574, %c0_575] : memref<8x1xf32, #tpu.memory_space<vmem>>, vector<8x1xf32>
    %1228 = vector.broadcast %1227 : vector<8x1xf32> to vector<8x256xf32>
    %1229 = arith.addf %1226, %1228 : vector<8x256xf32>
    %cst_576 = arith.constant 0.000000e+00 : f32
    %1230 = vector.broadcast %cst_576 : f32 to vector<8x256xf32>
    %1231 = arith.maximumf %1229, %1230 : vector<8x256xf32>
    %c0_577 = arith.constant 0 : index
    %c0_578 = arith.constant 0 : index
    %1232 = vector.load %arg16[%c0_577, %c0_578] : memref<1x8xf32, #tpu.memory_space<vmem>>, vector<1x8xf32>
    %cst_579 = arith.constant dense<0.000000e+00> : vector<1x256xf32>
    %1233 = tpu.matmul %1232, %1231, %cst_579 {dimension_numbers = #tpu.dot_dimension_numbers<[1], [0], [0], [1], [0, 0, 1, 1], [], []>} : vector<1x8xf32>, vector<8x256xf32>, vector<1x256xf32> -> vector<1x256xf32>
    %c0_580 = arith.constant 0 : index
    %c0_581 = arith.constant 0 : index
    %1234 = vector.load %arg17[%c0_580, %c0_581] : memref<1x1xf32, #tpu.memory_space<vmem>>, vector<1x1xf32>
    %1235 = vector.broadcast %1234 : vector<1x1xf32> to vector<1x256xf32>
    %1236 = arith.addf %1233, %1235 : vector<1x256xf32>
    %c0_582 = arith.constant 0 : index
    %c0_583 = arith.constant 0 : index
    %c0_584 = arith.constant 0 : index
    %1237 = vector.load %arg18[%c0_582, %c0_583, %c0_584] : memref<1x1x256xf32, #tpu.memory_space<vmem>>, vector<1x1x256xf32>
    %1238 = vector.shape_cast %1237 : vector<1x1x256xf32> to vector<1x256xf32>
    %1239 = vector.shape_cast %1236 : vector<1x256xf32> to vector<1x1x256xf32>
    tpu.vector_store %arg18[%c0_582, %c0_583, %c0_584], %1239 {strides = array<i32>} : memref<1x1x256xf32, #tpu.memory_space<vmem>>, vector<1x1x256xf32>,
    return
  }
  func.func @transform_0(%arg0: i32) -> (i32, i32, i32) {
    %c0_i32 = arith.constant 0 : i32
    %c0_i32_0 = arith.constant 0 : i32
    %c0_i32_1 = arith.constant 0 : i32
    return %arg0, %c0_i32, %c0_i32_0 : i32, i32, i32
  }
  func.func @transform_1(%arg0: i32) -> (i32, i32) {
    %c0_i32 = arith.constant 0 : i32
    %c0_i32_0 = arith.constant 0 : i32
    %c0_i32_1 = arith.constant 0 : i32
    return %c0_i32, %c0_i32_0 : i32, i32
  }
  func.func @transform_2(%arg0: i32) -> (i32, i32) {
    %c0_i32 = arith.constant 0 : i32
    %c0_i32_0 = arith.constant 0 : i32
    %c0_i32_1 = arith.constant 0 : i32
    return %c0_i32, %c0_i32_0 : i32, i32
  }
  func.func @transform_3(%arg0: i32) -> (i32, i32) {
    %c0_i32 = arith.constant 0 : i32
    %c0_i32_0 = arith.constant 0 : i32
    %c0_i32_1 = arith.constant 0 : i32
    return %c0_i32, %c0_i32_0 : i32, i32
  }
  func.func @transform_4(%arg0: i32) -> (i32, i32) {
    %c0_i32 = arith.constant 0 : i32
    %c0_i32_0 = arith.constant 0 : i32
    %c0_i32_1 = arith.constant 0 : i32
    return %c0_i32, %c0_i32_0 : i32, i32
  }
  func.func @transform_5(%arg0: i32) -> (i32, i32) {
    %c0_i32 = arith.constant 0 : i32
    %c0_i32_0 = arith.constant 0 : i32
    %c0_i32_1 = arith.constant 0 : i32
    return %c0_i32, %c0_i32_0 : i32, i32
  }
  func.func @transform_6(%arg0: i32) -> (i32, i32) {
    %c0_i32 = arith.constant 0 : i32
    %c0_i32_0 = arith.constant 0 : i32
    %c0_i32_1 = arith.constant 0 : i32
    return %c0_i32, %c0_i32_0 : i32, i32
  }
  func.func @transform_7(%arg0: i32) -> (i32, i32) {
    %c0_i32 = arith.constant 0 : i32
    %c0_i32_0 = arith.constant 0 : i32
    %c0_i32_1 = arith.constant 0 : i32
    return %c0_i32, %c0_i32_0 : i32, i32
  }
  func.func @transform_8(%arg0: i32) -> (i32, i32) {
    %c0_i32 = arith.constant 0 : i32
    %c0_i32_0 = arith.constant 0 : i32
    %c0_i32_1 = arith.constant 0 : i32
    return %c0_i32, %c0_i32_0 : i32, i32
  }
  func.func @transform_9(%arg0: i32) -> (i32, i32, i32) {
    %c0_i32 = arith.constant 0 : i32
    %c0_i32_0 = arith.constant 0 : i32
    %c0_i32_1 = arith.constant 0 : i32
    %c0_i32_2 = arith.constant 0 : i32
    return %c0_i32, %c0_i32_0, %c0_i32_1 : i32, i32, i32
  }
  func.func @transform_10(%arg0: i32) -> (i32, i32) {
    %c0_i32 = arith.constant 0 : i32
    %c0_i32_0 = arith.constant 0 : i32
    %c0_i32_1 = arith.constant 0 : i32
    return %c0_i32, %c0_i32_0 : i32, i32
  }
  func.func @transform_11(%arg0: i32) -> (i32, i32) {
    %c0_i32 = arith.constant 0 : i32
    %c0_i32_0 = arith.constant 0 : i32
    %c0_i32_1 = arith.constant 0 : i32
    return %c0_i32, %c0_i32_0 : i32, i32
  }
  func.func @transform_12(%arg0: i32) -> (i32, i32) {
    %c0_i32 = arith.constant 0 : i32
    %c0_i32_0 = arith.constant 0 : i32
    %c0_i32_1 = arith.constant 0 : i32
    return %c0_i32, %c0_i32_0 : i32, i32
  }
  func.func @transform_13(%arg0: i32) -> (i32, i32) {
    %c0_i32 = arith.constant 0 : i32
    %c0_i32_0 = arith.constant 0 : i32
    %c0_i32_1 = arith.constant 0 : i32
    return %c0_i32, %c0_i32_0 : i32, i32
  }
  func.func @transform_14(%arg0: i32) -> (i32, i32) {
    %c0_i32 = arith.constant 0 : i32
    %c0_i32_0 = arith.constant 0 : i32
    %c0_i32_1 = arith.constant 0 : i32
    return %c0_i32, %c0_i32_0 : i32, i32
  }
  func.func @transform_15(%arg0: i32) -> (i32, i32) {
    %c0_i32 = arith.constant 0 : i32
    %c0_i32_0 = arith.constant 0 : i32
    %c0_i32_1 = arith.constant 0 : i32
    return %c0_i32, %c0_i32_0 : i32, i32
  }
  func.func @transform_16(%arg0: i32) -> (i32, i32) {
    %c0_i32 = arith.constant 0 : i32
    %c0_i32_0 = arith.constant 0 : i32
    %c0_i32_1 = arith.constant 0 : i32
    return %c0_i32, %c0_i32_0 : i32, i32
  }
  func.func @transform_17(%arg0: i32) -> (i32, i32, i32) {
    %c0_i32 = arith.constant 0 : i32
    %c0_i32_0 = arith.constant 0 : i32
    %c0_i32_1 = arith.constant 0 : i32
    return %arg0, %c0_i32, %c0_i32_0 : i32, i32, i32
  }
}

</mosaic_0001>

<bundles_post_ra>
// kernel: segmentation_cnn_forward.1
= control target key start
LH: loop header
LB: loop body
LE: loop exit
PB: predicated region body
PF: predicated region fallthrough
CT: control target
= control target key end

     0   :  { %s2971_s26 = smov 0   ;;  %s4430_s0 = inlined_call_operand.vmem [shape: f32[2,8,256], index: 0, kind: input, shape index: {}]   ;;  %s4431_s1 = inlined_call_operand.vmem [shape: f32[8,72], index: 1, kind: input, shape index: {}]   ;;  %s4432_s2 = inlined_call_operand.vmem [shape: f32[8,1], index: 2, kind: input, shape index: {}]   ;;  %s4433_s3 = inlined_call_operand.vmem [shape: f32[8,72], index: 3, kind: input, shape index: {}]   ;;  %s4434_s4 = inlined_call_operand.vmem [shape: f32[8,1], index: 4, kind: input, shape index: {}]   ;;  %s4435_s5 = inlined_call_operand.vmem [shape: f32[16,72], index: 5, kind: input, shape index: {}]   ;;  %s4436_s6 = inlined_call_operand.vmem [shape: f32[16,1], index: 6, kind: input, shape index: {}]   ;;  %s4437_s7 = inlined_call_operand.vmem [shape: f32[16,144], index: 7, kind: input, shape index: {}]   ;;  %s4438_s8 = inlined_call_operand.vmem [shape: f32[16,1], index: 8, kind: input, shape index: {}]   ;;  %s4439_s9 = inlined_call_operand.vmem [shape: f32[4,8,16], index: 9, kind: input, shape index: {}]   ;;  %s4440_s10 = inlined_call_operand.vmem [shape: f32[8,1], index: 10, kind: input, shape index: {}]   ;;  %s4441_s11 = inlined_call_operand.vmem [shape: f32[8,144], index: 11, kind: input, shape index: {}]   ;;  %s4442_s12 = inlined_call_operand.vmem [shape: f32[8,1], index: 12, kind: input, shape index: {}]   ;;  %s4443_s13 = inlined_call_operand.vmem [shape: f32[8,72], index: 13, kind: input, shape index: {}]   ;;  %s4444_s14 = inlined_call_operand.vmem [shape: f32[8,1], index: 14, kind: input, shape index: {}]   ;;  %s4445_s15 = inlined_call_operand.vmem [shape: f32[1,8], index: 15, kind: input, shape index: {}]   ;;  %s4446_s16 = inlined_call_operand.<no memory space> [shape: f32[1,1], index: 16, kind: input, shape index: {}]   ;;  %s4447_s17 = inlined_call_operand.vmem [shape: f32[2,1,256], index: 17, kind: output, shape index: {}]  }
   0x1   :  { %4563 = sst [smem:[#allocation17_spill]] %s4430_s0  ;;  %v22_v0 = vstv %s4446_s16 }
   0x2   :  { %4564 = sst [smem:[#allocation18_spill]] %s4431_s1  ;;  %23 = vst [vmem:[#allocation3] sm:$0x1] %v22_v0 }
   0x3 LB: > { %s2559_s27 = sadd.s32 4294967295, %s2858_s26   ;;  %p2563_p0 = scmp.ge.s32.totalorder %s2858_s26, 1  ;;  %s2858_s26 = sphi %s2971_s26, %s29_s26  }
   0x4   : > { %p489_p1 = scmp.lt.s32.totalorder %s2858_s26, 3 }
   0x6   : > { %p490_p2 = pnand %p2563_p0, %p489_p1 }
   0x8   : > { %493 = sbr.rel (%p490_p2) target bundleno = 2414 (0x96e), region = 88 }
   0xd   : > { %p540_p3 = scmp.lt.s32.totalorder %s2559_s27, 1  ;;  %v4543_v1 = vmov 0.0   ;;  %s4483_s28 = smov 111   ;;  %v4528_v5 = vlaneseq  ;;  %v4566_v21 = vmov 0  ;;  %v4568_v22 = vmov 0  ;;  %v793_v52 = vld [vmem:[%s4432_s2] sm:$0xff] }
   0xe   : > { %783 = vrot.lane.b32.xlu1 %v4543_v1, %s4483_s28  ;;  %s4565_s30 = sld [smem:[#allocation17_spill]]  ;;  %s4523_s19 = smov 112   ;;  %v4570_v24 = vmov 0  ;;  %vm4449_vm9 = vcmask 908288   ;;  %v4573_v25 = vmov 0  ;;  %vm4448_vm11 = vcmask 916480  }
   0xf   : > { %s4856_s27 = smov (!%p540_p3, %s2559_s27), 1  ;;  %s4489_s1 = smov 113   ;;  %v558_v6 = vand.u32 127, %v4528_v5  ;;  %vm4450_vm13 = vcmask 924672   ;;  %v4576_v34 = vmov 0  ;;  %v4579_v36 = vmov 0 }
  0x10   : > { %s2742_s16 = sshll.u32 %s4856_s27, 4  ;;  %s4487_s20 = smov 127   ;;  %v4581_v37 = vmov 0  ;;  %v4583_v40 = vmov 0  ;;  %v4588_v45 = vmov 0  ;;  %v4591_v49 = vmov 0 }
  0x11   : > { %s2865_s21 = smov 1   ;;  %s4485_s22 = smov 15   ;;  %v559_v7 = vadd.s32 128, %v558_v6  ;;  %v3050_v9 = vshra.s32 %v558_v6, 4  ;;  %v3054_v12 = vand.u32 15, %v558_v6  ;;  %v2869_v55 = vmov 0  }
  0x12   : > { %s2867_s23 = smov 16   ;;  %s2868_s24 = smov 17   ;;  %2769 = vset.pattern.permute.xlu0 %v2869_v55  ;;  %2770 = vset.pattern.permute.xlu2 %v2869_v55  ;;  %v4594_v56 = vmov 0  ;;  %v4598_v57 = vmov 0  ;;  %v4603_v60 = vmov 0  ;;  %v4606_v63 = vmov 0 }
  0x13   : > { %v3052_v10 = vshra.s32 %v559_v7, 4  ;;  %v721_v13 = vadd.s32 1, %v3050_v9  ;;  %v3057_v14 = vand.u32 15, %v559_v7  ;;  %v3061_v17 = vadd.s32 1, %v3054_v12  ;;  %2771 = vset.pattern.permute.xlu1 %v2869_v55  ;;  %s2870_s0 = smov 94   ;;  %s2873_s25 = smov 126  }
  0x14   : > { %s544_s18 = scalar_lea.vmem %s4565_s30, %s2742_s16  ;;  %v3097_v28 = vadd.s32 4294967295, %v3054_v12  ;;  %v571_v54 = vadd.s32 4294967295, %v3050_v9  ;;  %s4617_s30 = sld [smem:[#allocation18_spill]] }
  0x15   : > { %v2987_v2 = vld [vmem:[%s544_s18] sm:$0xff]  ;;  %v2989_v3 = vld [vmem:[%s544_s18 + $0x8] sm:$0xff]  ;;  %v722_v15 = vadd.s32 1, %v3052_v10  ;;  %vm723_vm0 = vcmp.ge.s32.totalorder %v721_v13, 0  ;;  %vm725_vm1 = vcmp.lt.s32.totalorder %v721_v13, 16  ;;  %v3064_v19 = vadd.s32 1, %v3057_v14 }
  0x16   : > { %779 = vrot.lane.b32.xlu0 %v2987_v2, %s4483_s28  ;;  %760 = vrot.lane.b32.xlu2 %v2989_v3, %s4523_s19  ;;  %vm4453_vm4 = vcmp.lt.s32.totalorder %v3061_v17, 16  ;;  %vm3067_vm5 = vmand %vm723_vm0, %vm725_vm1  ;;  %v3077_v23 = vadd.s32 4294967295, %v3057_v14  ;;  %vm662_vm15 = vcmp.ge.s32.totalorder %v3052_v10, 0  ;;  %vm664_vm0 = vcmp.lt.s32.totalorder %v3052_v10, 16  ;;  %s2872_s18 = smov 98   ;;  %s2874_s16 = smov 2  }
  0x17   : > { %758 = vrot.lane.b32.xlu1 %v2987_v2, %s4523_s19  ;;  %vm724_vm2 = vcmp.ge.s32.totalorder %v722_v15, 0  ;;  %vm726_vm3 = vcmp.lt.s32.totalorder %v722_v15, 16  ;;  %v4567_v21 = vsel %vm3067_vm5, 4294967295, %v4566_v21  ;;  %vm4451_vm6 = vcmp.lt.s32.totalorder %v3064_v19, 16  ;;  %vm3083_vm8 = vmand %vm3067_vm5, %vm4453_vm4  ;;  %s2875_s29 = smov 30  }
  0x18   : > { %vm3072_vm7 = vmand %vm724_vm2, %vm726_vm3  ;;  %v4571_v24 = vsel %vm3083_vm8, 4294967295, %v4570_v24  ;;  %vm4455_vm12 = vcmp.ge.s32.totalorder %v3077_v23, 0  ;;  %vm4452_vm1 = vcmp.ge.s32.totalorder %v3097_v28, 0  ;;  %v572_v46 = vadd.s32 4294967295, %v3052_v10 }
  0x19   : > { %v4569_v22 = vsel %vm3072_vm7, 4294967295, %v4568_v22  ;;  %4572 = vst [vmem:[#allocation4_spill] sm:$0xff] %v4571_v24  ;;  %vm3091_vm10 = vmand %vm3072_vm7, %vm4451_vm6  ;;  %v4614_v15 = vmov 0 }
  0x1a   : > { %v4574_v25 = vsel %vm3091_vm10, 4294967295, %v4573_v25  ;;  %vm3111_vm14 = vmand %vm3072_vm7, %vm4455_vm12 }
  0x1b   : > { %4575 = vst [vmem:[#allocation5_spill] sm:$0xff] %v4574_v25  ;;  %v4577_v34 = vsel %vm3111_vm14, 4294967295, %v4576_v34  ;;  %vm3125_vm2 = vmand %vm662_vm15, %vm664_vm0  ;;  %vm661_vm0 = vcmp.ge.s32.totalorder %v3050_v9, 0 }
  0x1c   : > { %4578 = vst [vmem:[#allocation6_spill] sm:$0xff] %v4577_v34  ;;  %v4580_v36 = vsel %vm3125_vm2, 4294967295, %v4579_v36  ;;  %vm3133_vm3 = vmand %vm3067_vm5, %vm4452_vm1  ;;  %vm4456_vm1 = vcmask 7168  }
  0x1d   : > { %v4582_v37 = vsel %vm3133_vm3, 4294967295, %v4581_v37  ;;  %vm3142_vm15 = vmand %vm3125_vm2, %vm4451_vm6 }
  0x1e   : > { %781 = vrot.lane.b32.xlu0 %v2989_v3, %s4483_s28  ;;  %762 = vrot.lane.b32.xlu2 %v4543_v1, %s4523_s19  ;;  %v4584_v40 = vsel %vm3142_vm15, 4294967295, %v4583_v40 }
  0x1f   : > { %739 = vrot.lane.b32.xlu1 %v2989_v3, %s4489_s1  ;;  %4585 = vst [vmem:[#allocation7_spill] sm:$0xff] %v4584_v40 }
  0x26   : > { %737 = vrot.lane.b32.xlu0 %v2987_v2, %s4489_s1  ;;  %741 = vrot.lane.b32.xlu2 %v4543_v1, %s4489_s1 }
  0x27   : > { %710 = vrot.lane.b32.xlu1 %v2989_v3, %s4487_s20 }
  0x2e   : > { %708 = vrot.lane.b32.xlu0 %v2987_v2, %s4487_s20  ;;  %712 = vrot.lane.b32.xlu2 %v4543_v1, %s4487_s20 }
  0x2f   : > { %677 = vrot.lane.b32.xlu1 %v2987_v2, %s2865_s21 }
  0x36   : > { %675 = vrot.lane.b32.xlu0 %v4543_v1, %s2865_s21  ;;  %679 = vrot.lane.b32.xlu2 %v2989_v3, %s2865_s21 }
  0x37   : > { %650 = vrot.lane.b32.xlu1 %v2987_v2, %s4485_s22 }
  0x3e   : > { %648 = vrot.lane.b32.xlu0 %v4543_v1, %s4485_s22  ;;  %652 = vrot.lane.b32.xlu2 %v2989_v3, %s4485_s22 }
  0x3f   : > { %623 = vrot.lane.b32.xlu1 %v2987_v2, %s2867_s23 }
  0x46   : > { %621 = vrot.lane.b32.xlu0 %v4543_v1, %s2867_s23  ;;  %625 = vrot.lane.b32.xlu2 %v2989_v3, %s2867_s23 }
  0x47   : > { %598 = vrot.lane.b32.xlu1 %v2987_v2, %s2868_s24 }
  0x4e   : > { %596 = vrot.lane.b32.xlu0 %v4543_v1, %s2868_s24  ;;  %600 = vrot.lane.b32.xlu2 %v2989_v3, %s2868_s24 }
  0x4f   : > { %945 = vrot.lane.b32.xlu1 %v4543_v1, %s4483_s28 }
  0x56   : > { %889 = vrot.lane.b32.xlu2 %v4543_v1, %s2865_s21  ;;  %796 = vperm.xlu0 %2769, %v793_v52  }
  0x57   : > { %933 = vrot.lane.b32.xlu1 %v4543_v1, %s4523_s19 }
  0x5e   : > { %877 = vrot.lane.b32.xlu2 %v4543_v1, %s4485_s22 }
  0x5f   : > { %921 = vrot.lane.b32.xlu1 %v4543_v1, %s4489_s1 }
  0x67   : > { %909 = vrot.lane.b32.xlu1 %v4543_v1, %s4487_s20 }
  0x70   : > { %v761_v4 = vpop.permute.xlu2 %760 }
  0x78   : > { %v763_v8 = vpop.permute.xlu2 %762 }
  0x79   : > { %v766_v33 = vsel %vm4448_vm11, %v761_v4, %v763_v8 }
  0x80   : > { %v784_v11 = vpop.permute.xlu1 %783  ;;  %v742_v16 = vpop.permute.xlu2 %741 }
  0x88   : > { %v780_v18 = vpop.permute.xlu0 %779  ;;  %v713_v27 = vpop.permute.xlu2 %712 }
  0x89   : > { %v759_v20 = vpop.permute.xlu1 %758 }
  0x8a   : > { %v765_v32 = vsel %vm4448_vm11, %v759_v20, %v761_v4  ;;  %vm4454_vm11 = vcmask 1039360  }
  0x90   : > { %v782_v26 = vpop.permute.xlu0 %781  ;;  %v680_v42 = vpop.permute.xlu2 %679 }
  0x91   : > { %v786_v29 = vsel %vm4449_vm9, %v780_v18, %v782_v26  ;;  %v787_v30 = vsel %vm4449_vm9, %v782_v26, %v784_v11  ;;  %v740_v31 = vpop.permute.xlu1 %739  ;;  %vm663_vm9 = vcmp.lt.s32.totalorder %v3050_v9, 16 }
  0x92   : > { %2567 = vmatpush.msk.msra.mxu0 %vm3083_vm8, %v786_v29  ;;  %2577 = vmatpush.msk.msra.mxu1 %vm3091_vm10, %v787_v30  ;;  %v745_v35 = vsel %vm4450_vm13, %v740_v31, %v742_v16 }
  0x94   : > { %2568 = vmatpush.msk.msra.mxu0 %vm3067_vm5, %v765_v32  ;;  %2578 = vmatpush.msk.msra.mxu1 %vm3072_vm7, %v766_v33 }
  0x96   : > { %2579 = vmatpush.msk.msra.mxu1 %vm3111_vm14, %v745_v35 }
  0x98   : > { %v738_v38 = vpop.permute.xlu0 %737  ;;  %v653_v53 = vpop.permute.xlu2 %652 }
  0x99   : > { %v744_v39 = vsel %vm4450_vm13, %v738_v38, %v740_v31  ;;  %v711_v41 = vpop.permute.xlu1 %710  ;;  %vm3153_vm13 = vmand %vm661_vm0, %vm663_vm9  ;;  %vm576_vm0 = vcmp.ge.s32.totalorder %v572_v46, 0 }
  0x9a   : > { %2569 = vmatpush.msk.msra.mxu0 %vm3133_vm3, %v744_v39  ;;  %v716_v43 = vsel %vm4454_vm11, %v711_v41, %v713_v27  ;;  %vm3164_vm6 = vmand %vm3153_vm13, %vm4453_vm4  ;;  %vm578_vm4 = vcmp.lt.s32.totalorder %v572_v46, 16 }
  0x9b   : > { %2580 = vmatpush.msk.msra.mxu1 %vm3142_vm15, %v716_v43  ;;  %v4589_v45 = vsel %vm3164_vm6, 4294967295, %v4588_v45  ;;  %vm3174_vm9 = vmand %vm3125_vm2, %vm4455_vm12  ;;  %vm4597_vm12 = vcmp.ge.s32.totalorder %v3097_v28, 0  ;;  %vm4602_vm15 = vcmp.lt.s32.totalorder %v3064_v19, 16  ;;  %v4619_v19 = vmov 0 }
  0x9c   : > { %4590 = vst [vmem:[#allocation8_spill] sm:$0xff] %v4589_v45  ;;  %v4592_v49 = vsel %vm3174_vm9, 4294967295, %v4591_v49 }
  0x9d   : > { %2581 = vmatpush.msk.msra.mxu1 %vm3125_vm2, %v2989_v3  ;;  %4593 = vst [vmem:[#allocation9_spill] sm:$0xff] %v4592_v49  ;;  %vm4601_vm2 = vcmask 7168  }
  0xa0   : > { %v709_v47 = vpop.permute.xlu0 %708  ;;  %v626_v0 = vpop.permute.xlu2 %625 }
  0xa1   : > { %v715_v48 = vsel %vm4454_vm11, %v709_v47, %v711_v41  ;;  %v678_v50 = vpop.permute.xlu1 %677  ;;  %vm3190_vm11 = vmand %vm576_vm0, %vm578_vm4  ;;  %vm575_vm0 = vcmp.ge.s32.totalorder %v571_v54, 0 }
  0xa2   : > { %2570 = vmatpush.msk.msra.mxu0 %vm3164_vm6, %v715_v48  ;;  %v683_v51 = vsel %vm4456_vm1, %v678_v50, %v680_v42  ;;  %v4595_v56 = vsel %vm3190_vm11, 4294967295, %v4594_v56  ;;  %vm3198_vm1 = vmand %vm3153_vm13, %vm4597_vm12  ;;  %vm577_vm6 = vcmp.lt.s32.totalorder %v571_v54, 16 }
  0xa3   : > { %2582 = vmatpush.msk.msra.mxu1 %vm3174_vm9, %v683_v51  ;;  %4596 = vst [vmem:[#allocation10_spill] sm:$0xff] %v4595_v56  ;;  %v4599_v57 = vsel %vm3198_vm1, 4294967295, %v4598_v57  ;;  %vm4467_vm9 = vcmask 121856   ;;  %vm3207_vm4 = vmand %vm3190_vm11, %vm4602_vm15 }
  0xa4   : > { %2571 = vmatpush.msk.msra.mxu0 %vm3153_vm13, %v2987_v2  ;;  %4600 = vst [vmem:[#allocation11_spill] sm:$0xff] %v4599_v57  ;;  %v4604_v60 = vsel %vm3207_vm4, 4294967295, %v4603_v60  ;;  %vm3216_vm12 = vmand %vm575_vm0, %vm577_vm6  ;;  %v4610_v2 = vmov 0  ;;  %vm4470_vm6 = vcmask 138240   ;;  %vm4613_vm0 = vcmp.ge.s32.totalorder %v3077_v23, 0 }
  0xa5   : > { %4605 = vst [vmem:[#allocation12_spill] sm:$0xff] %v4604_v60  ;;  %v4607_v63 = vsel %vm3216_vm12, 4294967295, %v4606_v63 }
  0xa6   : > { %4608 = vst [vmem:[#allocation13_spill] sm:$0xff] %v4607_v63 }
  0xa8   : > { %v676_v58 = vpop.permute.xlu0 %675  ;;  %v601_v11 = vpop.permute.xlu2 %600 }
  0xa9   : > { %v682_v59 = vsel %vm4601_vm2, %v676_v58, %v678_v50  ;;  %v651_v61 = vpop.permute.xlu1 %650  ;;  %vm4609_vm2 = vcmp.lt.s32.totalorder %v3061_v17, 16  ;;  %v792_v17 = vld [vmem:[%s4617_s30] sm:$0xff]  ;;  %s2871_s30 = smov 96  }
  0xaa   : > { %2572 = vmatpush.msk.msra.mxu0 %vm3198_vm1, %v682_v59  ;;  %v656_v62 = vsel %vm4467_vm9, %v651_v61, %v653_v53  ;;  %vm3224_vm15 = vmand %vm3216_vm12, %vm4609_vm2  ;;  %vm4468_vm1 = vcmask 130048  }
  0xab   : > { %2583 = vmatpush.msk.msra.mxu1 %vm3207_vm4, %v656_v62  ;;  %v4611_v2 = vsel %vm3224_vm15, 4294967295, %v4610_v2  ;;  %vm3239_vm2 = vmand %vm3190_vm11, %vm4613_vm0  ;;  %vm4618_vm0 = vcmp.ge.s32.totalorder %v3097_v28, 0 }
  0xac   : > { %4612 = vst [vmem:[#allocation14_spill] sm:$0xff] %v4611_v2  ;;  %v4615_v15 = vsel %vm3239_vm2, 4294967295, %v4614_v15 }
  0xad   : > { %4616 = vst [vmem:[#allocation15_spill] sm:$0xff] %v4615_v15 }
  0xb0   : > { %v649_v3 = vpop.permute.xlu0 %648  ;;  %v890_v33 = vpop.permute.xlu2 %889 }
  0xb1   : > { %v655_v4 = vsel %vm4467_vm9, %v649_v3, %v651_v61  ;;  %v624_v6 = vpop.permute.xlu1 %623  ;;  %vm4469_vm9 = vcmask 588800  }
  0xb2   : > { %2573 = vmatpush.msk.msra.mxu0 %vm3224_vm15, %v655_v4  ;;  %v629_v7 = vsel %vm4468_vm1, %v624_v6, %v626_v0 }
  0xb3   : > { %2584 = vmatpush.msk.msra.mxu1 %vm3190_vm11, %v629_v7 }
  0xb8   : > { %v622_v8 = vpop.permute.xlu0 %621  ;;  %v878_v35 = vpop.permute.xlu2 %877 }
  0xb9   : > { %v628_v13 = vsel %vm4468_vm1, %v622_v8, %v624_v6  ;;  %v599_v16 = vpop.permute.xlu1 %598  ;;  %vm3256_vm1 = vmand %vm3216_vm12, %vm4618_vm0  ;;  %vm4622_vm0 = vcmask 908288   ;;  %v954_v6 = vld [vmem:[%s4434_s4] sm:$0xff] }
  0xba   : > { %2574 = vmatpush.msk.msra.mxu0 %vm3216_vm12, %v628_v13  ;;  %v604_v18 = vsel %vm4470_vm6, %v599_v16, %v601_v11  ;;  %v4620_v19 = vsel %vm3256_vm1, 4294967295, %v4619_v19 }
  0xbb   : > { %2585 = vmatpush.msk.msra.mxu1 %vm3239_vm2, %v604_v18  ;;  %4621 = vst [vmem:[#allocation16_spill] sm:$0xff] %v4620_v19 }
  0xbc   : > { %2586 = vmatmul.msk.f32.vlgmr.msra.gmra.mxu1 %vm4469_vm9, %v792_v17 }
  0xc0   : > { %v597_v20 = vpop.permute.xlu0 %596 }
  0xc1   : > { %v603_v23 = vsel %vm4470_vm6, %v597_v20, %v599_v16  ;;  %v946_v38 = vpop.permute.xlu1 %945  ;;  %vm4624_vm6 = vmmov %vm4622_vm0 }
  0xc2   : > { %2575 = vmatpush.msk.msra.mxu0 %vm3256_vm1, %v603_v23 }
  0xc3   : > { %2576 = vmatmul.msk.f32.vlgmr.msra.gmra.mxu0 %vm4469_vm9, %v792_v17  ;;  %vm4623_vm9 = vcmask 916480  }
  0xc8   : > { %v797_v26 = vpop.permute.xlu0 %796 }
  0xc9   : > { %v934_v41 = vpop.permute.xlu1 %933 }
  0xd1   : > { %v922_v43 = vpop.permute.xlu1 %921 }
  0xd9   : > { %v910_v47 = vpop.permute.xlu1 %909 }
 0x139   : > { %v840_v27 = vpop.f32.mrf.mxu1 }
 0x13a   : > { %v841_v29 = vadd.f32 %v840_v27, %v797_v26 }
 0x13c   : > { %v844_v30 = vmax.f32 %v841_v29, 0.0 }
 0x13e   : > { %931 = vrot.lane.b32.xlu0 %v844_v30, %s4523_s19  ;;  %943 = vrot.lane.b32.xlu2 %v844_v30, %s4483_s28 }
 0x140   : > { %v820_v28 = vpop.f32.mrf.mxu0 }
 0x141   : > { %v821_v31 = vadd.f32 %v820_v28, %v797_v26 }
 0x143   : > { %v843_v32 = vmax.f32 %v821_v31, 0.0 }
 0x145   : > { %941 = vrot.lane.b32.xlu1 %v843_v32, %s4483_s28 }
 0x146   : > { %919 = vrot.lane.b32.xlu0 %v844_v30, %s4489_s1  ;;  %929 = vrot.lane.b32.xlu2 %v843_v32, %s4523_s19 }
 0x14d   : > { %893 = vrot.lane.b32.xlu1 %v844_v30, %s2865_s21 }
 0x14e   : > { %907 = vrot.lane.b32.xlu0 %v844_v30, %s4487_s20  ;;  %917 = vrot.lane.b32.xlu2 %v843_v32, %s4489_s1 }
 0x155   : > { %881 = vrot.lane.b32.xlu1 %v844_v30, %s4485_s22 }
 0x156   : > { %891 = vrot.lane.b32.xlu0 %v843_v32, %s2865_s21  ;;  %905 = vrot.lane.b32.xlu2 %v843_v32, %s4487_s20 }
 0x15d   : > { %869 = vrot.lane.b32.xlu1 %v844_v30, %s2867_s23 }
 0x15e   : > { %879 = vrot.lane.b32.xlu0 %v843_v32, %s4485_s22  ;;  %865 = vrot.lane.b32.xlu2 %v4543_v1, %s2867_s23  ;;  %s2877_s22 = smov 34  }
 0x165   : > { %857 = vrot.lane.b32.xlu1 %v844_v30, %s2868_s24 }
 0x166   : > { %867 = vrot.lane.b32.xlu0 %v843_v32, %s2867_s23  ;;  %853 = vrot.lane.b32.xlu2 %v4543_v1, %s2868_s24 }
 0x16e   : > { %855 = vrot.lane.b32.xlu0 %v843_v32, %s2868_s24  ;;  %957 = vperm.xlu2 %2770, %v954_v6  }
 0x176   : > { %1017 = vrot.lane.b32.xlu2 %v4543_v1, %s4487_s20 }
 0x17e   : > { %1029 = vrot.lane.b32.xlu2 %v4543_v1, %s4523_s19 }
 0x186   : > { %1041 = vrot.lane.b32.xlu2 %v4543_v1, %s4483_s28 }
 0x18e   : > { %1248 = vrot.lane.b32.xlu2 %v4543_v1, %s2870_s0 }
 0x196   : > { %1227 = vrot.lane.b32.xlu2 %v4543_v1, %s2871_s30 }
 0x198   : > { %v944_v39 = vpop.permute.xlu2 %943 }
 0x199   : > { %v948_v42 = vsel %vm4622_vm0, %v944_v39, %v946_v38  ;;  %vm4625_vm0 = vmmov %vm4623_vm9 }
 0x19a   : > { %2597 = vmatpush.msk.msra.mxu3 %vm3091_vm10, %v948_v42  ;;  %vm4626_vm10 = vcmask 924672  }
 0x19e   : > { %1206 = vrot.lane.b32.xlu2 %v4543_v1, %s2872_s18 }
 0x1a0   : > { %v930_v46 = vpop.permute.xlu2 %929 }
 0x1a6   : > { %1177 = vrot.lane.b32.xlu2 %v4543_v1, %s2873_s25 }
 0x1a8   : > { %v918_v51 = vpop.permute.xlu2 %917 }
 0x1b0   : > { %v932_v48 = vpop.permute.xlu0 %931  ;;  %v906_v61 = vpop.permute.xlu2 %905 }
 0x1b1   : > { %v936_v50 = vsel %vm4623_vm9, %v932_v48, %v934_v41  ;;  %v935_v55 = vsel %vm4625_vm0, %v930_v46, %v932_v48  ;;  %vm4627_vm9 = vmmov %vm4626_vm10  ;;  %vm4631_vm0 = vnez %v4584_v40 }
 0x1b2   : > { %2598 = vmatpush.msk.msra.mxu3 %vm3072_vm7, %v936_v50 }
 0x1b7   : > { %v942_v52 = vpop.permute.xlu1 %941 }
 0x1b8   : > { %v947_v53 = vsel %vm4624_vm6, %v942_v52, %v944_v39  ;;  %v920_v54 = vpop.permute.xlu0 %919  ;;  %vm4628_vm6 = vcmask 1039360   ;;  %v866_v20 = vpop.permute.xlu2 %865 }
 0x1b9   : > { %2587 = vmatpush.msk.msra.mxu2 %vm3083_vm8, %v947_v53  ;;  %v924_v58 = vsel %vm4626_vm10, %v920_v54, %v922_v43  ;;  %v923_v59 = vsel %vm4627_vm9, %v918_v51, %v920_v54  ;;  %vm4629_vm8 = vmmov %vm4628_vm6  ;;  %vm4630_vm10 = vnez %v4589_v45  ;;  %vm4632_vm9 = vnez %v4580_v36 }
 0x1ba   : > { %2599 = vmatpush.msk.msra.mxu3 %vm3111_vm14, %v924_v58  ;;  %vm4637_vm14 = vcmask 121856  }
 0x1bb   : > { %2588 = vmatpush.msk.msra.mxu2 %vm3067_vm5, %v935_v55 }
 0x1bd   : > { %2589 = vmatpush.msk.msra.mxu2 %vm3133_vm3, %v923_v59  ;;  %vm4638_vm3 = vmmov %vm4637_vm14 }
 0x1bf   : > { %v894_v4 = vpop.permute.xlu1 %893 }
 0x1c0   : > { %v908_v62 = vpop.permute.xlu0 %907 }
 0x1c1   : > { %v911_v0 = vsel %vm4628_vm6, %v906_v61, %v908_v62  ;;  %v912_v3 = vsel %vm4629_vm8, %v908_v62, %v910_v47  ;;  %vm4633_vm8 = vcmask 7168  }
 0x1c2   : > { %2590 = vmatpush.msk.msra.mxu2 %vm4630_vm10, %v911_v0  ;;  %2600 = vmatpush.msk.msra.mxu3 %vm4631_vm0, %v912_v3  ;;  %vm4634_vm6 = vmmov %vm4633_vm8  ;;  %vm4635_vm10 = vnez %v4599_v57  ;;  %vm4636_vm0 = vnez %v4592_v49 }
 0x1c4   : > { %2591 = vmatpush.msk.msra.mxu2 %vm3153_vm13, %v843_v32  ;;  %2601 = vmatpush.msk.msra.mxu3 %vm4632_vm9, %v844_v30  ;;  %v854_v30 = vpop.permute.xlu2 %853  ;;  %v953_v32 = vld [vmem:[%s4433_s3] sm:$0xff] }
 0x1c7   : > { %v882_v13 = vpop.permute.xlu1 %881 }
 0x1c8   : > { %v892_v7 = vpop.permute.xlu0 %891 }
 0x1c9   : > { %v895_v8 = vsel %vm4633_vm8, %v890_v33, %v892_v7  ;;  %v896_v11 = vsel %vm4634_vm6, %v892_v7, %v894_v4  ;;  %vm4639_vm8 = vcmask 130048  }
 0x1ca   : > { %2592 = vmatpush.msk.msra.mxu2 %vm4635_vm10, %v895_v8  ;;  %2602 = vmatpush.msk.msra.mxu3 %vm4636_vm0, %v896_v11  ;;  %vm4640_vm6 = vmmov %vm4639_vm8 }
 0x1cc   : > { %v958_v38 = vpop.permute.xlu2 %957 }
 0x1cf   : > { %v870_v23 = vpop.permute.xlu1 %869 }
 0x1d0   : > { %v880_v16 = vpop.permute.xlu0 %879 }
 0x1d1   : > { %v883_v17 = vsel %vm4637_vm14, %v878_v35, %v880_v16  ;;  %v884_v18 = vsel %vm4638_vm3, %v880_v16, %v882_v13  ;;  %vm4641_vm14 = vcmask 138240  }
 0x1d2   : > { %2593 = vmatpush.msk.msra.mxu2 %vm3224_vm15, %v883_v17  ;;  %2603 = vmatpush.msk.msra.mxu3 %vm3207_vm4, %v884_v18  ;;  %vm4642_vm3 = vmmov %vm4641_vm14  ;;  %v1260_v18 = vld [vmem:[%s4436_s6 + $0x8] sm:$0xff] }
 0x1d4   : > { %v1018_v48 = vpop.permute.xlu2 %1017 }
 0x1d7   : > { %v858_v28 = vpop.permute.xlu1 %857 }
 0x1d8   : > { %v868_v26 = vpop.permute.xlu0 %867 }
 0x1d9   : > { %v871_v27 = vsel %vm4639_vm8, %v866_v20, %v868_v26  ;;  %v872_v29 = vsel %vm4640_vm6, %v868_v26, %v870_v23  ;;  %vm4643_vm8 = vcmask 588800   ;;  %v1187_v26 = vadd.s32 2, %v3052_v10 }
 0x1da   : > { %2594 = vmatpush.msk.msra.mxu2 %vm3216_vm12, %v871_v27  ;;  %2604 = vmatpush.msk.msra.mxu3 %vm3190_vm11, %v872_v29  ;;  %vm4644_vm6 = vmmov %vm4643_vm8  ;;  %v1186_v27 = vadd.s32 2, %v3050_v9  ;;  %vm4497_vm11 = vcmask 769024  }
 0x1dc   : > { %v1030_v52 = vpop.permute.xlu2 %1029 }
 0x1e0   : > { %v856_v31 = vpop.permute.xlu0 %855 }
 0x1e1   : > { %v859_v33 = vsel %vm4641_vm14, %v854_v30, %v856_v31  ;;  %v860_v35 = vsel %vm4642_vm3, %v856_v31, %v858_v28  ;;  %vm4645_vm14 = vcmask 1039360   ;;  %v3436_v30 = vadd.s32 2, %v3057_v14 }
 0x1e2   : > { %2595 = vmatpush.msk.msra.mxu2 %vm3256_vm1, %v859_v33  ;;  %2605 = vmatpush.msk.msra.mxu3 %vm3239_vm2, %v860_v35  ;;  %vm4646_vm3 = vmmov %vm4645_vm14  ;;  %vm4649_vm1 = vcmask 908288   ;;  %v3439_v28 = vadd.s32 2, %v3054_v12  ;;  %v4655_v35 = vmov 0 }
 0x1e3   : > { %2596 = vmatmul.msk.f32.vlgmr.msra.gmra.mxu2 %vm4643_vm8, %v953_v32  ;;  %2606 = vmatmul.msk.f32.vlgmr.msra.gmra.mxu3 %vm4644_vm6, %v953_v32  ;;  %vm4647_vm8 = vcmask 916480   ;;  %vm4650_vm12 = vmmov %vm4649_vm1 }
 0x1e4   : > { %vm4648_vm6 = vmmov %vm4647_vm8  ;;  %v1042_v3 = vpop.permute.xlu2 %1041  ;;  %vm4498_vm2 = vcmp.lt.s32.totalorder %v3439_v28, 16  ;;  %vm4665_vm4 = vcmp.lt.s32.totalorder %v3439_v28, 16 }
 0x1ec   : > { %v1249_v23 = vpop.permute.xlu2 %1248 }
 0x1f4   : > { %v1228_v31 = vpop.permute.xlu2 %1227 }
 0x266   : > { %v980_v39 = vpop.f32.mrf.mxu2  ;;  %v1000_v41 = vpop.f32.mrf.mxu3 }
 0x267   : > { %v981_v42 = vadd.f32 %v980_v39, %v958_v38  ;;  %v1001_v43 = vadd.f32 %v1000_v41, %v958_v38 }
 0x269   : > { %v3358_v46 = vmax.f32 %v981_v42, 0.0  ;;  %v3360_v47 = vmax.f32 %v1001_v43, 0.0 }
 0x26b   : > { %1013 = vrot.lane.b32.xlu0 %v3358_v46, %s4487_s20  ;;  %1015 = vrot.lane.b32.xlu1 %v3360_v47, %s4487_s20 }
 0x273   : > { %1025 = vrot.lane.b32.xlu0 %v3358_v46, %s4523_s19  ;;  %1027 = vrot.lane.b32.xlu1 %v3360_v47, %s4523_s19 }
 0x27b   : > { %1037 = vrot.lane.b32.xlu0 %v3358_v46, %s4483_s28  ;;  %1039 = vrot.lane.b32.xlu1 %v3360_v47, %s4483_s28  ;;  %s2876_s28 = smov 32  }
 0x283   : > { %1148 = vrot.lane.b32.xlu0 %v4543_v1, %s2874_s16 }
 0x28b   : > { %1127 = vrot.lane.b32.xlu0 %v4543_v1, %s2875_s29 }
 0x2dd   : > { %v1014_v50 = vpop.permute.xlu0 %1013  ;;  %v1016_v51 = vpop.permute.xlu1 %1015 }
 0x2de   : > { %v1019_v55 = vsel %vm4645_vm14, %v1014_v50, %v1016_v51  ;;  %v1020_v58 = vsel %vm4646_vm3, %v1016_v51, %v1018_v48  ;;  %vm1188_vm14 = vcmp.ge.s32.totalorder %v1186_v27, 0  ;;  %vm1190_vm3 = vcmp.lt.s32.totalorder %v1186_v27, 16  ;;  %v1207_v48 = vpop.permute.xlu2 %1206 }
 0x2df   : > { %v1023_v62 = vmax.f32 %v3358_v46, %v1019_v55  ;;  %v1024_v0 = vmax.f32 %v3360_v47, %v1020_v58  ;;  %vm3447_vm15 = vmand %vm1188_vm14, %vm1190_vm3  ;;  %v3474_v51 = vadd.s32 4294967294, %v3057_v14  ;;  %v1055_v27 = vadd.s32 4294967294, %v3052_v10 }
 0x2e1   : > { %vm4500_vm14 = vcmp.ge.s32.totalorder %v3474_v51, 0  ;;  %vm4671_vm0 = vcmp.ge.s32.totalorder %v3474_v51, 0 }
 0x2e2   : > { %vm3551_vm7 = vmand %vm4632_vm9, %vm4671_vm0 }
 0x2e5   : > { %v1026_v53 = vpop.permute.xlu0 %1025  ;;  %v1028_v54 = vpop.permute.xlu1 %1027 }
 0x2e6   : > { %v1031_v59 = vsel %vm4647_vm8, %v1026_v53, %v1028_v54  ;;  %v1032_v61 = vsel %vm4648_vm6, %v1028_v54, %v1030_v52  ;;  %vm4506_vm8 = vcmp.lt.s32.totalorder %v3436_v30, 16  ;;  %v3478_v54 = vadd.s32 4294967294, %v3054_v12  ;;  %v1178_v58 = vpop.permute.xlu2 %1177 }
 0x2e7   : > { %v1035_v4 = vmax.f32 %v1023_v62, %v1031_v59  ;;  %v1036_v6 = vmax.f32 %v1024_v0, %v1032_v61 }
 0x2e8   : > { %vm4501_vm3 = vcmp.ge.s32.totalorder %v3478_v54, 0 }
 0x2ed   : > { %v1038_v7 = vpop.permute.xlu0 %1037  ;;  %v1040_v8 = vpop.permute.xlu1 %1039 }
 0x2ee   : > { %v1043_v11 = vsel %vm4649_vm1, %v1038_v7, %v1040_v8  ;;  %v1044_v13 = vsel %vm4650_vm12, %v1040_v8, %v1042_v3  ;;  %vm1189_vm1 = vcmp.ge.s32.totalorder %v1187_v26, 0  ;;  %vm1191_vm12 = vcmp.lt.s32.totalorder %v1187_v26, 16 }
 0x2ef   : > { %v3386_v16 = vmax.f32 %v1035_v4, %v1043_v11  ;;  %v3388_v17 = vmax.f32 %v1036_v6, %v1044_v13  ;;  %vm3442_vm6 = vmand %vm1189_vm1, %vm1191_vm12  ;;  %vm4499_vm12 = vcmask 785408   ;;  %v4663_v6 = vmov 0 }
 0x2f0   : > { %vm3455_vm10 = vmand %vm3442_vm6, %vm4506_vm8  ;;  %v1054_v26 = vadd.s32 4294967294, %v3050_v9 }
 0x2f1   : > { %1152 = vrot.lane.b32.xlu2 %v3388_v17, %s2874_s16  ;;  %1246 = vrot.lane.b32.xlu1 %v3388_v17, %s2870_s0  ;;  %v4656_v35 = vsel %vm3455_vm10, 4294967295, %v4655_v35  ;;  %vm3463_vm1 = vmand %vm3447_vm15, %vm4498_vm2 }
 0x2f2   : > { %1244 = vrot.lane.b32.xlu0 %v3386_v16, %s2870_s0  ;;  %vm3491_vm2 = vmand %vm3442_vm6, %vm4500_vm14  ;;  %vm4505_vm14 = vcmask 1031168   ;;  %vm1058_vm5 = vcmp.ge.s32.totalorder %v1054_v26, 0 }
 0x2f5   : > { %v3429_v20 = vpop.permute.xlu0 %1148 }
 0x2f9   : > { %1131 = vrot.lane.b32.xlu2 %v3388_v17, %s2875_s29  ;;  %1225 = vrot.lane.b32.xlu1 %v3388_v17, %s2871_s30 }
 0x2fa   : > { %1223 = vrot.lane.b32.xlu0 %v3386_v16, %s2871_s30 }
 0x2fd   : > { %v3433_v29 = vpop.permute.xlu0 %1127 }
 0x301   : > { %1104 = vrot.lane.b32.xlu2 %v3388_v17, %s2876_s28  ;;  %1204 = vrot.lane.b32.xlu1 %v3388_v17, %s2872_s18 }
 0x302   : > { %1202 = vrot.lane.b32.xlu0 %v3386_v16, %s2872_s18 }
 0x309   : > { %1083 = vrot.lane.b32.xlu2 %v3388_v17, %s2877_s22  ;;  %1175 = vrot.lane.b32.xlu1 %v3388_v17, %s2873_s25 }
 0x30a   : > { %1173 = vrot.lane.b32.xlu0 %v3386_v16, %s2873_s25 }
 0x311   : > { %1150 = vrot.lane.b32.xlu1 %v3386_v16, %s2874_s16  ;;  %2793 = vrot.lane.b32.xlu2 %v4543_v1, %s2875_s29 }
 0x312   : > { %1100 = vrot.lane.b32.xlu0 %v4543_v1, %s2876_s28 }
 0x319   : > { %1129 = vrot.lane.b32.xlu1 %v3386_v16, %s2875_s29  ;;  %2803 = vrot.lane.b32.xlu2 %v4543_v1, %s2877_s22 }
 0x31a   : > { %1079 = vrot.lane.b32.xlu0 %v4543_v1, %s2877_s22 }
 0x321   : > { %1102 = vrot.lane.b32.xlu1 %v3386_v16, %s2876_s28 }
 0x322   : > { %1268 = vperm.xlu0 %2769, %v1260_v18  }
 0x329   : > { %1081 = vrot.lane.b32.xlu1 %v3386_v16, %s2877_s22 }
 0x32a   : > { %2773 = vrot.lane.b32.xlu0 %v4543_v1, %s2871_s30 }
 0x332   : > { %2778 = vrot.lane.b32.xlu0 %v4543_v1, %s2872_s18 }
 0x33a   : > { %2788 = vrot.lane.b32.xlu0 %v4543_v1, %s2873_s25 }
 0x342   : > { %2798 = vrot.lane.b32.xlu0 %v4543_v1, %s2876_s28 }
 0x34b   : > { %v1153_v11 = vpop.permute.xlu2 %1152 }
 0x363   : > { %v1247_v38 = vpop.permute.xlu1 %1246 }
 0x364   : > { %v1245_v41 = vpop.permute.xlu0 %1244  ;;  %v1252_v42 = vsel %vm4497_vm11, %v1247_v38, %v1249_v23 }
 0x365   : > { %v1251_v43 = vsel %vm4497_vm11, %v1245_v41, %v1247_v38  ;;  %2618 = vmatpush.msk.msrb.mxu1 %vm3455_vm10, %v1252_v42  ;;  %vm4504_vm11 = vcmask 801792   ;;  %vm1061_vm10 = vcmp.lt.s32.totalorder %v1055_v27, 16  ;;  %v1132_v42 = vpop.permute.xlu2 %1131 }
 0x366   : > { %2607 = vmatpush.msk.msrb.mxu0 %vm3463_vm1, %v1251_v43 }
 0x36b   : > { %v1226_v50 = vpop.permute.xlu1 %1225 }
 0x36c   : > { %v1224_v52 = vpop.permute.xlu0 %1223  ;;  %v1231_v53 = vsel %vm4499_vm12, %v1226_v50, %v1228_v31 }
 0x36d   : > { %v1230_v55 = vsel %vm4499_vm12, %v1224_v52, %v1226_v50  ;;  %2619 = vmatpush.msk.msrb.mxu1 %vm3442_vm6, %v1231_v53  ;;  %vm3499_vm12 = vmand %vm3447_vm15, %vm4501_vm3  ;;  %v4682_v52 = vmov 0 }
 0x36e   : > { %2608 = vmatpush.msk.msrb.mxu0 %vm3447_vm15, %v1230_v55  ;;  %vm3513_vm3 = vmand %vm4632_vm9, %vm4506_vm8  ;;  %vm4516_vm8 = vcmask 15360  }
 0x36f   : > { %v4664_v6 = vsel %vm3513_vm3, 4294967295, %v4663_v6 }
 0x373   : > { %v1205_v61 = vpop.permute.xlu1 %1204 }
 0x374   : > { %v1203_v0 = vpop.permute.xlu0 %1202  ;;  %v1210_v3 = vsel %vm4504_vm11, %v1205_v61, %v1207_v48  ;;  %v1259_v48 = vld [vmem:[%s4436_s6] sm:$0xff] }
 0x375   : > { %v1209_v4 = vsel %vm4504_vm11, %v1203_v0, %v1205_v61  ;;  %2620 = vmatpush.msk.msrb.mxu1 %vm3491_vm2, %v1210_v3  ;;  %vm3521_vm11 = vmand %vm3153_vm13, %vm4665_vm4  ;;  %vm4668_vm4 = vcmp.ge.s32.totalorder %v3478_v54, 0  ;;  %1263 = vperm.xlu1 %2771, %v1259_v48  }
 0x376   : > { %2609 = vmatpush.msk.msrb.mxu0 %vm3499_vm12, %v1209_v4 }
 0x37b   : > { %v1176_v7 = vpop.permute.xlu1 %1175 }
 0x37c   : > { %v1174_v13 = vpop.permute.xlu0 %1173  ;;  %v1181_v18 = vsel %vm4505_vm14, %v1176_v7, %v1178_v58 }
 0x37d   : > { %v1180_v23 = vsel %vm4505_vm14, %v1174_v13, %v1176_v7  ;;  %2621 = vmatpush.msk.msrb.mxu1 %vm3513_vm3, %v1181_v18  ;;  %vm3543_vm14 = vmand %vm3153_vm13, %vm4668_vm4  ;;  %vm1060_vm3 = vcmp.lt.s32.totalorder %v1054_v26, 16  ;;  %vm1059_vm4 = vcmp.ge.s32.totalorder %v1055_v27, 0  ;;  %2783 = vrot.lane.b32.xlu1 %v4543_v1, %s2874_s16  ;;  %v2671_v7 = vld [vmem:[%s4439_s9 + $0x8] sm:$0xff] }
 0x37e   : > { %2610 = vmatpush.msk.msrb.mxu0 %vm3521_vm11, %v1180_v23  ;;  %vm3562_vm0 = vmand %vm1058_vm5, %vm1060_vm3  ;;  %vm4678_vm5 = vcmp.lt.s32.totalorder %v3439_v28, 16 }
 0x37f   : > { %2622 = vmatpush.msk.msrb.mxu1 %vm4632_vm9, %v3388_v17  ;;  %v4672_v17 = vmov 0  ;;  %vm3569_vm9 = vmand %vm1059_vm4, %vm1061_vm10  ;;  %vm4681_vm10 = vcmp.lt.s32.totalorder %v3436_v30, 16  ;;  %v1105_v30 = vpop.permute.xlu2 %1104 }
 0x380   : > { %2611 = vmatpush.msk.msrb.mxu0 %vm3153_vm13, %v3386_v16  ;;  %v4673_v17 = vsel %vm3551_vm7, 4294967295, %v4672_v17  ;;  %vm3581_vm3 = vmand %vm3562_vm0, %vm4678_vm5  ;;  %vm4520_vm5 = vcmask 261120  }
 0x381   : > { %vm3589_vm4 = vmand %vm3569_vm9, %vm4681_vm10  ;;  %vm4684_vm10 = vcmp.ge.s32.totalorder %v3478_v54, 0  ;;  %v1257_v54 = vld [vmem:[%s4435_s5] sm:$0xff] }
 0x382   : > { %v4683_v52 = vsel %vm3589_vm4, 4294967295, %v4682_v52 }
 0x383   : > { %v1151_v16 = vpop.permute.xlu1 %1150 }
 0x384   : > { %v1155_v38 = vsel %vm4516_vm8, %v3429_v20, %v1151_v16  ;;  %v1156_v41 = vsel %vm4516_vm8, %v1151_v16, %v1153_v11  ;;  %v4676_v20 = vmov 0  ;;  %vm4517_vm8 = vcmask 244736   ;;  %v1101_v58 = vpop.permute.xlu0 %1100 }
 0x385   : > { %2612 = vmatpush.msk.msrb.mxu0 %vm3543_vm14, %v1155_v38  ;;  %2623 = vmatpush.msk.msrb.mxu1 %vm3551_vm7, %v1156_v41  ;;  %v4677_v20 = vsel %vm3569_vm9, 4294967295, %v4676_v20 }
 0x387   : > { %v1084_v4 = vpop.permute.xlu2 %1083 }
 0x38b   : > { %v1130_v53 = vpop.permute.xlu1 %1129 }
 0x38c   : > { %v1134_v55 = vsel %vm4517_vm8, %v3433_v29, %v1130_v53  ;;  %v1135_v28 = vsel %vm4517_vm8, %v1130_v53, %v1132_v42  ;;  %vm3618_vm8 = vmand %vm3562_vm0, %vm4684_vm10  ;;  %v1080_v11 = vpop.permute.xlu0 %1079 }
 0x38d   : > { %2613 = vmatpush.msk.msrb.mxu0 %vm3581_vm3, %v1134_v55  ;;  %2624 = vmatpush.msk.msrb.mxu1 %vm3589_vm4, %v1135_v28  ;;  %vm4527_vm4 = vcmask 277504  }
 0x393   : > { %v1103_v29 = vpop.permute.xlu1 %1102 }
 0x394   : > { %v1107_v61 = vsel %vm4520_vm5, %v1101_v58, %v1103_v29  ;;  %v1108_v0 = vsel %vm4520_vm5, %v1103_v29, %v1105_v30  ;;  %vm4687_vm5 = vcmp.ge.s32.totalorder %v3474_v51, 0  ;;  %v1258_v51 = vld [vmem:[%s4435_s5 + $0x8] sm:$0xff]  ;;  %v1269_v55 = vpop.permute.xlu0 %1268 }
 0x395   : > { %2614 = vmatpush.msk.msrb.mxu0 %vm3562_vm0, %v1107_v61  ;;  %2625 = vmatpush.msk.msrb.mxu1 %vm3569_vm9, %v1108_v0  ;;  %vm3626_vm7 = vmand %vm3569_vm9, %vm4687_vm5  ;;  %vm4690_vm5 = vcmask 588800   ;;  %v1556_v0 = vld [vmem:[%s4438_s8 + $0x8] sm:$0xff] }
 0x396   : > { %vm4691_vm10 = vmmov %vm4690_vm5 }
 0x397   : > { %vm4692_vm9 = vmmov %vm4690_vm5 }
 0x39b   : > { %v1082_v13 = vpop.permute.xlu1 %1081 }
 0x39c   : > { %v1086_v18 = vsel %vm4527_vm4, %v1080_v11, %v1082_v13  ;;  %v1087_v23 = vsel %vm4527_vm4, %v1082_v13, %v1084_v4  ;;  %vm4693_vm4 = vmmov %vm4690_vm5  ;;  %v3713_v4 = vpop.permute.xlu2 %2793  ;;  %v3719_v11 = vpop.permute.xlu0 %2773  ;;  %v1958_v13 = vld [vmem:[%s4440_s10] sm:$0xff] }
 0x39d   : > { %2615 = vmatpush.msk.msrb.mxu0 %vm3618_vm8, %v1086_v18  ;;  %2626 = vmatpush.msk.msrb.mxu1 %vm3626_vm7, %v1087_v23  ;;  %v2776_v23 = vunpack.i.h.bf16 %v3719_v11 }
 0x39e   : > { %2616 = vmatmul.msk.f32.vlgmr.msrb.gmra.mxu0 %vm4690_vm5, %v1257_v54  ;;  %2627 = vmatmul.msk.f32.vlgmr.msrb.gmra.mxu1 %vm4691_vm10, %v1257_v54  ;;  %vm4697_vm5 = vcmask 801792  }
 0x3a4   : > { %v3726_v54 = vpop.permute.xlu2 %2803  ;;  %v3730_v18 = vpop.permute.xlu0 %2778 }
 0x3a5   : > { %v2806_v59 = vunpack.i.h.bf16 %v3726_v54 }
 0x3a6   : > { %2617 = vmatmul.msk.f32.gmra.mxu0 %vm4692_vm9, %v1258_v51  ;;  %2628 = vmatmul.msk.f32.gmra.mxu1 %vm4693_vm4, %v1258_v51  ;;  %vm4694_vm9 = vcmask 785408   ;;  %vm4695_vm4 = vcmask 1031168  }
 0x3a7   : > { %vm4699_vm10 = vmmov %vm4694_vm9 }
 0x3e7   : > { %v1264_v26 = vpop.permute.xlu1 %1263 }
 0x41b   : > { %v1317_v27 = vpop.f32.mrf.mxu1  ;;  %v1294_v16 = vpop.f32.mrf.mxu0 }
 0x41c   : > { %v1318_v38 = vadd.f32 %v1317_v27, %v1264_v26  ;;  %v1295_v41 = vadd.f32 %v1294_v16, %v1264_v26  ;;  %v1555_v27 = vld [vmem:[%s4438_s8] sm:$0xff]  ;;  %v3743_v16 = vpop.permute.xlu0 %2788 }
 0x41d   : > { %v2790_v32 = vunpack.i.l.bf16 %v3743_v16 }
 0x41e   : > { %v3648_v42 = vmax.f32 %v1318_v38, 0.0  ;;  %v3650_v48 = vmax.f32 %v1295_v41, 0.0  ;;  %v2791_v41 = vunpack.i.h.bf16 %v3743_v16  ;;  %v1554_v16 = vld [vmem:[%s4437_s7 + $0x18] sm:$0xff] }
 0x420   : > { %1505 = vrot.lane.b32.xlu2 %v3648_v42, %s2871_s30  ;;  %1481 = vrot.lane.b32.xlu0 %v3648_v42, %s2872_s18 }
 0x421   : > { %1503 = vrot.lane.b32.xlu1 %v3650_v48, %s2871_s30 }
 0x423   : > { %v1320_v53 = vpop.f32.mrf.mxu1  ;;  %v1297_v58 = vpop.f32.mrf.mxu0 }
 0x424   : > { %v1321_v28 = vadd.f32 %v1320_v53, %v1269_v55  ;;  %v1298_v29 = vadd.f32 %v1297_v58, %v1269_v55  ;;  %v3750_v53 = vpop.permute.xlu0 %2798  ;;  %v2784_v55 = vpop.permute.xlu1 %2783 }
 0x425   : > { %v2801_v31 = vunpack.i.h.bf16 %v3750_v53  ;;  %v2800_v39 = vunpack.i.l.bf16 %v3750_v53 }
 0x426   : > { %v3670_v30 = vmax.f32 %v1321_v28, 0.0  ;;  %v3678_v61 = vmax.f32 %v1298_v29, 0.0  ;;  %v2781_v29 = vunpack.i.h.bf16 %v3730_v18 }
 0x428   : > { %1393 = vrot.lane.b32.xlu0 %v3650_v48, %s2875_s29  ;;  %1479 = vrot.lane.b32.xlu2 %v3650_v48, %s2872_s18 }
 0x429   : > { %1455 = vrot.lane.b32.xlu1 %v3650_v48, %s2873_s25 }
 0x430   : > { %1369 = vrot.lane.b32.xlu0 %v3650_v48, %s2876_s28  ;;  %1457 = vrot.lane.b32.xlu2 %v3648_v42, %s2873_s25 }
 0x431   : > { %1417 = vrot.lane.b32.xlu1 %v3650_v48, %s2874_s16 }
 0x438   : > { %1529 = vrot.lane.b32.xlu2 %v3648_v42, %s2870_s0  ;;  %1511 = vrot.lane.b32.xlu0 %v3670_v30, %s2871_s30 }
 0x439   : > { %1527 = vrot.lane.b32.xlu1 %v3650_v48, %s2870_s0 }
 0x440   : > { %1485 = vrot.lane.b32.xlu0 %v3678_v61, %s2872_s18  ;;  %1509 = vrot.lane.b32.xlu2 %v3678_v61, %s2871_s30 }
 0x441   : > { %1419 = vrot.lane.b32.xlu1 %v3648_v42, %s2874_s16 }
 0x448   : > { %1399 = vrot.lane.b32.xlu0 %v3678_v61, %s2875_s29  ;;  %1463 = vrot.lane.b32.xlu2 %v3670_v30, %s2873_s25 }
 0x449   : > { %1487 = vrot.lane.b32.xlu1 %v3670_v30, %s2872_s18 }
 0x450   : > { %1395 = vrot.lane.b32.xlu0 %v3648_v42, %s2875_s29  ;;  %1423 = vrot.lane.b32.xlu2 %v3678_v61, %s2874_s16 }
 0x451   : > { %1461 = vrot.lane.b32.xlu1 %v3678_v61, %s2873_s25 }
 0x458   : > { %1351 = vrot.lane.b32.xlu0 %v3678_v61, %s2877_s22  ;;  %1535 = vrot.lane.b32.xlu2 %v3670_v30, %s2870_s0 }
 0x459   : > { %1533 = vrot.lane.b32.xlu1 %v3678_v61, %s2870_s0 }
 0x460   : > { %1353 = vrot.lane.b32.xlu0 %v3670_v30, %s2877_s22  ;;  %1425 = vrot.lane.b32.xlu2 %v3670_v30, %s2874_s16  ;;  %s4744_s16 = smov 127  }
 0x461   : > { %1375 = vrot.lane.b32.xlu1 %v3678_v61, %s2876_s28 }
 0x468   : > { %1564 = vperm.xlu0 %2769, %v1556_v0   ;;  %1345 = vrot.lane.b32.xlu2 %v3650_v48, %s2877_s22 }
 0x469   : > { %1401 = vrot.lane.b32.xlu1 %v3670_v30, %s2875_s29  ;;  %s4746_s29 = smov 15  }
 0x470   : > { %1961 = vperm.xlu0 %2769, %v1958_v13   ;;  %1371 = vrot.lane.b32.xlu2 %v3648_v42, %s2876_s28 }
 0x471   : > { %1377 = vrot.lane.b32.xlu1 %v3670_v30, %s2876_s28  ;;  %s4696_s28 = smov 112  }
 0x478   : > { %2808 = vrot.lane.b32.xlu2 %v4543_v1, %s2870_s0  ;;  %s4769_s0 = smov 111  }
 0x479   : > { %1347 = vrot.lane.b32.xlu1 %v3648_v42, %s2877_s22  ;;  %s4698_s22 = smov 113  }
 0x47a   : > { %v1506_v51 = vpop.permute.xlu2 %1505 }
 0x47b   : > { %v3738_v26 = vsel %vm4694_vm9, %v1506_v51, %v2776_v23 }
 0x480   : > { %1796 = vrot.lane.b32.xlu2 %v4543_v1, %s2865_s21 }
 0x481   : > { %1559 = vperm.xlu1 %2771, %v1555_v27  }
 0x482   : > { %v1480_v38 = vpop.permute.xlu2 %1479 }
 0x488   : > { %1944 = vrot.lane.b32.xlu2 %v4543_v1, %s2868_s24 }
 0x489   : > { %1871 = vrot.lane.b32.xlu1 %v4543_v1, %s2867_s23 }
 0x48a   : > { %v1458_v28 = vpop.permute.xlu2 %1457 }
 0x48b   : > { %v3755_v58 = vsel %vm4695_vm4, %v1458_v28, %v2791_v41  ;;  %vm4700_vm4 = vmmov %vm4697_vm5 }
 0x490   : > { %2144 = vrot.lane.b32.xlu2 %v3360_v47, %s4696_s28 }
 0x491   : > { %2813 = vrot.lane.b32.xlu1 %v4543_v1, %s4696_s28 }
 0x492   : > { %v3762_v0 = vpop.permute.xlu2 %1529  ;;  %v1482_v13 = vpop.permute.xlu0 %1481 }
 0x493   : > { %v1504_v23 = vpop.permute.xlu1 %1503  ;;  %v3765_v27 = vsel %vm4697_vm5, %v1482_v13, %v2781_v29  ;;  %vm4701_vm5 = vmmov %vm4700_vm4 }
 0x498   : > { %2120 = vrot.lane.b32.xlu2 %v3360_v47, %s4698_s22 }
 0x499   : > { %2818 = vrot.lane.b32.xlu1 %v4543_v1, %s4698_s22  ;;  %v1515_v1 = vsel %vm4694_vm9, %v1504_v23, %v1506_v51  ;;  %v2786_v23 = vunpack.i.h.bf16 %v2784_v55  ;;  %vm4705_vm9 = vcmask 769024  }
 0x49a   : > { %v1510_v41 = vpop.permute.xlu2 %1509  ;;  %v3771_v5 = vpop.permute.xlu0 %1393 }
 0x49b   : > { %v1456_v25 = vpop.permute.xlu1 %1455 }
 0x4a2   : > { %v3773_v19 = vpop.permute.xlu2 %1463  ;;  %v3775_v63 = vpop.permute.xlu0 %1369 }
 0x4a3   : > { %v3777_v15 = vpop.permute.xlu1 %1417 }
 0x4aa   : > { %v3779_v2 = vpop.permute.xlu2 %1423  ;;  %v1512_v29 = vpop.permute.xlu0 %1511 }
 0x4ab   : > { %v1528_v56 = vpop.permute.xlu1 %1527  ;;  %v1517_v57 = vsel %vm4699_vm10, %v1510_v41, %v1512_v29  ;;  %v1491_v41 = vsel %vm4701_vm5, %v1480_v38, %v1482_v13  ;;  %vm4708_vm5 = vcmask 785408  }
 0x4ac   : > { %2629 = vmatpush.msk.msrb.mxu2 %vm3447_vm15, %v1517_v57 }
 0x4ae   : > { %2630 = vmatpush.msk.msrb.mxu2 %vm3447_vm15, %v1515_v1  ;;  %vm4702_vm15 = vcmask 1031168  }
 0x4af   : > { %vm4703_vm10 = vmmov %vm4702_vm15 }
 0x4b2   : > { %v1536_v60 = vpop.permute.xlu2 %1535  ;;  %v1486_v45 = vpop.permute.xlu0 %1485 }
 0x4b3   : > { %v3787_v49 = vpop.permute.xlu1 %1419 }
 0x4ba   : > { %v3789_v24 = vpop.permute.xlu2 %1425  ;;  %v3797_v57 = vpop.permute.xlu0 %1399 }
 0x4bb   : > { %v1488_v40 = vpop.permute.xlu1 %1487 }
 0x4bc   : > { %v1493_v34 = vsel %vm4700_vm4, %v1486_v45, %v1488_v40  ;;  %v1467_v45 = vsel %vm4703_vm10, %v1456_v25, %v1458_v28  ;;  %v2775_v28 = vunpack.i.l.bf16 %v3719_v11  ;;  %vm4707_vm4 = vmmov %vm4705_vm9  ;;  %vm4710_vm10 = vcmask 130048  }
 0x4bd   : > { %2631 = vmatpush.msk.msrb.mxu2 %vm3499_vm12, %v1493_v34  ;;  %v2785_v34 = vunpack.i.l.bf16 %v2784_v55  ;;  %v1552_v55 = vld [vmem:[%s4437_s7 + $0x8] sm:$0xff] }
 0x4be   : > { %v1518_v11 = vsel %vm4708_vm5, %v1512_v29, %v2775_v28  ;;  %vm4719_vm5 = vcmask 277504  }
 0x4bf   : > { %2632 = vmatpush.msk.msrb.mxu2 %vm3499_vm12, %v1491_v41  ;;  %vm4704_vm12 = vcmask 15360  }
 0x4c0   : > { %v1429_v25 = vsel %vm4704_vm12, %v2785_v34, %v3779_v2 }
 0x4c2   : > { %v3799_v1 = vpop.permute.xlu2 %1345  ;;  %v3813_v38 = vpop.permute.xlu0 %1395 }
 0x4c3   : > { %v1462_v33 = vpop.permute.xlu1 %1461 }
 0x4c4   : > { %v1469_v51 = vsel %vm4702_vm15, %v1462_v33, %v3773_v19  ;;  %v2796_v33 = vunpack.i.h.bf16 %v3713_v4  ;;  %vm4709_vm15 = vcmask 244736  }
 0x4c5   : > { %2633 = vmatpush.msk.msrb.mxu2 %vm3521_vm11, %v1469_v51  ;;  %v2780_v51 = vunpack.i.l.bf16 %v3730_v18 }
 0x4c7   : > { %2634 = vmatpush.msk.msrb.mxu2 %vm3521_vm11, %v1467_v45  ;;  %vm4706_vm11 = vmmov %vm4704_vm12  ;;  %vm4713_vm12 = vcmask 261120  }
 0x4c8   : > { %v1427_v41 = vsel %vm4706_vm11, %v2786_v23, %v3777_v15  ;;  %vm4717_vm11 = vcmask 1031168  }
 0x4c9   : > { %2635 = vmatpush.msk.msrb.mxu2 %vm3153_vm13, %v3678_v61  ;;  %v2795_v61 = vunpack.i.l.bf16 %v3713_v4 }
 0x4ca   : > { %v3811_v62 = vpop.permute.xlu2 %1371 }
 0x4cb   : > { %v1534_v13 = vpop.permute.xlu1 %1533  ;;  %2636 = vmatpush.msk.msrb.mxu2 %vm3153_vm13, %v3650_v48  ;;  %v1539_v48 = vsel %vm4707_vm4, %v1528_v56, %v3762_v0  ;;  %v1405_v56 = vsel %vm4709_vm15, %v2795_v61, %v3797_v57 }
 0x4cc   : > { %v1541_v8 = vsel %vm4705_vm9, %v1534_v13, %v1536_v60  ;;  %vm4716_vm9 = vnez %v4656_v35 }
 0x4cd   : > { %2637 = vmatpush.msk.msrb.mxu2 %vm3543_vm14, %v1429_v25  ;;  %2645 = vmatpush.msk.msrb.mxu3 %vm3463_vm1, %v1541_v8  ;;  %v1470_v25 = vsel %vm4717_vm11, %v3773_v19, %v2790_v32  ;;  %v1551_v19 = vld [vmem:[%s4437_s7] sm:$0xff] }
 0x4cf   : > { %2638 = vmatpush.msk.msrb.mxu2 %vm3543_vm14, %v1427_v41  ;;  %2646 = vmatpush.msk.msrb.mxu3 %vm3463_vm1, %v1539_v48  ;;  %vm4711_vm1 = vmmov %vm4709_vm15  ;;  %vm4712_vm14 = vcmask 801792   ;;  %v1669_v48 = vld [vmem:[%s4439_s9] sm:$0xff] }
 0x4d0   : > { %2647 = vmatmul.msk.f32.vlgmr.msrb.gmra.mxu3 %vm4710_vm10, %v1552_v55  ;;  %v1403_v29 = vsel %vm4711_vm1, %v2796_v33, %v3771_v5  ;;  %v1494_v45 = vsel %vm4712_vm14, %v1488_v40, %v2780_v51  ;;  %v2805_v40 = vunpack.i.l.bf16 %v3726_v54  ;;  %vm4721_vm15 = vmmov %vm4719_vm5  ;;  %vm4723_vm1 = vnez %v4580_v36  ;;  %v1553_v54 = vld [vmem:[%s4437_s7 + $0x10] sm:$0xff] }
 0x4d1   : > { %2649 = vmatpush.msk.msra.mxu3 %vm3442_vm6, %v1518_v11  ;;  %2639 = vmatpush.msk.msrb.mxu2 %vm3581_vm3, %v1405_v56  ;;  %v1355_v43 = vsel %vm4721_vm15, %v2806_v59, %v3799_v1  ;;  %vm4724_vm14 = vcmask 15360  }
 0x4d2   : > { %v2809_v4 = vpop.permute.xlu2 %2808 }
 0x4d3   : > { %2650 = vmatpush.msk.msra.mxu3 %vm3442_vm6, %v3738_v26  ;;  %v1376_v18 = vpop.permute.xlu1 %1375  ;;  %v2811_v34 = vunpack.i.h.bf16 %v2809_v4  ;;  %v2810_v13 = vunpack.i.l.bf16 %v2809_v4  ;;  %2640 = vmatpush.msk.msrb.mxu2 %vm3581_vm3, %v1403_v29  ;;  %v1352_v26 = vpop.permute.xlu0 %1351  ;;  %vm4714_vm6 = vmmov %vm4707_vm4 }
 0x4d4   : > { %v1381_v53 = vsel %vm4713_vm12, %v2800_v39, %v1376_v18  ;;  %vm4715_vm3 = vmmov %vm4713_vm12  ;;  %vm4725_vm12 = vnez %v4673_v17 }
 0x4d5   : > { %2651 = vmatpush.msk.msra.mxu3 %vm3491_vm2, %v1494_v45  ;;  %2641 = vmatpush.msk.msrb.mxu2 %vm3562_vm0, %v1381_v53  ;;  %v1542_v23 = vsel %vm4714_vm6, %v1536_v60, %v2810_v13  ;;  %v1379_v50 = vsel %vm4715_vm3, %v2801_v31, %v3775_v63  ;;  %v1540_v60 = vsel %vm4707_vm4, %v3762_v0, %v2811_v34  ;;  %vm4726_vm6 = vmmov %vm4724_vm14  ;;  %vm4728_vm3 = vcmask 244736   ;;  %v2674_v34 = vld [vmem:[%s4439_s9 + $0x10] sm:$0xff] }
 0x4d6   : > { %2665 = vmatpush.msk.msra.mxu0 %vm4716_vm9, %v1542_v23  ;;  %v1428_v3 = vsel %vm4726_vm6, %v3777_v15, %v3787_v49  ;;  %vm4730_vm11 = vmmov %vm4728_vm3  ;;  %vm4731_vm4 = vcmask 261120  }
 0x4d7   : > { %2652 = vmatpush.msk.msra.mxu3 %vm3491_vm2, %v3765_v27  ;;  %2642 = vmatpush.msk.msrb.mxu2 %vm3562_vm0, %v1379_v50  ;;  %vm4718_vm2 = vnez %v4664_v6  ;;  %v1357_v27 = vsel %vm4719_vm5, %v2805_v40, %v1352_v26  ;;  %vm4720_vm0 = vmmov %vm4710_vm10  ;;  %v1430_v6 = vsel %vm4724_vm14, %v3779_v2, %v3789_v24  ;;  %v1404_v49 = vsel %vm4730_vm11, %v3771_v5, %v3813_v38 }
 0x4d8   : > { %2666 = vmatpush.msk.msra.mxu0 %vm4716_vm9, %v1540_v60  ;;  %2648 = vmatmul.msk.f32.gmra.mxu3 %vm4720_vm0, %v1554_v16  ;;  %vm4722_vm10 = vmmov %vm4720_vm0  ;;  %vm4729_vm9 = vnez %v4683_v52 }
 0x4d9   : > { %2653 = vmatpush.msk.msra.mxu3 %vm4718_vm2, %v1470_v25  ;;  %2643 = vmatpush.msk.msrb.mxu2 %vm3618_vm8, %v1357_v27  ;;  %vm4733_vm5 = vmmov %vm4731_vm4  ;;  %v4745_v25 = vmov 0.0  }
 0x4da   : > { %2667 = vmatmul.msk.f32.vlgmr.msra.gmra.mxu0 %vm4722_vm10, %v1552_v55  ;;  %v1380_v17 = vsel %vm4733_vm5, %v3775_v63, %v3811_v62  ;;  %v2677_v55 = vld [vmem:[%s4439_s9 + $0x18] sm:$0xff]  ;;  %v1797_v60 = vpop.permute.xlu2 %1796 }
 0x4db   : > { %2654 = vmatpush.msk.msra.mxu3 %vm4718_vm2, %v3755_v58  ;;  %v1402_v35 = vpop.permute.xlu1 %1401  ;;  %2644 = vmatpush.msk.msrb.mxu2 %vm3618_vm8, %v1355_v43  ;;  %vm4727_vm8 = vmmov %vm4720_vm0  ;;  %v1354_v15 = vpop.permute.xlu0 %1353  ;;  %vm4732_vm2 = vnez %v4677_v20 }
 0x4dc   : > { %1589 = vmatmul.f32.vlgmr.msrb.gmra.mxu2 %v1551_v19  ;;  %vm4734_vm0 = vmmov %vm4721_vm15 }
 0x4dd   : > { %2655 = vmatpush.msk.msra.mxu3 %vm4723_vm1, %v3670_v30  ;;  %v1358_v30 = vsel %vm4734_vm0, %v1352_v26, %v1354_v15  ;;  %vm4735_vm15 = vmmov %vm4734_vm0 }
 0x4df   : > { %2656 = vmatpush.msk.msra.mxu3 %vm4723_vm1, %v3648_v42  ;;  %v1406_v42 = vsel %vm4728_vm3, %v3797_v57, %v1402_v35 }
 0x4e1   : > { %2657 = vmatpush.msk.msra.mxu3 %vm4725_vm12, %v1430_v6 }
 0x4e2   : > { %2668 = vmatmul.msk.f32.gmra.mxu0 %vm4727_vm8, %v1554_v16  ;;  %v1945_v59 = vpop.permute.xlu2 %1944 }
 0x4e3   : > { %2658 = vmatpush.msk.msra.mxu3 %vm4725_vm12, %v1428_v3  ;;  %v1378_v24 = vpop.permute.xlu1 %1377  ;;  %v1565_v57 = vpop.permute.xlu0 %1564 }
 0x4e4   : > { %1592 = vmatmul.f32.gmra.mxu2 %v1553_v54  ;;  %v1382_v2 = vsel %vm4731_vm4, %v1376_v18, %v1378_v24  ;;  %v1721_v24 = vand.u32 1, %v3054_v12 }
 0x4e5   : > { %2659 = vmatpush.msk.msra.mxu3 %vm4729_vm9, %v1406_v42  ;;  %v1717_v42 = vand.u32 1, %v3050_v9 }
 0x4e6   : > { %vm4016_vm11 = vcmp.eq.s32.totalorder %v1721_v24, 1  ;;  %vm4028_vm5 = vcmp.eq.s32.totalorder %v1721_v24, 0 }
 0x4e7   : > { %2660 = vmatpush.msk.msra.mxu3 %vm4729_vm9, %v1404_v49  ;;  %v1718_v49 = vand.u32 1, %v3052_v10 }
 0x4e9   : > { %2661 = vmatpush.msk.msra.mxu3 %vm4732_vm2, %v1382_v2  ;;  %v1722_v2 = vand.u32 1, %v3057_v14 }
 0x4eb   : > { %2662 = vmatpush.msk.msra.mxu3 %vm4732_vm2, %v1380_v17  ;;  %v1348_v58 = vpop.permute.xlu1 %1347  ;;  %v1962_v35 = vpop.permute.xlu0 %1961  ;;  %vm4020_vm4 = vcmp.eq.s32.totalorder %v1722_v2, 1  ;;  %vm4024_vm2 = vcmp.eq.s32.totalorder %v1717_v42, 0 }
 0x4ec   : > { %v1356_v5 = vsel %vm4735_vm15, %v3799_v1, %v1348_v58  ;;  %vm1787_vm0 = vmand %vm4024_vm2, %vm4016_vm11  ;;  %vm1720_vm15 = vcmp.eq.s32.totalorder %v1718_v49, 0 }
 0x4ed   : > { %2663 = vmatpush.msk.msra.mxu3 %vm3626_vm7, %v1358_v30 }
 0x4ef   : > { %2664 = vmatpush.msk.msra.mxu3 %vm3626_vm7, %v1356_v5  ;;  %vm4736_vm7 = vmmov %vm4727_vm8 }
 0x4f0   : > { %1635 = vmatmul.f32.vlgmr.msra.gmra.mxu3 %v1551_v19  ;;  %vm4737_vm10 = vmmov %vm4736_vm7  ;;  %v4004_v19 = vpop.permute.xlu2 %2144 }
 0x4f1   : > { %vm4738_vm14 = vmmov %vm4736_vm7 }
 0x4f2   : > { %vm4739_vm12 = vmmov %vm4736_vm7 }
 0x4f3   : > { %v1560_v63 = vpop.permute.xlu1 %1559  ;;  %vm4740_vm6 = vmmov %vm4736_vm7 }
 0x4f4   : > { %vm4741_vm8 = vmmov %vm4740_vm6 }
 0x4f5   : > { %vm4742_vm3 = vmmov %vm4740_vm6 }
 0x4f6   : > { %vm4743_vm9 = vmmov %vm4742_vm3 }
 0x4f8   : > { %1638 = vmatmul.f32.gmra.mxu3 %v1553_v54  ;;  %v4008_v6 = vpop.permute.xlu2 %2120 }
 0x4fb   : > { %v1872_v27 = vpop.permute.xlu1 %1871 }
 0x503   : > { %v4006_v43 = vpop.permute.xlu1 %2813 }
 0x50b   : > { %v4010_v3 = vpop.permute.xlu1 %2818 }
 0x553   : > { %v1613_v52 = vpop.f32.mrf.mxu3 }
 0x557   : > { %v1659_v11 = vpop.f32.mrf.mxu0 }
 0x55b   : > { %v1616_v38 = vpop.f32.mrf.mxu3 }
 0x55f   : > { %v1590_v0 = vpop.f32.mrf.mxu2  ;;  %v1662_v31 = vpop.f32.mrf.mxu0 }
 0x560   : > { %v1591_v20 = vadd.f32 %v1590_v0, %v1560_v63 }
 0x562   : > { %v1614_v28 = vadd.f32 %v1613_v52, %v1591_v20 }
 0x564   : > { %v1665_v1 = vmax.f32 %v1614_v28, 0.0 }
 0x567   : > { %v1593_v62 = vpop.f32.mrf.mxu2 }
 0x568   : > { %v1594_v8 = vadd.f32 %v1593_v62, %v1565_v57 }
 0x56a   : > { %v1617_v61 = vadd.f32 %v1616_v38, %v1594_v8 }
 0x56c   : > { %v1667_v41 = vmax.f32 %v1617_v61, 0.0 }
 0x56e   : > { %1687 = vmatpush.msra.mxu1 %v1667_v41  ;;  %1754 = vmatpush.msra.mxu2 %v1667_v41 }
 0x56f   : > { %1904 = vmatpush.msrb.mxu3 %v1667_v41 }
 0x570   : > { %1688 = vmatpush.msra.mxu1 %v1665_v1  ;;  %1755 = vmatpush.msra.mxu2 %v1665_v1 }
 0x571   : > { %1905 = vmatpush.msrb.mxu3 %v1665_v1  ;;  %2672 = vmatmul.msk.f32.vlgmr.msra.gmra.mxu2 %vm4736_vm7, %v2671_v7  ;;  %vm4036_vm7 = vcmp.eq.s32.totalorder %v1722_v2, 0 }
 0x572   : > { %2669 = vmatmul.msk.f32.vlgmr.msra.gmra.mxu1 %vm4737_vm10, %v1669_v48  ;;  %2678 = vmatmul.msk.f32.vlgmr.msrb.gmra.mxu3 %vm4738_vm14, %v2677_v55  ;;  %vm1788_vm10 = vmand %vm1720_vm15, %vm4020_vm4  ;;  %vm4757_vm14 = vcmask 7168  }
 0x573   : > { %v1636_v33 = vpop.f32.mrf.mxu3 }
 0x574   : > { %v1637_v56 = vadd.f32 %v1636_v33, %v1560_v63 }
 0x576   : > { %v1660_v4 = vadd.f32 %v1659_v11, %v1637_v56 }
 0x578   : > { %v1666_v18 = vmax.f32 %v1660_v4, 0.0 }
 0x57b   : > { %v1639_v51 = vpop.f32.mrf.mxu3 }
 0x57c   : > { %v1640_v39 = vadd.f32 %v1639_v51, %v1565_v57 }
 0x57e   : > { %v1663_v29 = vadd.f32 %v1662_v31, %v1640_v39 }
 0x580   : > { %v1668_v45 = vmax.f32 %v1663_v29, 0.0 }
 0x582   : > { %1707 = vmatpush.msrb.mxu1 %v1668_v45  ;;  %1774 = vmatpush.msrb.mxu0 %v1668_v45 }
 0x583   : > { %1849 = vmatpush.msrb.mxu2 %v1668_v45 }
 0x584   : > { %1708 = vmatpush.msrb.mxu1 %v1666_v18  ;;  %1775 = vmatpush.msrb.mxu0 %v1666_v18 }
 0x585   : > { %1850 = vmatpush.msrb.mxu2 %v1666_v18  ;;  %2673 = vmatmul.msk.f32.vlgmr.msrb.gmra.mxu0 %vm4739_vm12, %v2671_v7  ;;  %vm4758_vm12 = vmmov %vm4757_vm14 }
 0x586   : > { %1829 = vmatpush.msra.mxu1 %v1667_v41  ;;  %2676 = vmatmul.msk.f32.vlgmr.msrb.gmra.mxu2 %vm4740_vm6, %v2674_v34  ;;  %vm1725_vm6 = vmand %vm4024_vm2, %vm4028_vm5 }
 0x587   : > { %1924 = vmatpush.msra.mxu0 %v1668_v45  ;;  %2670 = vmatmul.msk.f32.vlgmr.msrb.gmra.mxu1 %vm4741_vm8, %v1669_v48  ;;  %vm1726_vm8 = vmand %vm1720_vm15, %vm4036_vm7  ;;  %vm4763_vm15 = vcmask 138240  }
 0x588   : > { %1830 = vmatpush.msra.mxu1 %v1665_v1 }
 0x589   : > { %1925 = vmatpush.msra.mxu0 %v1666_v18 }
 0x58d   : > { %2679 = vmatmul.msk.f32.vlgmr.msra.gmra.mxu0 %vm4742_vm3, %v2677_v55  ;;  %vm4050_vm3 = vcmp.eq.s32.totalorder %v1717_v42, 1 }
 0x58f   : > { %2675 = vmatmul.msk.f32.vlgmr.msra.gmra.mxu1 %vm4743_vm9, %v2674_v34  ;;  %vm1862_vm9 = vmand %vm4050_vm3, %vm4028_vm5  ;;  %vm4770_vm5 = vcmask 916480  }
 0x5ef   : > { %v1690_v53 = vpop.f32.mrf.mxu1 }
 0x5f0   : > { %v1731_v62 = vsel %vm1725_vm6, %v1690_v53, 0.0 }
 0x5f4   : > { %v1757_v13 = vpop.f32.mrf.mxu2 }
 0x5f5   : > { %1798 = vrot.lane.b32.xlu2 %v1757_v13, %s2865_s21  ;;  %v1907_v23 = vpop.f32.mrf.mxu3 }
 0x602   : > { %v1777_v32 = vpop.f32.mrf.mxu0 }
 0x603   : > { %1800 = vrot.lane.b32.xlu0 %v1777_v32, %s2865_s21 }
 0x604   : > { %v1710_v26 = vpop.f32.mrf.mxu1 }
 0x605   : > { %v1732_v38 = vsel %vm1726_vm8, %v1710_v26, 0.0  ;;  %vm4771_vm8 = vmmov %vm4770_vm5 }
 0x609   : > { %v1852_v40 = vpop.f32.mrf.mxu2 }
 0x60a   : > { %1875 = vrot.lane.b32.xlu2 %v1852_v40, %s2867_s23  ;;  %v1927_v50 = vpop.f32.mrf.mxu0 }
 0x60b   : > { %1946 = vrot.lane.b32.xlu0 %v1907_v23, %s2868_s24  ;;  %1948 = vrot.lane.b32.xlu1 %v1927_v50, %s2868_s24  ;;  %v2192_v50 = vld [vmem:[%s4442_s12] sm:$0xff] }
 0x60c   : > { %v1832_v16 = vpop.f32.mrf.mxu1 }
 0x612   : > { %2058 = vrot.lane.b32.xlu2 %v3360_v47, %s2865_s21 }
 0x613   : > { %2096 = vrot.lane.b32.xlu0 %v3360_v47, %s4744_s16  ;;  %1873 = vrot.lane.b32.xlu1 %v1832_v16, %s2867_s23 }
 0x61a   : > { %2008 = vrot.lane.b32.xlu2 %v3358_v46, %s2867_s23 }
 0x61b   : > { %2118 = vrot.lane.b32.xlu0 %v3358_v46, %s4698_s22  ;;  %2823 = vrot.lane.b32.xlu1 %v4745_v25, %s4744_s16 }
 0x622   : > { %1986 = vrot.lane.b32.xlu2 %v3360_v47, %s2868_s24 }
 0x623   : > { %2094 = vrot.lane.b32.xlu0 %v3358_v46, %s4744_s16  ;;  %2142 = vrot.lane.b32.xlu1 %v3358_v46, %s4696_s28 }
 0x62b   : > { %2032 = vrot.lane.b32.xlu0 %v3358_v46, %s4746_s29  ;;  %2056 = vrot.lane.b32.xlu1 %v3358_v46, %s2865_s21 }
 0x633   : > { %2010 = vrot.lane.b32.xlu0 %v3360_v47, %s2867_s23  ;;  %2034 = vrot.lane.b32.xlu1 %v3360_v47, %s4746_s29 }
 0x63b   : > { %2833 = vrot.lane.b32.xlu0 %v4745_v25, %s4746_s29  ;;  %2828 = vrot.lane.b32.xlu1 %v4745_v25, %s2865_s21 }
 0x643   : > { %2838 = vrot.lane.b32.xlu0 %v4745_v25, %s2867_s23  ;;  %1984 = vrot.lane.b32.xlu1 %v3358_v46, %s2868_s24 }
 0x64f   : > { %v1799_v30 = vpop.permute.xlu2 %1798 }
 0x650   : > { %v1802_v5 = vsel %vm4757_vm14, %v1797_v60, %v1799_v30  ;;  %vm4058_vm14 = vcmp.eq.s32.totalorder %v1718_v49, 1 }
 0x651   : > { %v1806_v63 = vsel %vm1787_vm0, %v1802_v5, 0.0  ;;  %vm1863_vm2 = vmand %vm4058_vm14, %vm4036_vm7  ;;  %vm4765_vm7 = vcmask 130048  }
 0x652   : > { %v1808_v28 = vadd.f32 %v1806_v63, %v1731_v62  ;;  %vm1935_vm0 = vmand %vm4050_vm3, %vm4016_vm11  ;;  %vm4767_vm11 = vcmask 1039360   ;;  %vm4772_vm3 = vnez %v4567_v21  ;;  %v2820_v62 = vunpack.i.l.bf16 %v4010_v3 }
 0x653   : > { %vm4766_vm6 = vmmov %vm4765_vm7 }
 0x664   : > { %v1876_v8 = vpop.permute.xlu2 %1875 }
 0x66c   : > { %v4143_v16 = vpop.permute.xlu2 %2058 }
 0x675   : > { %v1801_v54 = vpop.permute.xlu0 %1800 }
 0x676   : > { %v1803_v52 = vsel %vm4758_vm12, %v1799_v30, %v1801_v54  ;;  %vm4764_vm12 = vmmov %vm4763_vm15 }
 0x677   : > { %v1807_v57 = vsel %vm1788_vm10, %v1803_v52, 0.0  ;;  %vm1936_vm10 = vmand %vm4058_vm14, %vm4020_vm4 }
 0x678   : > { %v1809_v61 = vadd.f32 %v1807_v57, %v1732_v38  ;;  %vm4768_vm4 = vmmov %vm4767_vm11 }
 0x679   : > { %vm4774_vm14 = vmmov %vm4770_vm5 }
 0x67d   : > { %v1947_v10 = vpop.permute.xlu0 %1946  ;;  %v1949_v12 = vpop.permute.xlu1 %1948 }
 0x67e   : > { %v1950_v7 = vsel %vm4763_vm15, %v1945_v59, %v1947_v10  ;;  %v1951_v48 = vsel %vm4764_vm12, %v1947_v10, %v1949_v12  ;;  %v4149_v59 = vpop.permute.xlu2 %2008  ;;  %v2816_v10 = vunpack.i.h.bf16 %v4006_v43  ;;  %v2815_v12 = vunpack.i.l.bf16 %v4006_v43 }
 0x67f   : > { %v1954_v39 = vsel %vm1935_vm0, %v1950_v7, 0.0  ;;  %v1955_v4 = vsel %vm1936_vm10, %v1951_v48, 0.0  ;;  %v2821_v43 = vunpack.i.h.bf16 %v4010_v3  ;;  %vm4776_vm0 = vcmask 924672  }
 0x680   : > { %vm4777_vm15 = vmmov %vm4776_vm0  ;;  %vm4778_vm10 = vnez %v4582_v37 }
 0x685   : > { %v2097_v41 = vpop.permute.xlu0 %2096  ;;  %v1874_v1 = vpop.permute.xlu1 %1873 }
 0x686   : > { %v1877_v55 = vsel %vm4765_vm7, %v1872_v27, %v1874_v1  ;;  %v1878_v11 = vsel %vm4766_vm6, %v1874_v1, %v1876_v8  ;;  %v4161_v54 = vpop.permute.xlu2 %1986  ;;  %vm4781_vm7 = vmmov %vm4776_vm0 }
 0x687   : > { %v1881_v33 = vsel %vm1862_vm9, %v1877_v55, 0.0  ;;  %v1882_v56 = vsel %vm1863_vm2, %v1878_v11, 0.0  ;;  %vm4773_vm9 = vnez %v4569_v22  ;;  %vm4775_vm2 = vmmov %vm4770_vm5 }
 0x688   : > { %v1883_v51 = vadd.f32 %v1881_v33, %v1808_v28  ;;  %v1884_v31 = vadd.f32 %v1882_v56, %v1809_v61  ;;  %v2155_v20 = vsel %vm4775_vm2, %v4004_v19, %v2816_v10  ;;  %vm4782_vm6 = vmmov %vm4776_vm0  ;;  %v4784_v56 = vld [vmem:[#allocation7_spill] sm:$0xff] }
 0x689   : > { %v2131_v3 = vsel %vm4782_vm6, %v4008_v6, %v2821_v43  ;;  %vm4796_vm6 = vcmask 121856  }
 0x68a   : > { %v1956_v29 = vadd.f32 %v1954_v39, %v1883_v51  ;;  %v1957_v45 = vadd.f32 %v1955_v4, %v1884_v31 }
 0x68c   : > { %v4083_v18 = vadd.f32 %v1962_v35, %v1956_v29  ;;  %v4085_v34 = vadd.f32 %v1962_v35, %v1957_v45  ;;  %v4789_v45 = vld [vmem:[#allocation4_spill] sm:$0xff] }
 0x68d   : > { %v4087_v13 = vpop.permute.xlu0 %2118  ;;  %v4089_v53 = vpop.permute.xlu1 %2823  ;;  %vm4790_vm2 = vnez %v4789_v45 }
 0x68e   : > { %v2826_v32 = vunpack.i.h.bf16 %v4089_v53  ;;  %2062 = vrot.lane.b32.xlu1 %v4083_v18, %s2865_s21  ;;  %2148 = vrot.lane.b32.xlu2 %v4083_v18, %s4696_s28  ;;  %v2130_v1 = vsel %vm4781_vm7, %v4087_v13, %v4008_v6  ;;  %v2825_v7 = vunpack.i.l.bf16 %v4089_v53  ;;  %v4791_v13 = vld [vmem:[#allocation8_spill] sm:$0xff] }
 0x68f   : > { %2150 = vrot.lane.b32.xlu0 %v4085_v34, %s4696_s28 }
 0x690   : > { %v4099_v26 = vsel %vm4767_vm11, %v2097_v41, %v2826_v32  ;;  %vm4783_vm11 = vmmov %vm4768_vm4  ;;  %v4797_v32 = vld [vmem:[#allocation12_spill] sm:$0xff] }
 0x695   : > { %v2095_v23 = vpop.permute.xlu0 %2094  ;;  %v2143_v60 = vpop.permute.xlu1 %2142 }
 0x696   : > { %v4102_v40 = vsel %vm4768_vm4, %v2095_v23, %v2097_v41  ;;  %2038 = vrot.lane.b32.xlu1 %v4083_v18, %s4746_s29  ;;  %2124 = vrot.lane.b32.xlu2 %v4083_v18, %s4698_s22  ;;  %v2154_v57 = vsel %vm4774_vm14, %v2143_v60, %v4004_v19  ;;  %v4779_v19 = vld [vmem:[#allocation6_spill] sm:$0xff]  ;;  %vm4785_vm4 = vnez %v4784_v56  ;;  %vm4788_vm14 = vmmov %vm4783_vm11  ;;  %v4802_v60 = vld [vmem:[#allocation11_spill] sm:$0xff] }
 0x697   : > { %2126 = vrot.lane.b32.xlu0 %v4085_v34, %s4698_s22  ;;  %vm4780_vm12 = vnez %v4779_v19 }
 0x69d   : > { %v4155_v27 = vpop.permute.xlu1 %2056  ;;  %v4157_v35 = vpop.permute.xlu0 %2032 }
 0x69e   : > { %1990 = vrot.lane.b32.xlu1 %v4083_v18, %s2868_s24  ;;  %2064 = vrot.lane.b32.xlu2 %v4085_v34, %s2865_s21 }
 0x69f   : > { %2102 = vrot.lane.b32.xlu0 %v4085_v34, %s4744_s16 }
 0x6a5   : > { %v2035_v42 = vpop.permute.xlu1 %2034  ;;  %v4163_v24 = vpop.permute.xlu0 %2010 }
 0x6a6   : > { %2172 = vrot.lane.b32.xlu1 %v4083_v18, %s4769_s0  ;;  %2040 = vrot.lane.b32.xlu2 %v4085_v34, %s4746_s29 }
 0x6a7   : > { %2100 = vrot.lane.b32.xlu0 %v4083_v18, %s4744_s16 }
 0x6ad   : > { %v4165_v2 = vpop.permute.xlu1 %2828  ;;  %v4167_v15 = vpop.permute.xlu0 %2833 }
 0x6ae   : > { %2168 = vrot.lane.b32.xlu1 %v3360_v47, %s4769_s0  ;;  %2014 = vrot.lane.b32.xlu2 %v4083_v18, %s2867_s23  ;;  %v2831_v23 = vunpack.i.h.bf16 %v4165_v2 }
 0x6af   : > { %2016 = vrot.lane.b32.xlu0 %v4085_v34, %s2867_s23 }
 0x6b5   : > { %v4169_v30 = vpop.permute.xlu1 %1984  ;;  %v4171_v9 = vpop.permute.xlu0 %2838 }
 0x6b6   : > { %2195 = vperm.xlu1 %2771, %v2192_v50   ;;  %1992 = vrot.lane.b32.xlu2 %v4085_v34, %s2868_s24  ;;  %v2830_v50 = vunpack.i.l.bf16 %v4165_v2  ;;  %v2835_v2 = vunpack.i.l.bf16 %v4167_v15 }
 0x6b7   : > { %2166 = vrot.lane.b32.xlu0 %v3358_v46, %s4769_s0 }
 0x6be   : > { %2174 = vrot.lane.b32.xlu2 %v4085_v34, %s4769_s0 }
 0x6bf   : > { %2848 = vrot.lane.b32.xlu0 %v4745_v25, %s4769_s0 }
 0x6c6   : > { %2843 = vrot.lane.b32.xlu2 %v4745_v25, %s2868_s24 }
 0x6c7   : > { %2383 = vrot.lane.b32.xlu0 %v4745_v25, %s4769_s0 }
 0x6ce   : > { %2371 = vrot.lane.b32.xlu2 %v4745_v25, %s4696_s28 }
 0x6cf   : > { %2327 = vrot.lane.b32.xlu0 %v4745_v25, %s2865_s21 }
 0x6d6   : > { %2359 = vrot.lane.b32.xlu2 %v4745_v25, %s4698_s22 }
 0x6d7   : > { %2315 = vrot.lane.b32.xlu0 %v4745_v25, %s4746_s29 }
 0x6de   : > { %2347 = vrot.lane.b32.xlu2 %v4745_v25, %s4744_s16 }
 0x6e8   : > { %v2149_v49 = vpop.permute.xlu2 %2148 }
 0x6f0   : > { %v2125_v17 = vpop.permute.xlu2 %2124 }
 0x6f8   : > { %v2065_v58 = vpop.permute.xlu2 %2064 }
 0x700   : > { %v2063_v14 = vpop.permute.xlu1 %2062  ;;  %v2041_v5 = vpop.permute.xlu2 %2040 }
 0x701   : > { %v2151_v52 = vpop.permute.xlu0 %2150 }
 0x702   : > { %v2156_v0 = vsel %vm4770_vm5, %v2149_v49, %v2151_v52  ;;  %v2157_v63 = vsel %vm4771_vm8, %v2151_v52, %v2815_v12  ;;  %vm4786_vm5 = vcmask 908288   ;;  %vm4787_vm8 = vcmask 7168  }
 0x703   : > { %2680 = vmatpush.msk.msrb.mxu1 %vm4772_vm3, %v2156_v0  ;;  %2699 = vmatpush.msk.msra.mxu3 %vm4773_vm9, %v2157_v63  ;;  %v2069_v4 = vsel %vm4787_vm8, %v2063_v14, %v2065_v58  ;;  %vm4795_vm7 = vmmov %vm4787_vm8 }
 0x704   : > { %v2067_v53 = vsel %vm4795_vm7, %v4155_v27, %v4143_v16  ;;  %vm4800_vm8 = vmmov %vm4795_vm7  ;;  %vm4803_vm7 = vnez %v4802_v60 }
 0x705   : > { %2681 = vmatpush.msk.msrb.mxu1 %vm4772_vm3, %v2154_v57  ;;  %2700 = vmatpush.msk.msra.mxu3 %vm4773_vm9, %v2155_v20  ;;  %v2191_v20 = vld [vmem:[%s4441_s11 + $0x8] sm:$0xff] }
 0x708   : > { %v2039_v38 = vpop.permute.xlu1 %2038  ;;  %v4191_v8 = vpop.permute.xlu2 %2014 }
 0x709   : > { %v2127_v28 = vpop.permute.xlu0 %2126 }
 0x70a   : > { %v2132_v61 = vsel %vm4776_vm0, %v2125_v17, %v2127_v28  ;;  %v2133_v41 = vsel %vm4777_vm15, %v2127_v28, %v2820_v62  ;;  %vm4792_vm0 = vnez %v4791_v13  ;;  %v4822_v28 = vld [vmem:[#allocation16_spill] sm:$0xff] }
 0x70b   : > { %2682 = vmatpush.msk.msrb.mxu1 %vm4778_vm10, %v2132_v61  ;;  %2701 = vmatpush.msk.msra.mxu3 %vm4780_vm12, %v2133_v41 }
 0x70d   : > { %2683 = vmatpush.msk.msrb.mxu1 %vm4778_vm10, %v2130_v1  ;;  %2702 = vmatpush.msk.msra.mxu3 %vm4780_vm12, %v2131_v3 }
 0x710   : > { %v4209_v48 = vpop.permute.xlu1 %1990  ;;  %v1993_v55 = vpop.permute.xlu2 %1992 }
 0x711   : > { %v2103_v11 = vpop.permute.xlu0 %2102 }
 0x712   : > { %v2109_v33 = vsel %vm4783_vm11, %v2103_v11, %v2825_v7  ;;  %vm4798_vm11 = vnez %v4797_v32  ;;  %v4826_v7 = vld [vmem:[#allocation5_spill] sm:$0xff] }
 0x713   : > { %2703 = vmatpush.msk.msra.mxu3 %vm4785_vm4, %v2109_v33 }
 0x715   : > { %2704 = vmatpush.msk.msra.mxu3 %vm4785_vm4, %v4099_v26 }
 0x717   : > { %2705 = vmatpush.msk.msra.mxu3 %vm4723_vm1, %v4085_v34  ;;  %v4793_v34 = vld [vmem:[#allocation9_spill] sm:$0xff] }
 0x718   : > { %v2173_v6 = vpop.permute.xlu1 %2172  ;;  %v4220_v51 = vpop.permute.xlu2 %2174  ;;  %vm4794_vm15 = vnez %v4793_v34 }
 0x719   : > { %v2180_v31 = vsel %vm4786_vm5, %v2173_v6, %v4220_v51  ;;  %2706 = vmatpush.msk.msra.mxu3 %vm4723_vm1, %v3360_v47  ;;  %v2101_v39 = vpop.permute.xlu0 %2100  ;;  %v2045_v47 = vsel %vm4796_vm6, %v2039_v38, %v2041_v5  ;;  %vm4799_vm5 = vmmov %vm4796_vm6  ;;  %v2840_v5 = vunpack.i.l.bf16 %v4171_v9 }
 0x71a   : > { %v2108_v29 = vsel %vm4788_vm14, %v2101_v39, %v2103_v11  ;;  %2696 = vmatpush.msk.msra.mxu2 %vm4790_vm2, %v2180_v31  ;;  %v2043_v26 = vsel %vm4799_vm5, %v4157_v35, %v2035_v42  ;;  %vm4801_vm14 = vcmask 130048   ;;  %v4804_v42 = vld [vmem:[#allocation10_spill] sm:$0xff] }
 0x71b   : > { %2684 = vmatpush.msk.msrb.mxu1 %vm4792_vm0, %v2108_v29  ;;  %2707 = vmatpush.msk.msra.mxu3 %vm4794_vm15, %v2069_v4  ;;  %vm4805_vm6 = vnez %v4804_v42  ;;  %vm4806_vm5 = vmmov %vm4801_vm14 }
 0x71c   : > { %v2019_v49 = vsel %vm4806_vm5, %v4149_v59, %v4163_v24  ;;  %v4810_v24 = vld [vmem:[#allocation14_spill] sm:$0xff] }
 0x71d   : > { %2685 = vmatpush.msk.msrb.mxu1 %vm4792_vm0, %v4102_v40  ;;  %2708 = vmatpush.msk.msra.mxu3 %vm4794_vm15, %v2067_v53  ;;  %vm4811_vm5 = vnez %v4810_v24 }
 0x71f   : > { %2686 = vmatpush.msk.msrb.mxu1 %vm3153_vm13, %v4083_v18  ;;  %2709 = vmatpush.msk.msra.mxu3 %vm4798_vm11, %v2045_v47  ;;  %v2068_v18 = vsel %vm4800_vm8, %v2830_v50, %v2063_v14  ;;  %v4812_v14 = vld [vmem:[#allocation15_spill] sm:$0xff] }
 0x720   : > { %v2844_v12 = vpop.permute.xlu2 %2843  ;;  %vm4813_vm15 = vnez %v4812_v14  ;;  %v2169_v63 = vpop.permute.xlu1 %2168  ;;  %v2392_v47 = vld [vmem:[%s4444_s14] sm:$0xff] }
 0x721   : > { %2687 = vmatpush.msk.msrb.mxu1 %vm3153_vm13, %v3358_v46  ;;  %2710 = vmatpush.msk.msra.mxu3 %vm4798_vm11, %v2043_v26  ;;  %v2017_v40 = vpop.permute.xlu0 %2016  ;;  %v2836_v46 = vunpack.i.h.bf16 %v4167_v15  ;;  %vm4807_vm11 = vmmov %vm4800_vm8  ;;  %vm4808_vm8 = vcmask 121856   ;;  %v2841_v15 = vunpack.i.h.bf16 %v4171_v9  ;;  %v2845_v43 = vunpack.i.l.bf16 %v2844_v12  ;;  %v2444_v26 = vld [vmem:[#allocation3] sm:$0x1] }
 0x722   : > { %v2021_v16 = vsel %vm4801_vm14, %v4191_v8, %v2017_v40  ;;  %v2066_v17 = vsel %vm4807_vm11, %v2831_v23, %v4155_v27  ;;  %v2044_v58 = vsel %vm4808_vm8, %v2835_v2, %v2039_v38  ;;  %vm4809_vm14 = vcmask 138240   ;;  %v2190_v27 = vld [vmem:[%s4441_s11] sm:$0xff] }
 0x723   : > { %2688 = vmatpush.msk.msrb.mxu1 %vm4803_vm7, %v2068_v18  ;;  %2711 = vmatpush.msk.msra.mxu3 %vm4805_vm6, %v2021_v16  ;;  %v1997_v10 = vsel %vm4809_vm14, %v4209_v48, %v1993_v55  ;;  %vm4814_vm11 = vmmov %vm4809_vm14  ;;  %v2042_v0 = vsel %vm4808_vm8, %v2836_v46, %v4157_v35  ;;  %vm4815_vm14 = vcmask 130048   ;;  %v4817_v35 = vld [vmem:[#allocation13_spill] sm:$0xff]  ;;  %v2846_v62 = vunpack.i.h.bf16 %v2844_v12 }
 0x724   : > { %v1995_v52 = vsel %vm4814_vm11, %v4169_v30, %v4161_v54  ;;  %v2020_v9 = vsel %vm4815_vm14, %v2840_v5, %v4191_v8  ;;  %vm4816_vm11 = vcmask 908288   ;;  %vm4818_vm8 = vnez %v4817_v35 }
 0x725   : > { %2689 = vmatpush.msk.msrb.mxu1 %vm4803_vm7, %v2066_v17  ;;  %2712 = vmatpush.msk.msra.mxu3 %vm4805_vm6, %v2019_v49  ;;  %vm4820_vm6 = vmmov %vm4815_vm14 }
 0x727   : > { %2690 = vmatpush.msk.msrb.mxu1 %vm4811_vm5, %v2044_v58  ;;  %2713 = vmatpush.msk.msra.mxu3 %vm4813_vm15, %v1997_v10 }
 0x728   : > { %v2372_v23 = vpop.permute.xlu2 %2371 }
 0x729   : > { %2691 = vmatpush.msk.msrb.mxu1 %vm4811_vm5, %v2042_v0  ;;  %2714 = vmatpush.msk.msra.mxu3 %vm4813_vm15, %v1995_v52  ;;  %v2167_v57 = vpop.permute.xlu0 %2166  ;;  %vm4819_vm15 = vmmov %vm4815_vm14  ;;  %vm4821_vm14 = vcmask 138240  }
 0x72a   : > { %v2178_v54 = vsel %vm4816_vm11, %v2167_v57, %v2169_v63  ;;  %2257 = vmatmul.f32.vlgmr.msra.gmra.mxu3 %v2190_v27  ;;  %v2018_v38 = vsel %vm4819_vm15, %v2841_v15, %v4149_v59  ;;  %v1996_v8 = vsel %vm4821_vm14, %v2845_v43, %v4209_v48  ;;  %vm4823_vm11 = vnez %v4822_v28  ;;  %vm4824_vm5 = vmmov %vm4821_vm14 }
 0x72b   : > { %2692 = vmatpush.msk.msrb.mxu1 %vm4818_vm8, %v2020_v9  ;;  %2697 = vmatpush.msk.msra.mxu2 %vm4790_vm2, %v2178_v54  ;;  %v1994_v61 = vsel %vm4824_vm5, %v2846_v62, %v4169_v30  ;;  %vm4825_vm15 = vcmask 908288   ;;  %v2196_v30 = vpop.permute.xlu1 %2195 }
 0x72c   : > { %2698 = vmatmul.msk.f32.vlgmr.msra.gmra.mxu2 %vm4820_vm6, %v2191_v20  ;;  %vm4827_vm6 = vnez %v4826_v7  ;;  %vm4828_vm14 = vmmov %vm4825_vm15 }
 0x72d   : > { %2693 = vmatpush.msk.msrb.mxu1 %vm4818_vm8, %v2018_v38  ;;  %vm4829_vm8 = vcmask 130048   ;;  %vm4830_vm5 = vmmov %vm4828_vm14 }
 0x72f   : > { %2694 = vmatpush.msk.msrb.mxu1 %vm4823_vm11, %v1996_v8 }
 0x730   : > { %v2360_v50 = vpop.permute.xlu2 %2359 }
 0x731   : > { %2695 = vmatpush.msk.msrb.mxu1 %vm4823_vm11, %v1994_v61  ;;  %v2849_v41 = vpop.permute.xlu0 %2848 }
 0x732   : > { %v2851_v1 = vunpack.i.h.bf16 %v2849_v41  ;;  %v2850_v59 = vunpack.i.l.bf16 %v2849_v41  ;;  %2217 = vmatmul.f32.vlgmr.msrb.gmra.mxu1 %v2190_v27 }
 0x734   : > { %v2181_v3 = vsel %vm4825_vm15, %v4220_v51, %v2850_v59  ;;  %v2179_v48 = vsel %vm4828_vm14, %v2169_v63, %v2851_v1  ;;  %vm4832_vm15 = vcmask 916480  }
 0x735   : > { %2715 = vmatpush.msk.msrb.mxu0 %vm4827_vm6, %v2181_v3  ;;  %vm4833_vm14 = vmmov %vm4832_vm15 }
 0x737   : > { %2716 = vmatpush.msk.msrb.mxu0 %vm4827_vm6, %v2179_v48 }
 0x738   : > { %2717 = vmatmul.msk.f32.vlgmr.msrb.gmra.mxu0 %vm4829_vm8, %v2191_v20  ;;  %v2348_v40 = vpop.permute.xlu2 %2347  ;;  %vm4831_vm8 = vmmov %vm4830_vm5 }
 0x739   : > { %v2384_v18 = vpop.permute.xlu0 %2383 }
 0x741   : > { %v2328_v49 = vpop.permute.xlu0 %2327 }
 0x749   : > { %v2316_v17 = vpop.permute.xlu0 %2315 }
 0x7ad   : > { %v2258_v31 = vpop.f32.mrf.mxu3 }
 0x7ae   : > { %v2259_v51 = vadd.f32 %v2258_v31, %v2196_v30  ;;  %v4854_v31 = vlaneseq }
 0x7af   : > { %v2218_v55 = vpop.f32.mrf.mxu1  ;;  %v2238_v11 = vpop.f32.mrf.mxu2 }
 0x7b0   : > { %v2219_v33 = vadd.f32 %v2218_v55, %v2196_v30 }
 0x7b2   : > { %v2239_v6 = vadd.f32 %v2238_v11, %v2219_v33 }
 0x7b4   : > { %v4328_v39 = vmax.f32 %v2239_v6, 0.0 }
 0x7b5   : > { %v2278_v4 = vpop.f32.mrf.mxu0 }
 0x7b6   : > { %2329 = vrot.lane.b32.xlu2 %v4328_v39, %s2865_s21  ;;  %2343 = vrot.lane.b32.xlu1 %v4328_v39, %s4744_s16  ;;  %v2279_v29 = vadd.f32 %v2278_v4, %v2259_v51 }
 0x7b7   : > { %2379 = vrot.lane.b32.xlu0 %v4328_v39, %s4769_s0 }
 0x7b8   : > { %v2282_v53 = vmax.f32 %v2279_v29, 0.0 }
 0x7be   : > { %2317 = vrot.lane.b32.xlu1 %v4328_v39, %s4746_s29  ;;  %2381 = vrot.lane.b32.xlu2 %v2282_v53, %s4769_s0 }
 0x7bf   : > { %2367 = vrot.lane.b32.xlu0 %v4328_v39, %s4696_s28 }
 0x7c6   : > { %2305 = vrot.lane.b32.xlu1 %v4328_v39, %s2867_s23  ;;  %2319 = vrot.lane.b32.xlu2 %v2282_v53, %s4746_s29 }
 0x7c7   : > { %2355 = vrot.lane.b32.xlu0 %v4328_v39, %s4698_s22 }
 0x7ce   : > { %2369 = vrot.lane.b32.xlu1 %v2282_v53, %s4696_s28  ;;  %2307 = vrot.lane.b32.xlu2 %v2282_v53, %s2867_s23 }
 0x7cf   : > { %2331 = vrot.lane.b32.xlu0 %v2282_v53, %s2865_s21 }
 0x7d6   : > { %2357 = vrot.lane.b32.xlu1 %v2282_v53, %s4698_s22  ;;  %2295 = vrot.lane.b32.xlu2 %v2282_v53, %s2868_s24  ;;  %s2566_s22 = sshll.u32 %s4856_s27, 1 }
 0x7d7   : > { %2303 = vrot.lane.b32.xlu0 %v4745_v25, %s2867_s23  ;;  %s548_s1 = scalar_lea.vmem %s4447_s17, %s2566_s22 }
 0x7de   : > { %2345 = vrot.lane.b32.xlu1 %v2282_v53, %s4744_s16  ;;  %2395 = vperm.xlu2 %2770, %v2392_v47  }
 0x7df   : > { %2447 = vperm.xlu0 %2769, %v2444_v26  }
 0x7e6   : > { %2293 = vrot.lane.b32.xlu1 %v4328_v39, %s2868_s24 }
 0x7ee   : > { %2291 = vrot.lane.b32.xlu1 %v4745_v25, %s2868_s24 }
 0x810   : > { %v2330_v16 = vpop.permute.xlu2 %2329 }
 0x818   : > { %v2382_v46 = vpop.permute.xlu2 %2381 }
 0x819   : > { %v2386_v2 = vsel %vm4830_vm5, %v2382_v46, %v2384_v18  ;;  %vm4836_vm5 = vcmask 1039360  }
 0x81a   : > { %2728 = vmatpush.msk.msra.mxu0 %vm4827_vm6, %v2386_v2  ;;  %vm4834_vm6 = vcmask 924672  }
 0x820   : > { %v2320_v57 = vpop.permute.xlu2 %2319 }
 0x828   : > { %v2344_v58 = vpop.permute.xlu1 %2343  ;;  %v2308_v54 = vpop.permute.xlu2 %2307 }
 0x829   : > { %v2380_v10 = vpop.permute.xlu0 %2379 }
 0x82a   : > { %v2385_v12 = vsel %vm4831_vm8, %v2380_v10, %v2382_v46  ;;  %vm4845_vm8 = vcmask 130048  }
 0x82b   : > { %2718 = vmatpush.msk.msrb.mxu2 %vm4790_vm2, %v2385_v12  ;;  %vm4835_vm2 = vmmov %vm4834_vm6 }
 0x830   : > { %v2318_v25 = vpop.permute.xlu1 %2317  ;;  %v2296_v60 = vpop.permute.xlu2 %2295 }
 0x831   : > { %v2368_v27 = vpop.permute.xlu0 %2367 }
 0x838   : > { %v2306_v15 = vpop.permute.xlu1 %2305 }
 0x839   : > { %v2356_v63 = vpop.permute.xlu0 %2355  ;;  %v2310_v36 = vsel %vm4845_vm8, %v2306_v15, %v2308_v54 }
 0x840   : > { %v2370_v5 = vpop.permute.xlu1 %2369 }
 0x841   : > { %v2373_v52 = vsel %vm4832_vm15, %v2368_v27, %v2370_v5  ;;  %v2374_v0 = vsel %vm4833_vm14, %v2370_v5, %v2372_v23  ;;  %v2332_v43 = vpop.permute.xlu0 %2331  ;;  %vm4846_vm15 = vmmov %vm4845_vm8  ;;  %vm4848_vm14 = vnez %v4804_v42  ;;  %v2396_v42 = vpop.permute.xlu2 %2395 }
 0x842   : > { %2719 = vmatpush.msk.msrb.mxu2 %vm4772_vm3, %v2373_v52  ;;  %2729 = vmatpush.msk.msra.mxu0 %vm4773_vm9, %v2374_v0  ;;  %vm4837_vm3 = vmmov %vm4836_vm5  ;;  %vm4838_vm9 = vcmask 7168  }
 0x843   : > { %v2333_v37 = vsel %vm4838_vm9, %v2328_v49, %v2330_v16 }
 0x848   : > { %v2358_v20 = vpop.permute.xlu1 %2357 }
 0x849   : > { %v2361_v45 = vsel %vm4834_vm6, %v2356_v63, %v2358_v20  ;;  %v2362_v9 = vsel %vm4835_vm2, %v2358_v20, %v2360_v50  ;;  %v2304_v38 = vpop.permute.xlu0 %2303  ;;  %vm4849_vm6 = vcmask 138240   ;;  %vm4850_vm2 = vnez %v4812_v14  ;;  %v2443_v14 = vld [vmem:[%s4445_s15] sm:$0x1] }
 0x84a   : > { %2720 = vmatpush.msk.msrb.mxu2 %vm4778_vm10, %v2361_v45  ;;  %2730 = vmatpush.msk.msra.mxu0 %vm4780_vm12, %v2362_v9  ;;  %vm4839_vm10 = vmmov %vm4838_vm9  ;;  %vm4840_vm12 = vnez %v4793_v34  ;;  %v2309_v8 = vsel %vm4846_vm15, %v2304_v38, %v2306_v15  ;;  %v2391_v34 = vld [vmem:[%s4443_s13] sm:$0xff] }
 0x84b   : > { %v2334_v19 = vsel %vm4839_vm10, %v2330_v16, %v2332_v43  ;;  %vm2451_vm10 = vcmask 64512  }
 0x850   : > { %v2346_v62 = vpop.permute.xlu1 %2345 }
 0x851   : > { %v2349_v21 = vsel %vm4836_vm5, %v2344_v58, %v2346_v62  ;;  %v2350_v22 = vsel %vm4837_vm3, %v2346_v62, %v2348_v40  ;;  %vm4851_vm5 = vcmask 588800   ;;  %vm4852_vm3 = vmmov %vm4849_vm6  ;;  %v2448_v28 = vpop.permute.xlu0 %2447 }
 0x852   : > { %2721 = vmatpush.msk.msrb.mxu2 %vm4792_vm0, %v2349_v21  ;;  %2731 = vmatpush.msk.msra.mxu0 %vm4785_vm4, %v2350_v22  ;;  %vm4841_vm0 = vcmask 121856   ;;  %vm4853_vm9 = vmmov %vm4851_vm5  ;;  %v2450_v30 = vperm.slane %v2448_v28, 0 }
 0x853   : > { %v2321_v56 = vsel %vm4841_vm0, %v2316_v17, %v2318_v25  ;;  %vm4842_vm4 = vmmov %vm4841_vm0 }
 0x854   : > { %2722 = vmatpush.msk.msrb.mxu2 %vm3153_vm13, %v4328_v39  ;;  %2732 = vmatpush.msk.msra.mxu0 %vm4723_vm1, %v2282_v53  ;;  %v2322_v13 = vsel %vm4842_vm4, %v2318_v25, %v2320_v57  ;;  %vm4843_vm13 = vnez %v4810_v24  ;;  %vm4844_vm1 = vnez %v4797_v32 }
 0x856   : > { %2723 = vmatpush.msk.msrb.mxu2 %vm4803_vm7, %v2333_v37  ;;  %2733 = vmatpush.msk.msra.mxu0 %vm4840_vm12, %v2334_v19  ;;  %vm4847_vm7 = vnez %v4817_v35  ;;  %vm2503_vm12 = vcmp.lt.s32.totalorder %v4854_v31, 256 }
 0x858   : > { %v2294_v44 = vpop.permute.xlu1 %2293  ;;  %2724 = vmatpush.msk.msrb.mxu2 %vm4843_vm13, %v2321_v56  ;;  %2734 = vmatpush.msk.msra.mxu0 %vm4844_vm1, %v2322_v13 }
 0x859   : > { %v2298_v24 = vsel %vm4849_vm6, %v2294_v44, %v2296_v60 }
 0x85a   : > { %2725 = vmatpush.msk.msrb.mxu2 %vm4847_vm7, %v2309_v8  ;;  %2735 = vmatpush.msk.msra.mxu0 %vm4848_vm14, %v2310_v36 }
 0x85c   : > { %2736 = vmatpush.msk.msra.mxu0 %vm4850_vm2, %v2298_v24 }
 0x85d   : > { %2737 = vmatmul.msk.f32.vlgmr.msra.gmra.mxu0 %vm4851_vm5, %v2391_v34 }
 0x860   : > { %v2292_v32 = vpop.permute.xlu1 %2291 }
 0x861   : > { %v2297_v61 = vsel %vm4852_vm3, %v2292_v32, %v2294_v44 }
 0x862   : > { %2726 = vmatpush.msk.msrb.mxu2 %vm4823_vm11, %v2297_v61  ;;  %vm2498_vm11 = vcmask 1040384  }
 0x863   : > { %2727 = vmatmul.msk.f32.vlgmr.msrb.gmra.mxu2 %vm4853_vm9, %v2391_v34 }
 0x8da   : > { %v2438_v35 = vpop.f32.mrf.mxu0 }
 0x8db   : > { %v2439_v41 = vadd.f32 %v2438_v35, %v2396_v42 }
 0x8dd   : > { %v2442_v1 = vmax.f32 %v2439_v41, 0.0 }
 0x8df   : > { %2490 = vmatpush.msra.mxu2 %v2442_v1 }
 0x8e0   : > { %2739 = vmatmul.msk.f32.vlgmr.msra.gmra.mxu2 %vm2451_vm10, %v2443_v14 }
 0x8e6   : > { %v2418_v59 = vpop.f32.mrf.mxu2 }
 0x8e7   : > { %v2419_v3 = vadd.f32 %v2418_v59, %v2396_v42 }
 0x8e9   : > { %v2441_v7 = vmax.f32 %v2419_v3, 0.0 }
 0x8eb   : > { %2470 = vmatpush.msra.mxu1 %v2441_v7 }
 0x8ec   : > { %2738 = vmatmul.msk.f32.vlgmr.msra.gmra.mxu1 %vm2451_vm10, %v2443_v14 }
 0x963   : > { %v2492_v48 = vpop.f32.mrf.mxu2 }
 0x964   : > { %v2493_v55 = vadd.f32 %v2492_v48, %v2450_v30 }
 0x966   : > { %v2497_v33 = vrot.slane %v2493_v55, 7 }
 0x969   : > { %v2472_v11 = vpop.f32.mrf.mxu1 }
 0x96a   : > { %v2473_v6 = vadd.f32 %v2472_v11, %v2450_v30 }
 0x96c   : > { %v2499_v39 = vsel %vm2498_vm11, %v2473_v6, %v2497_v33 }
 0x96d   : > { %2505 = vst.msk [vmem:[%s548_s1] sm:$0x3] %vm2503_vm12, %v2499_v39 }
 0x96e PF: > { %s29_s26 = sadd.s32 1, %s2858_s26  }
 0x96f   : > { %p26_p4 = scmp.ge.s32.totalorder %s29_s26, 4  }
 0x971   :  { %28 = sbr.rel (!%p26_p4) target bundleno = 3 (0x3), region = 121 }

</bundles_post_ra>
